<compile_context>
chip_gen: v7x
topology: tpu7x:2x2x1
jax: 0.10.0
libtpu: 0.0.40
codegen_flags: <defaults>
</compile_context>

<pallas_src>
import functools

import jax
import jax.numpy as jnp
from jax import lax
from jax.experimental import pallas as pl
from jax.experimental.pallas import tpu as pltpu

K_SIZE = 4
STRIDE = 2
PAD = 1
BN_EPS = 1e-5
LEAKY_SLOPE = 0.2


# ---------------------------------------------------------------------------
# Pallas kernel: one conv (k=4, s=2, p=1) as 4 shifted MXU matmuls on a
# space-to-depth tile, fused with bias + activation / BN-stats reduction.
# ---------------------------------------------------------------------------
def _conv_s2d_kernel(main_ref, halo_ref, w_ref, b_ref, *out_refs,
                     mode, tho, wo, c4, cout):
    """One grid step = `tho` output rows (full width) of one image.

    main_ref : (1, tho, Wo+1, 4*Cin) bf16   s2d rows [i*tho, (i+1)*tho)
    halo_ref : (1, 1,   Wo+1, 4*Cin) bf16   s2d row  (i+1)*tho   (row halo)
    w_ref    : (4, 4*Cin, Cout)      bf16   tap t = 2a+b -> (4Cin, Cout)
    b_ref    : (1, Cout)             f32    conv bias
    out_refs : (o_ref,)                         for mode 'leaky'/'sigmoid'
               (o_ref, sum_ref, sq_ref)         for mode 'linear_stats'
      o_ref  : (1, tho*Wo, Cout)
      sum/sq : (1, 1, 1, Cout) f32  per-tile channel sum / sum-of-squares
    """
    o_ref = out_refs[0]

    acc = None
    for a in (0, 1):
        for b in (0, 1):
            if a == 0:
                xab = main_ref[0, :, b:b + wo, :]
            elif tho == 1:
                xab = halo_ref[0, :, b:b + wo, :]
            else:
                xab = jnp.concatenate(
                    [main_ref[0, 1:, b:b + wo, :],
                     halo_ref[0, :, b:b + wo, :]], axis=0)
            xab = xab.reshape(tho * wo, c4)
            part = jnp.dot(xab, w_ref[2 * a + b],
                           preferred_element_type=jnp.float32)
            acc = part if acc is None else acc + part
    acc = acc + b_ref[...]                                  # (tho*wo, Cout) f32

    if mode == "leaky":
        acc = jnp.where(acc >= 0.0, acc, LEAKY_SLOPE * acc)
    elif mode == "sigmoid":
        acc = pl.reciprocal(1.0 + jnp.exp(-acc), approx=True)
        acc = jnp.minimum(acc, 1.0)                         # guard approx overshoot
    elif mode == "linear_stats":
        # BatchNorm batch statistics: partial reductions over this tile's rows.
        out_refs[1][0, 0] = jnp.sum(acc, axis=0, keepdims=True)
        out_refs[2][0, 0] = jnp.sum(acc * acc, axis=0, keepdims=True)

    o_ref[0] = acc.astype(o_ref.dtype)


def _pick_tho(ho, wo, c4, itemsize=2, max_rows=2048, max_bytes=1 << 20):
    """Largest divisor of `ho` whose main tile fits the row / VMEM budget.
    Keeps the flattened output block 8-row aligned unless it spans the image."""
    good = []
    for cand in range(1, ho + 1):
        if ho % cand:
            continue
        if cand != ho and (cand * wo) % 8 != 0:
            continue
        if cand * wo <= max_rows and cand * (wo + 1) * c4 * itemsize <= max_bytes:
            good.append(cand)
    return max(good) if good else ho


def _conv_layer(s2d, w, b, *, mode):
    """Run one conv layer given its space-to-depth input.

    s2d : (N, Ho+1, Wo+1, 4*Cin) bf16
    w   : (4, 4*Cin, Cout) bf16
    b   : (1, Cout) f32
    Returns y of shape (N, Ho*Wo, Cout), plus (sum, sumsq) partials when
    mode == 'linear_stats'.
    """
    n, hs, ws, c4 = s2d.shape
    ho, wo = hs - 1, ws - 1
    cout = w.shape[-1]
    tho = _pick_tho(ho, wo, c4)
    gi = ho // tho
    grid = (n, gi)
    with_stats = mode == "linear_stats"
    out_dtype = jnp.float32 if mode == "sigmoid" else jnp.bfloat16

    in_specs = [
        # main rows of the tile (a=0 taps), streamed/pipelined per grid step
        pl.BlockSpec((1, tho, ws, c4), lambda i, j: (i, j, 0, 0)),
        # one extra halo row for the a=1 taps (block shape 1 -> element-aligned)
        pl.BlockSpec((1, 1, ws, c4), lambda i, j: (i, (j + 1) * tho, 0, 0)),
        # weights and bias stay resident in VMEM across the grid
        pl.BlockSpec((4, c4, cout), lambda i, j: (0, 0, 0)),
        pl.BlockSpec((1, cout), lambda i, j: (0, 0)),
    ]
    out_shape = (jax.ShapeDtypeStruct((n, ho * wo, cout), out_dtype),)
    out_specs = (pl.BlockSpec((1, tho * wo, cout), lambda i, j: (i, j, 0)),)
    if with_stats:
        out_shape += (jax.ShapeDtypeStruct((n, gi, 1, cout), jnp.float32),) * 2
        out_specs += (pl.BlockSpec((1, 1, 1, cout), lambda i, j: (i, j, 0, 0)),) * 2

    flops = 2 * n * ho * wo * 4 * c4 * cout
    bytes_accessed = (s2d.size * s2d.dtype.itemsize
                      + w.size * w.dtype.itemsize
                      + n * ho * wo * cout * jnp.dtype(out_dtype).itemsize)
    transcendentals = n * ho * wo * cout if mode == "sigmoid" else 0

    return pl.pallas_call(
        functools.partial(_conv_s2d_kernel, mode=mode, tho=tho, wo=wo,
                          c4=c4, cout=cout),
        grid=grid,
        in_specs=in_specs,
        out_specs=out_specs if with_stats else out_specs[0],
        out_shape=out_shape if with_stats else out_shape[0],
        compiler_params=pltpu.CompilerParams(
            dimension_semantics=("parallel", "parallel"),
            vmem_limit_bytes=32 * 1024 * 1024),
        cost_estimate=pl.CostEstimate(
            flops=int(flops),
            transcendentals=int(transcendentals),
            bytes_accessed=int(bytes_accessed)),
    )(s2d, s2d, w, b)


# ---------------------------------------------------------------------------
# JAX-side plumbing (layout transforms, fused elementwise prep, parameters)
# ---------------------------------------------------------------------------
def _space_to_depth(x):
    """(N,H,W,C) -> (N, H/2+1, W/2+1, 4C): zero-pad by 1 and fold 2x2 spatial
    blocks into channels so the k=4/s=2 conv becomes a 2x2/s=1 conv."""
    n, h, w, c = x.shape
    xp = jnp.pad(x, ((0, 0), (PAD, PAD), (PAD, PAD), (0, 0)))
    hp, wp = h + 2 * PAD, w + 2 * PAD
    s = xp.reshape(n, hp // 2, 2, wp // 2, 2, c)
    s = jnp.transpose(s, (0, 1, 3, 2, 4, 5))          # (n, R, Q, p, q, ci)
    return s.reshape(n, hp // 2, wp // 2, 4 * c)      # channel = (2p+q)*C + ci


def _leaky(x):
    return jnp.where(x >= 0.0, x, LEAKY_SLOPE * x)


@functools.partial(jax.jit, static_argnums=(2,))
def _forward_impl(x_nchw, arrays, modes):
    x = jnp.transpose(x_nchw, (0, 2, 3, 1)).astype(jnp.float32)   # NCHW -> NHWC
    pend = None   # (scale, shift) of the previous layer's BatchNorm
    for p, mode in zip(arrays, modes):
        if pend is not None:
            # Previous layer's BN affine + LeakyReLU, fused by XLA with the
            # space-to-depth prep (y is read from HBM exactly once here).
            scale, shift = pend
            x = _leaky(x.astype(jnp.float32) * scale + shift)
            pend = None
        s2d = _space_to_depth(x).astype(jnp.bfloat16)
        n, hs, ws, _ = s2d.shape
        ho, wo = hs - 1, ws - 1
        cout = p["w"].shape[-1]
        if mode == "bn":
            y, ssum, ssq = _conv_layer(s2d, p["w"], p["b"], mode="linear_stats")
            m = n * ho * wo
            tot = jnp.sum(ssum, axis=(0, 1, 2))
            totsq = jnp.sum(ssq, axis=(0, 1, 2))
            mean = tot / m
            var = jnp.maximum(totsq / m - mean * mean, 0.0)   # biased batch var
            scale = p["gamma"] * lax.rsqrt(var + BN_EPS)
            shift = p["beta"] - mean * scale
            pend = (scale, shift)
        else:                      # 'leaky' or 'sigmoid' are applied in-kernel
            y = _conv_layer(s2d, p["w"], p["b"], mode=mode)
        x = y.reshape(n, ho, wo, cout)
    return jnp.transpose(x, (0, 3, 1, 2))                        # NHWC -> NCHW


def discriminator_forward(x_nchw, params):
    modes = tuple(p["mode"] for p in params)
    arrays = [{k: v for k, v in p.items() if k != "mode"} for p in params]
    n_convs = len(params)
    h, w = x_nchw.shape[2], x_nchw.shape[3]
    assert h % (2 ** n_convs) == 0 and w % (2 ** n_convs) == 0, (
        "spatial dims must be divisible by 2**(n_layers + 2)")
    return _forward_impl(x_nchw, arrays, modes)


def init_discriminator_params(key, in_channels=3, n_layers=2, start_channels=32):
    """Mirror weights_init(): conv W ~ N(0, 0.02), BN gamma ~ N(1, 0.02),
    BN beta = 0; conv bias keeps the default uniform init.  Conv weights are
    stored pre-arranged for the space-to-depth kernel:
    w[t=2a+b, (2p+q)*Cin + ci, co] = W_pt[co, ci, 2a+p, 2b+q] (bf16)."""
    def conv_params(k, cin, cout):
        kw, kb = jax.random.split(k)
        w_pt = 0.02 * jax.random.normal(kw, (cout, cin, K_SIZE, K_SIZE),
                                        jnp.float32)
        w6 = w_pt.reshape(cout, cin, 2, 2, 2, 2)          # (co, ci, a, p, b, q)
        w = jnp.transpose(w6, (2, 4, 3, 5, 1, 0)).reshape(4, 4 * cin, cout)
        bound = 1.0 / float(cin * K_SIZE * K_SIZE) ** 0.5
        b = jax.random.uniform(kb, (1, cout), jnp.float32, -bound, bound)
        return w.astype(jnp.bfloat16), b

    keys = jax.random.split(key, n_layers + 2)
    params = []
    w, b = conv_params(keys[0], in_channels, start_channels)
    params.append(dict(w=w, b=b, mode="leaky"))
    prev = start_channels
    for n in range(1, n_layers + 1):
        cout = start_channels * min(2 ** n, 4)
        kc, kbn = jax.random.split(keys[n])
        w, b = conv_params(kc, prev, cout)
        params.append(dict(
            w=w, b=b,
            gamma=1.0 + 0.02 * jax.random.normal(kbn, (cout,), jnp.float32),
            beta=jnp.zeros((cout,), jnp.float32),
            mode="bn"))
        prev = cout
    w, b = conv_params(keys[n_layers + 1], prev, 1)
    params.append(dict(w=w, b=b, mode="sigmoid"))
    return params


# ---------------------------------------------------------------------------
# Pure-JAX reference (lax.conv + BatchNorm) for validation
# ---------------------------------------------------------------------------
def _reference_forward(x_nchw, params):
    x = x_nchw.astype(jnp.float32)
    for p in params:
        w = p["w"].astype(jnp.float32)
        _, c4, cout = w.shape
        cin = c4 // 4
        w6 = w.reshape(2, 2, 2, 2, cin, cout)              # (a, b, p, q, ci, co)
        w_pt = jnp.transpose(w6, (5, 4, 0, 2, 1, 3)).reshape(cout, cin, 4, 4)
        y = lax.conv_general_dilated(
            x, w_pt, window_strides=(STRIDE, STRIDE),
            padding=((PAD, PAD), (PAD, PAD)),
            dimension_numbers=("NCHW", "OIHW", "NCHW"))
        y = y + p["b"].reshape(1, cout, 1, 1)
        if p["mode"] == "leaky":
            y = _leaky(y)
        elif p["mode"] == "bn":
            mean = jnp.mean(y, axis=(0, 2, 3), keepdims=True)
            var = jnp.mean(jnp.square(y - mean), axis=(0, 2, 3), keepdims=True)
            y = (y - mean) * lax.rsqrt(var + BN_EPS)
            y = y * p["gamma"].reshape(1, cout, 1, 1) + p["beta"].reshape(1, cout, 1, 1)
            y = _leaky(y)
        else:
            y = jax.nn.sigmoid(y)
        x = y
    return x


if __name__ == "__main__":
    key = jax.random.PRNGKey(0)
    pkey, xkey = jax.random.split(key)

    # Small demo shapes: batch=2, in_channels=3, spatial=32 -> output (2, 1, 2, 2)
    x = jax.random.normal(xkey, (2, 3, 32, 32), jnp.float32)
    params = init_discriminator_params(pkey, in_channels=3, n_layers=2,
                                       start_channels=32)

    out = jax.block_until_ready(discriminator_forward(x, params))
    assert out.shape == (2, 1, 2, 2), out.shape
    assert bool(jnp.all((out >= 0.0) & (out <= 1.0)))

    ref = jax.block_until_ready(_reference_forward(x, params))
    max_err = float(jnp.max(jnp.abs(out.astype(jnp.float32) - ref)))
    assert max_err < 5e-2, f"mismatch vs pure-JAX reference: {max_err}"

    print("KERNEL_OK")
</pallas_src>

<mosaic_0001>
module attributes {stable_mosaic.version = 11 : i64} {
  func.func @_conv_s2d_kernel(%arg0: i32, %arg1: i32, %arg2: memref<1x16x17x12xbf16, #tpu.memory_space<vmem>>, %arg3: memref<1x1x17x12xbf16, #tpu.memory_space<vmem>>, %arg4: memref<4x12x32xbf16, #tpu.memory_space<vmem>>, %arg5: memref<1x32xf32, #tpu.memory_space<vmem>>, %arg6: memref<1x256x32xbf16, #tpu.memory_space<vmem>>) attributes {dimension_semantics = [#tpu.dimension_semantics<parallel>, #tpu.dimension_semantics<parallel>], iteration_bounds = array<i64: 2, 1>, scalar_prefetch = 0 : i64, scratch_operands = 0 : i64, tpu.core_type = #tpu.core_type<tc>, window_params = [{transform_indices = @transform_0, window_bounds = array<i64: 1, 16, 17, 12>}, {transform_indices = @transform_1, window_bounds = array<i64: 1, 1, 17, 12>}, {pipeline_mode = #tpu.pipeline_mode<synchronous>, transform_indices = @transform_2, window_bounds = array<i64: 4, 12, 32>}, {pipeline_mode = #tpu.pipeline_mode<synchronous>, transform_indices = @transform_3, window_bounds = array<i64: 1, 32>}, {transform_indices = @transform_4, window_bounds = array<i64: 1, 256, 32>}]} {
    %c0 = arith.constant 0 : index
    %c0_0 = arith.constant 0 : index
    %c0_1 = arith.constant 0 : index
    %c0_2 = arith.constant 0 : index
    %0 = vector.load %arg2[%c0, %c0_0, %c0_1, %c0_2] : memref<1x16x17x12xbf16, #tpu.memory_space<vmem>>, vector<1x16x16x12xbf16>
    %1 = vector.shape_cast %0 : vector<1x16x16x12xbf16> to vector<16x16x12xbf16>
    %2 = vector.shape_cast %1 : vector<16x16x12xbf16> to vector<256x12xbf16>
    %c0_3 = arith.constant 0 : index
    %c0_4 = arith.constant 0 : index
    %c0_5 = arith.constant 0 : index
    %3 = vector.load %arg4[%c0_3, %c0_4, %c0_5] : memref<4x12x32xbf16, #tpu.memory_space<vmem>>, vector<1x12x32xbf16>
    %4 = vector.shape_cast %3 : vector<1x12x32xbf16> to vector<12x32xbf16>
    %cst = arith.constant dense<0.000000e+00> : vector<256x32xf32>
    %5 = tpu.matmul %2, %4, %cst {dimension_numbers = #tpu.dot_dimension_numbers<[1], [0], [0], [1], [0, 0, 1, 1], [], []>} : vector<256x12xbf16>, vector<12x32xbf16>, vector<256x32xf32> -> vector<256x32xf32>
    %c0_6 = arith.constant 0 : index
    %c0_7 = arith.constant 0 : index
    %c1 = arith.constant 1 : index
    %c0_8 = arith.constant 0 : index
    %6 = vector.load %arg2[%c0_6, %c0_7, %c1, %c0_8] : memref<1x16x17x12xbf16, #tpu.memory_space<vmem>>, vector<1x16x16x12xbf16>
    %7 = vector.shape_cast %6 : vector<1x16x16x12xbf16> to vector<16x16x12xbf16>
    %8 = vector.shape_cast %7 : vector<16x16x12xbf16> to vector<256x12xbf16>
    %c1_9 = arith.constant 1 : index
    %c0_10 = arith.constant 0 : index
    %c0_11 = arith.constant 0 : index
    %9 = vector.load %arg4[%c1_9, %c0_10, %c0_11] : memref<4x12x32xbf16, #tpu.memory_space<vmem>>, vector<1x12x32xbf16>
    %10 = vector.shape_cast %9 : vector<1x12x32xbf16> to vector<12x32xbf16>
    %cst_12 = arith.constant dense<0.000000e+00> : vector<256x32xf32>
    %11 = tpu.matmul %8, %10, %cst_12 {dimension_numbers = #tpu.dot_dimension_numbers<[1], [0], [0], [1], [0, 0, 1, 1], [], []>} : vector<256x12xbf16>, vector<12x32xbf16>, vector<256x32xf32> -> vector<256x32xf32>
    %12 = arith.addf %5, %11 : vector<256x32xf32>
    %c0_13 = arith.constant 0 : index
    %c1_14 = arith.constant 1 : index
    %c0_15 = arith.constant 0 : index
    %c0_16 = arith.constant 0 : index
    %13 = vector.load %arg2[%c0_13, %c1_14, %c0_15, %c0_16] : memref<1x16x17x12xbf16, #tpu.memory_space<vmem>>, vector<1x15x16x12xbf16>
    %14 = vector.shape_cast %13 : vector<1x15x16x12xbf16> to vector<15x16x12xbf16>
    %c0_17 = arith.constant 0 : index
    %c0_18 = arith.constant 0 : index
    %c0_19 = arith.constant 0 : index
    %c0_20 = arith.constant 0 : index
    %15 = vector.load %arg3[%c0_17, %c0_18, %c0_19, %c0_20] : memref<1x1x17x12xbf16, #tpu.memory_space<vmem>>, vector<1x1x16x12xbf16>
    %16 = vector.shape_cast %15 : vector<1x1x16x12xbf16> to vector<1x16x12xbf16>
    %17 = tpu.concatenate %14, %16 in 0 : vector<15x16x12xbf16>, vector<1x16x12xbf16> -> vector<16x16x12xbf16>
    %18 = vector.shape_cast %17 : vector<16x16x12xbf16> to vector<256x12xbf16>
    %c2 = arith.constant 2 : index
    %c0_21 = arith.constant 0 : index
    %c0_22 = arith.constant 0 : index
    %19 = vector.load %arg4[%c2, %c0_21, %c0_22] : memref<4x12x32xbf16, #tpu.memory_space<vmem>>, vector<1x12x32xbf16>
    %20 = vector.shape_cast %19 : vector<1x12x32xbf16> to vector<12x32xbf16>
    %cst_23 = arith.constant dense<0.000000e+00> : vector<256x32xf32>
    %21 = tpu.matmul %18, %20, %cst_23 {dimension_numbers = #tpu.dot_dimension_numbers<[1], [0], [0], [1], [0, 0, 1, 1], [], []>} : vector<256x12xbf16>, vector<12x32xbf16>, vector<256x32xf32> -> vector<256x32xf32>
    %22 = arith.addf %12, %21 : vector<256x32xf32>
    %c0_24 = arith.constant 0 : index
    %c1_25 = arith.constant 1 : index
    %c1_26 = arith.constant 1 : index
    %c0_27 = arith.constant 0 : index
    %23 = vector.load %arg2[%c0_24, %c1_25, %c1_26, %c0_27] : memref<1x16x17x12xbf16, #tpu.memory_space<vmem>>, vector<1x15x16x12xbf16>
    %24 = vector.shape_cast %23 : vector<1x15x16x12xbf16> to vector<15x16x12xbf16>
    %c0_28 = arith.constant 0 : index
    %c0_29 = arith.constant 0 : index
    %c1_30 = arith.constant 1 : index
    %c0_31 = arith.constant 0 : index
    %25 = vector.load %arg3[%c0_28, %c0_29, %c1_30, %c0_31] : memref<1x1x17x12xbf16, #tpu.memory_space<vmem>>, vector<1x1x16x12xbf16>
    %26 = vector.shape_cast %25 : vector<1x1x16x12xbf16> to vector<1x16x12xbf16>
    %27 = tpu.concatenate %24, %26 in 0 : vector<15x16x12xbf16>, vector<1x16x12xbf16> -> vector<16x16x12xbf16>
    %28 = vector.shape_cast %27 : vector<16x16x12xbf16> to vector<256x12xbf16>
    %c3 = arith.constant 3 : index
    %c0_32 = arith.constant 0 : index
    %c0_33 = arith.constant 0 : index
    %29 = vector.load %arg4[%c3, %c0_32, %c0_33] : memref<4x12x32xbf16, #tpu.memory_space<vmem>>, vector<1x12x32xbf16>
    %30 = vector.shape_cast %29 : vector<1x12x32xbf16> to vector<12x32xbf16>
    %cst_34 = arith.constant dense<0.000000e+00> : vector<256x32xf32>
    %31 = tpu.matmul %28, %30, %cst_34 {dimension_numbers = #tpu.dot_dimension_numbers<[1], [0], [0], [1], [0, 0, 1, 1], [], []>} : vector<256x12xbf16>, vector<12x32xbf16>, vector<256x32xf32> -> vector<256x32xf32>
    %32 = arith.addf %22, %31 : vector<256x32xf32>
    %c0_35 = arith.constant 0 : index
    %c0_36 = arith.constant 0 : index
    %33 = vector.load %arg5[%c0_35, %c0_36] : memref<1x32xf32, #tpu.memory_space<vmem>>, vector<1x32xf32>
    %34 = vector.broadcast %33 : vector<1x32xf32> to vector<256x32xf32>
    %35 = arith.addf %32, %34 : vector<256x32xf32>
    %cst_37 = arith.constant 0.000000e+00 : f32
    %36 = vector.broadcast %cst_37 : f32 to vector<256x32xf32>
    %37 = arith.cmpf oge, %35, %36 : vector<256x32xf32>
    %cst_38 = arith.constant 2.000000e-01 : f32
    %38 = vector.broadcast %cst_38 : f32 to vector<256x32xf32>
    %39 = arith.mulf %38, %35 : vector<256x32xf32>
    %40 = arith.select %37, %35, %39 : vector<256x32xi1>, vector<256x32xf32>
    %41 = arith.truncf %40 : vector<256x32xf32> to vector<256x32xbf16>
    %c0_39 = arith.constant 0 : index
    %c0_40 = arith.constant 0 : index
    %c0_41 = arith.constant 0 : index
    %42 = vector.load %arg6[%c0_39, %c0_40, %c0_41] : memref<1x256x32xbf16, #tpu.memory_space<vmem>>, vector<1x256x32xbf16>
    %43 = vector.shape_cast %42 : vector<1x256x32xbf16> to vector<256x32xbf16>
    %44 = vector.shape_cast %41 : vector<256x32xbf16> to vector<1x256x32xbf16>
    tpu.vector_store %arg6[%c0_39, %c0_40, %c0_41], %44 {strides = array<i32>} : memref<1x256x32xbf16, #tpu.memory_space<vmem>>, vector<1x256x32xbf16>,
    return
  }
  func.func @transform_0(%arg0: i32, %arg1: i32) -> (i32, i32, i32, i32) {
    %c0_i32 = arith.constant 0 : i32
    %c0_i32_0 = arith.constant 0 : i32
    %c0_i32_1 = arith.constant 0 : i32
    return %arg0, %arg1, %c0_i32, %c0_i32_0 : i32, i32, i32, i32
  }
  func.func @transform_1(%arg0: i32, %arg1: i32) -> (i32, i32, i32, i32) {
    %c1_i32 = arith.constant 1 : i32
    %0 = arith.addi %arg1, %c1_i32 : i32
    %c16_i32 = arith.constant 16 : i32
    %1 = arith.muli %0, %c16_i32 : i32
    %c0_i32 = arith.constant 0 : i32
    %c0_i32_0 = arith.constant 0 : i32
    %c0_i32_1 = arith.constant 0 : i32
    return %arg0, %1, %c0_i32, %c0_i32_0 : i32, i32, i32, i32
  }
  func.func @transform_2(%arg0: i32, %arg1: i32) -> (i32, i32, i32) {
    %c0_i32 = arith.constant 0 : i32
    %c0_i32_0 = arith.constant 0 : i32
    %c0_i32_1 = arith.constant 0 : i32
    %c0_i32_2 = arith.constant 0 : i32
    return %c0_i32, %c0_i32_0, %c0_i32_1 : i32, i32, i32
  }
  func.func @transform_3(%arg0: i32, %arg1: i32) -> (i32, i32) {
    %c0_i32 = arith.constant 0 : i32
    %c0_i32_0 = arith.constant 0 : i32
    %c0_i32_1 = arith.constant 0 : i32
    return %c0_i32, %c0_i32_0 : i32, i32
  }
  func.func @transform_4(%arg0: i32, %arg1: i32) -> (i32, i32, i32) {
    %c0_i32 = arith.constant 0 : i32
    %c0_i32_0 = arith.constant 0 : i32
    return %arg0, %arg1, %c0_i32 : i32, i32, i32
  }
}

module attributes {stable_mosaic.version = 11 : i64} {
  func.func @_conv_s2d_kernel(%arg0: i32, %arg1: i32, %arg2: memref<1x8x9x128xbf16, #tpu.memory_space<vmem>>, %arg3: memref<1x1x9x128xbf16, #tpu.memory_space<vmem>>, %arg4: memref<4x128x64xbf16, #tpu.memory_space<vmem>>, %arg5: memref<1x64xf32, #tpu.memory_space<vmem>>, %arg6: memref<1x64x64xbf16, #tpu.memory_space<vmem>>, %arg7: memref<1x1x1x64xf32, #tpu.memory_space<vmem>>, %arg8: memref<1x1x1x64xf32, #tpu.memory_space<vmem>>) attributes {dimension_semantics = [#tpu.dimension_semantics<parallel>, #tpu.dimension_semantics<parallel>], iteration_bounds = array<i64: 2, 1>, scalar_prefetch = 0 : i64, scratch_operands = 0 : i64, tpu.core_type = #tpu.core_type<tc>, window_params = [{transform_indices = @transform_0, window_bounds = array<i64: 1, 8, 9, 128>}, {transform_indices = @transform_1, window_bounds = array<i64: 1, 1, 9, 128>}, {pipeline_mode = #tpu.pipeline_mode<synchronous>, transform_indices = @transform_2, window_bounds = array<i64: 4, 128, 64>}, {pipeline_mode = #tpu.pipeline_mode<synchronous>, transform_indices = @transform_3, window_bounds = array<i64: 1, 64>}, {transform_indices = @transform_4, window_bounds = array<i64: 1, 64, 64>}, {transform_indices = @transform_5, window_bounds = array<i64: 1, 1, 1, 64>}, {transform_indices = @transform_6, window_bounds = array<i64: 1, 1, 1, 64>}]} {
    %c0 = arith.constant 0 : index
    %c0_0 = arith.constant 0 : index
    %c0_1 = arith.constant 0 : index
    %c0_2 = arith.constant 0 : index
    %0 = vector.load %arg2[%c0, %c0_0, %c0_1, %c0_2] : memref<1x8x9x128xbf16, #tpu.memory_space<vmem>>, vector<1x8x8x128xbf16>
    %1 = vector.shape_cast %0 : vector<1x8x8x128xbf16> to vector<8x8x128xbf16>
    %2 = vector.shape_cast %1 : vector<8x8x128xbf16> to vector<64x128xbf16>
    %c0_3 = arith.constant 0 : index
    %c0_4 = arith.constant 0 : index
    %c0_5 = arith.constant 0 : index
    %3 = vector.load %arg4[%c0_3, %c0_4, %c0_5] : memref<4x128x64xbf16, #tpu.memory_space<vmem>>, vector<1x128x64xbf16>
    %4 = vector.shape_cast %3 : vector<1x128x64xbf16> to vector<128x64xbf16>
    %cst = arith.constant dense<0.000000e+00> : vector<64x64xf32>
    %5 = tpu.matmul %2, %4, %cst {dimension_numbers = #tpu.dot_dimension_numbers<[1], [0], [0], [1], [0, 0, 1, 1], [], []>} : vector<64x128xbf16>, vector<128x64xbf16>, vector<64x64xf32> -> vector<64x64xf32>
    %c0_6 = arith.constant 0 : index
    %c0_7 = arith.constant 0 : index
    %c1 = arith.constant 1 : index
    %c0_8 = arith.constant 0 : index
    %6 = vector.load %arg2[%c0_6, %c0_7, %c1, %c0_8] : memref<1x8x9x128xbf16, #tpu.memory_space<vmem>>, vector<1x8x8x128xbf16>
    %7 = vector.shape_cast %6 : vector<1x8x8x128xbf16> to vector<8x8x128xbf16>
    %8 = vector.shape_cast %7 : vector<8x8x128xbf16> to vector<64x128xbf16>
    %c1_9 = arith.constant 1 : index
    %c0_10 = arith.constant 0 : index
    %c0_11 = arith.constant 0 : index
    %9 = vector.load %arg4[%c1_9, %c0_10, %c0_11] : memref<4x128x64xbf16, #tpu.memory_space<vmem>>, vector<1x128x64xbf16>
    %10 = vector.shape_cast %9 : vector<1x128x64xbf16> to vector<128x64xbf16>
    %cst_12 = arith.constant dense<0.000000e+00> : vector<64x64xf32>
    %11 = tpu.matmul %8, %10, %cst_12 {dimension_numbers = #tpu.dot_dimension_numbers<[1], [0], [0], [1], [0, 0, 1, 1], [], []>} : vector<64x128xbf16>, vector<128x64xbf16>, vector<64x64xf32> -> vector<64x64xf32>
    %12 = arith.addf %5, %11 : vector<64x64xf32>
    %c0_13 = arith.constant 0 : index
    %c1_14 = arith.constant 1 : index
    %c0_15 = arith.constant 0 : index
    %c0_16 = arith.constant 0 : index
    %13 = vector.load %arg2[%c0_13, %c1_14, %c0_15, %c0_16] : memref<1x8x9x128xbf16, #tpu.memory_space<vmem>>, vector<1x7x8x128xbf16>
    %14 = vector.shape_cast %13 : vector<1x7x8x128xbf16> to vector<7x8x128xbf16>
    %c0_17 = arith.constant 0 : index
    %c0_18 = arith.constant 0 : index
    %c0_19 = arith.constant 0 : index
    %c0_20 = arith.constant 0 : index
    %15 = vector.load %arg3[%c0_17, %c0_18, %c0_19, %c0_20] : memref<1x1x9x128xbf16, #tpu.memory_space<vmem>>, vector<1x1x8x128xbf16>
    %16 = vector.shape_cast %15 : vector<1x1x8x128xbf16> to vector<1x8x128xbf16>
    %17 = tpu.concatenate %14, %16 in 0 : vector<7x8x128xbf16>, vector<1x8x128xbf16> -> vector<8x8x128xbf16>
    %18 = vector.shape_cast %17 : vector<8x8x128xbf16> to vector<64x128xbf16>
    %c2 = arith.constant 2 : index
    %c0_21 = arith.constant 0 : index
    %c0_22 = arith.constant 0 : index
    %19 = vector.load %arg4[%c2, %c0_21, %c0_22] : memref<4x128x64xbf16, #tpu.memory_space<vmem>>, vector<1x128x64xbf16>
    %20 = vector.shape_cast %19 : vector<1x128x64xbf16> to vector<128x64xbf16>
    %cst_23 = arith.constant dense<0.000000e+00> : vector<64x64xf32>
    %21 = tpu.matmul %18, %20, %cst_23 {dimension_numbers = #tpu.dot_dimension_numbers<[1], [0], [0], [1], [0, 0, 1, 1], [], []>} : vector<64x128xbf16>, vector<128x64xbf16>, vector<64x64xf32> -> vector<64x64xf32>
    %22 = arith.addf %12, %21 : vector<64x64xf32>
    %c0_24 = arith.constant 0 : index
    %c1_25 = arith.constant 1 : index
    %c1_26 = arith.constant 1 : index
    %c0_27 = arith.constant 0 : index
    %23 = vector.load %arg2[%c0_24, %c1_25, %c1_26, %c0_27] : memref<1x8x9x128xbf16, #tpu.memory_space<vmem>>, vector<1x7x8x128xbf16>
    %24 = vector.shape_cast %23 : vector<1x7x8x128xbf16> to vector<7x8x128xbf16>
    %c0_28 = arith.constant 0 : index
    %c0_29 = arith.constant 0 : index
    %c1_30 = arith.constant 1 : index
    %c0_31 = arith.constant 0 : index
    %25 = vector.load %arg3[%c0_28, %c0_29, %c1_30, %c0_31] : memref<1x1x9x128xbf16, #tpu.memory_space<vmem>>, vector<1x1x8x128xbf16>
    %26 = vector.shape_cast %25 : vector<1x1x8x128xbf16> to vector<1x8x128xbf16>
    %27 = tpu.concatenate %24, %26 in 0 : vector<7x8x128xbf16>, vector<1x8x128xbf16> -> vector<8x8x128xbf16>
    %28 = vector.shape_cast %27 : vector<8x8x128xbf16> to vector<64x128xbf16>
    %c3 = arith.constant 3 : index
    %c0_32 = arith.constant 0 : index
    %c0_33 = arith.constant 0 : index
    %29 = vector.load %arg4[%c3, %c0_32, %c0_33] : memref<4x128x64xbf16, #tpu.memory_space<vmem>>, vector<1x128x64xbf16>
    %30 = vector.shape_cast %29 : vector<1x128x64xbf16> to vector<128x64xbf16>
    %cst_34 = arith.constant dense<0.000000e+00> : vector<64x64xf32>
    %31 = tpu.matmul %28, %30, %cst_34 {dimension_numbers = #tpu.dot_dimension_numbers<[1], [0], [0], [1], [0, 0, 1, 1], [], []>} : vector<64x128xbf16>, vector<128x64xbf16>, vector<64x64xf32> -> vector<64x64xf32>
    %32 = arith.addf %22, %31 : vector<64x64xf32>
    %c0_35 = arith.constant 0 : index
    %c0_36 = arith.constant 0 : index
    %33 = vector.load %arg5[%c0_35, %c0_36] : memref<1x64xf32, #tpu.memory_space<vmem>>, vector<1x64xf32>
    %34 = vector.broadcast %33 : vector<1x64xf32> to vector<64x64xf32>
    %35 = arith.addf %32, %34 : vector<64x64xf32>
    %cst_37 = arith.constant dense<0.000000e+00> : vector<64xf32>
    %36 = vector.multi_reduction <add>, %35, %cst_37 [0] : vector<64x64xf32> to vector<64xf32>
    %37 = vector.shape_cast %36 : vector<64xf32> to vector<1x64xf32>
    %c0_38 = arith.constant 0 : index
    %c0_39 = arith.constant 0 : index
    %c0_40 = arith.constant 0 : index
    %c0_41 = arith.constant 0 : index
    %38 = vector.load %arg7[%c0_38, %c0_39, %c0_40, %c0_41] : memref<1x1x1x64xf32, #tpu.memory_space<vmem>>, vector<1x1x1x64xf32>
    %39 = vector.shape_cast %38 : vector<1x1x1x64xf32> to vector<1x64xf32>
    %40 = vector.shape_cast %37 : vector<1x64xf32> to vector<1x1x1x64xf32>
    tpu.vector_store %arg7[%c0_38, %c0_39, %c0_40, %c0_41], %40 {strides = array<i32>} : memref<1x1x1x64xf32, #tpu.memory_space<vmem>>, vector<1x1x1x64xf32>,
    %41 = arith.mulf %35, %35 : vector<64x64xf32>
    %cst_42 = arith.constant dense<0.000000e+00> : vector<64xf32>
    %42 = vector.multi_reduction <add>, %41, %cst_42 [0] : vector<64x64xf32> to vector<64xf32>
    %43 = vector.shape_cast %42 : vector<64xf32> to vector<1x64xf32>
    %c0_43 = arith.constant 0 : index
    %c0_44 = arith.constant 0 : index
    %c0_45 = arith.constant 0 : index
    %c0_46 = arith.constant 0 : index
    %44 = vector.load %arg8[%c0_43, %c0_44, %c0_45, %c0_46] : memref<1x1x1x64xf32, #tpu.memory_space<vmem>>, vector<1x1x1x64xf32>
    %45 = vector.shape_cast %44 : vector<1x1x1x64xf32> to vector<1x64xf32>
    %46 = vector.shape_cast %43 : vector<1x64xf32> to vector<1x1x1x64xf32>
    tpu.vector_store %arg8[%c0_43, %c0_44, %c0_45, %c0_46], %46 {strides = array<i32>} : memref<1x1x1x64xf32, #tpu.memory_space<vmem>>, vector<1x1x1x64xf32>,
    %47 = arith.truncf %35 : vector<64x64xf32> to vector<64x64xbf16>
    %c0_47 = arith.constant 0 : index
    %c0_48 = arith.constant 0 : index
    %c0_49 = arith.constant 0 : index
    %48 = vector.load %arg6[%c0_47, %c0_48, %c0_49] : memref<1x64x64xbf16, #tpu.memory_space<vmem>>, vector<1x64x64xbf16>
    %49 = vector.shape_cast %48 : vector<1x64x64xbf16> to vector<64x64xbf16>
    %50 = vector.shape_cast %47 : vector<64x64xbf16> to vector<1x64x64xbf16>
    tpu.vector_store %arg6[%c0_47, %c0_48, %c0_49], %50 {strides = array<i32>} : memref<1x64x64xbf16, #tpu.memory_space<vmem>>, vector<1x64x64xbf16>,
    return
  }
  func.func @transform_0(%arg0: i32, %arg1: i32) -> (i32, i32, i32, i32) {
    %c0_i32 = arith.constant 0 : i32
    %c0_i32_0 = arith.constant 0 : i32
    %c0_i32_1 = arith.constant 0 : i32
    return %arg0, %arg1, %c0_i32, %c0_i32_0 : i32, i32, i32, i32
  }
  func.func @transform_1(%arg0: i32, %arg1: i32) -> (i32, i32, i32, i32) {
    %c1_i32 = arith.constant 1 : i32
    %0 = arith.addi %arg1, %c1_i32 : i32
    %c8_i32 = arith.constant 8 : i32
    %1 = arith.muli %0, %c8_i32 : i32
    %c0_i32 = arith.constant 0 : i32
    %c0_i32_0 = arith.constant 0 : i32
    %c0_i32_1 = arith.constant 0 : i32
    return %arg0, %1, %c0_i32, %c0_i32_0 : i32, i32, i32, i32
  }
  func.func @transform_2(%arg0: i32, %arg1: i32) -> (i32, i32, i32) {
    %c0_i32 = arith.constant 0 : i32
    %c0_i32_0 = arith.constant 0 : i32
    %c0_i32_1 = arith.constant 0 : i32
    %c0_i32_2 = arith.constant 0 : i32
    return %c0_i32, %c0_i32_0, %c0_i32_1 : i32, i32, i32
  }
  func.func @transform_3(%arg0: i32, %arg1: i32) -> (i32, i32) {
    %c0_i32 = arith.constant 0 : i32
    %c0_i32_0 = arith.constant 0 : i32
    %c0_i32_1 = arith.constant 0 : i32
    return %c0_i32, %c0_i32_0 : i32, i32
  }
  func.func @transform_4(%arg0: i32, %arg1: i32) -> (i32, i32, i32) {
    %c0_i32 = arith.constant 0 : i32
    %c0_i32_0 = arith.constant 0 : i32
    return %arg0, %arg1, %c0_i32 : i32, i32, i32
  }
  func.func @transform_5(%arg0: i32, %arg1: i32) -> (i32, i32, i32, i32) {
    %c0_i32 = arith.constant 0 : i32
    %c0_i32_0 = arith.constant 0 : i32
    %c0_i32_1 = arith.constant 0 : i32
    return %arg0, %arg1, %c0_i32, %c0_i32_0 : i32, i32, i32, i32
  }
  func.func @transform_6(%arg0: i32, %arg1: i32) -> (i32, i32, i32, i32) {
    %c0_i32 = arith.constant 0 : i32
    %c0_i32_0 = arith.constant 0 : i32
    %c0_i32_1 = arith.constant 0 : i32
    return %arg0, %arg1, %c0_i32, %c0_i32_0 : i32, i32, i32, i32
  }
}

module attributes {stable_mosaic.version = 11 : i64} {
  func.func @_conv_s2d_kernel(%arg0: i32, %arg1: i32, %arg2: memref<1x4x5x256xbf16, #tpu.memory_space<vmem>>, %arg3: memref<1x1x5x256xbf16, #tpu.memory_space<vmem>>, %arg4: memref<4x256x128xbf16, #tpu.memory_space<vmem>>, %arg5: memref<1x128xf32, #tpu.memory_space<vmem>>, %arg6: memref<1x16x128xbf16, #tpu.memory_space<vmem>>, %arg7: memref<1x1x1x128xf32, #tpu.memory_space<vmem>>, %arg8: memref<1x1x1x128xf32, #tpu.memory_space<vmem>>) attributes {dimension_semantics = [#tpu.dimension_semantics<parallel>, #tpu.dimension_semantics<parallel>], iteration_bounds = array<i64: 2, 1>, scalar_prefetch = 0 : i64, scratch_operands = 0 : i64, tpu.core_type = #tpu.core_type<tc>, window_params = [{transform_indices = @transform_0, window_bounds = array<i64: 1, 4, 5, 256>}, {transform_indices = @transform_1, window_bounds = array<i64: 1, 1, 5, 256>}, {pipeline_mode = #tpu.pipeline_mode<synchronous>, transform_indices = @transform_2, window_bounds = array<i64: 4, 256, 128>}, {pipeline_mode = #tpu.pipeline_mode<synchronous>, transform_indices = @transform_3, window_bounds = array<i64: 1, 128>}, {transform_indices = @transform_4, window_bounds = array<i64: 1, 16, 128>}, {transform_indices = @transform_5, window_bounds = array<i64: 1, 1, 1, 128>}, {transform_indices = @transform_6, window_bounds = array<i64: 1, 1, 1, 128>}]} {
    %c0 = arith.constant 0 : index
    %c0_0 = arith.constant 0 : index
    %c0_1 = arith.constant 0 : index
    %c0_2 = arith.constant 0 : index
    %0 = vector.load %arg2[%c0, %c0_0, %c0_1, %c0_2] : memref<1x4x5x256xbf16, #tpu.memory_space<vmem>>, vector<1x4x4x256xbf16>
    %1 = vector.shape_cast %0 : vector<1x4x4x256xbf16> to vector<4x4x256xbf16>
    %2 = vector.shape_cast %1 : vector<4x4x256xbf16> to vector<16x256xbf16>
    %c0_3 = arith.constant 0 : index
    %c0_4 = arith.constant 0 : index
    %c0_5 = arith.constant 0 : index
    %3 = vector.load %arg4[%c0_3, %c0_4, %c0_5] : memref<4x256x128xbf16, #tpu.memory_space<vmem>>, vector<1x256x128xbf16>
    %4 = vector.shape_cast %3 : vector<1x256x128xbf16> to vector<256x128xbf16>
    %cst = arith.constant dense<0.000000e+00> : vector<16x128xf32>
    %5 = tpu.matmul %2, %4, %cst {dimension_numbers = #tpu.dot_dimension_numbers<[1], [0], [0], [1], [0, 0, 1, 1], [], []>} : vector<16x256xbf16>, vector<256x128xbf16>, vector<16x128xf32> -> vector<16x128xf32>
    %c0_6 = arith.constant 0 : index
    %c0_7 = arith.constant 0 : index
    %c1 = arith.constant 1 : index
    %c0_8 = arith.constant 0 : index
    %6 = vector.load %arg2[%c0_6, %c0_7, %c1, %c0_8] : memref<1x4x5x256xbf16, #tpu.memory_space<vmem>>, vector<1x4x4x256xbf16>
    %7 = vector.shape_cast %6 : vector<1x4x4x256xbf16> to vector<4x4x256xbf16>
    %8 = vector.shape_cast %7 : vector<4x4x256xbf16> to vector<16x256xbf16>
    %c1_9 = arith.constant 1 : index
    %c0_10 = arith.constant 0 : index
    %c0_11 = arith.constant 0 : index
    %9 = vector.load %arg4[%c1_9, %c0_10, %c0_11] : memref<4x256x128xbf16, #tpu.memory_space<vmem>>, vector<1x256x128xbf16>
    %10 = vector.shape_cast %9 : vector<1x256x128xbf16> to vector<256x128xbf16>
    %cst_12 = arith.constant dense<0.000000e+00> : vector<16x128xf32>
    %11 = tpu.matmul %8, %10, %cst_12 {dimension_numbers = #tpu.dot_dimension_numbers<[1], [0], [0], [1], [0, 0, 1, 1], [], []>} : vector<16x256xbf16>, vector<256x128xbf16>, vector<16x128xf32> -> vector<16x128xf32>
    %12 = arith.addf %5, %11 : vector<16x128xf32>
    %c0_13 = arith.constant 0 : index
    %c1_14 = arith.constant 1 : index
    %c0_15 = arith.constant 0 : index
    %c0_16 = arith.constant 0 : index
    %13 = vector.load %arg2[%c0_13, %c1_14, %c0_15, %c0_16] : memref<1x4x5x256xbf16, #tpu.memory_space<vmem>>, vector<1x3x4x256xbf16>
    %14 = vector.shape_cast %13 : vector<1x3x4x256xbf16> to vector<3x4x256xbf16>
    %c0_17 = arith.constant 0 : index
    %c0_18 = arith.constant 0 : index
    %c0_19 = arith.constant 0 : index
    %c0_20 = arith.constant 0 : index
    %15 = vector.load %arg3[%c0_17, %c0_18, %c0_19, %c0_20] : memref<1x1x5x256xbf16, #tpu.memory_space<vmem>>, vector<1x1x4x256xbf16>
    %16 = vector.shape_cast %15 : vector<1x1x4x256xbf16> to vector<1x4x256xbf16>
    %17 = tpu.concatenate %14, %16 in 0 : vector<3x4x256xbf16>, vector<1x4x256xbf16> -> vector<4x4x256xbf16>
    %18 = vector.shape_cast %17 : vector<4x4x256xbf16> to vector<16x256xbf16>
    %c2 = arith.constant 2 : index
    %c0_21 = arith.constant 0 : index
    %c0_22 = arith.constant 0 : index
    %19 = vector.load %arg4[%c2, %c0_21, %c0_22] : memref<4x256x128xbf16, #tpu.memory_space<vmem>>, vector<1x256x128xbf16>
    %20 = vector.shape_cast %19 : vector<1x256x128xbf16> to vector<256x128xbf16>
    %cst_23 = arith.constant dense<0.000000e+00> : vector<16x128xf32>
    %21 = tpu.matmul %18, %20, %cst_23 {dimension_numbers = #tpu.dot_dimension_numbers<[1], [0], [0], [1], [0, 0, 1, 1], [], []>} : vector<16x256xbf16>, vector<256x128xbf16>, vector<16x128xf32> -> vector<16x128xf32>
    %22 = arith.addf %12, %21 : vector<16x128xf32>
    %c0_24 = arith.constant 0 : index
    %c1_25 = arith.constant 1 : index
    %c1_26 = arith.constant 1 : index
    %c0_27 = arith.constant 0 : index
    %23 = vector.load %arg2[%c0_24, %c1_25, %c1_26, %c0_27] : memref<1x4x5x256xbf16, #tpu.memory_space<vmem>>, vector<1x3x4x256xbf16>
    %24 = vector.shape_cast %23 : vector<1x3x4x256xbf16> to vector<3x4x256xbf16>
    %c0_28 = arith.constant 0 : index
    %c0_29 = arith.constant 0 : index
    %c1_30 = arith.constant 1 : index
    %c0_31 = arith.constant 0 : index
    %25 = vector.load %arg3[%c0_28, %c0_29, %c1_30, %c0_31] : memref<1x1x5x256xbf16, #tpu.memory_space<vmem>>, vector<1x1x4x256xbf16>
    %26 = vector.shape_cast %25 : vector<1x1x4x256xbf16> to vector<1x4x256xbf16>
    %27 = tpu.concatenate %24, %26 in 0 : vector<3x4x256xbf16>, vector<1x4x256xbf16> -> vector<4x4x256xbf16>
    %28 = vector.shape_cast %27 : vector<4x4x256xbf16> to vector<16x256xbf16>
    %c3 = arith.constant 3 : index
    %c0_32 = arith.constant 0 : index
    %c0_33 = arith.constant 0 : index
    %29 = vector.load %arg4[%c3, %c0_32, %c0_33] : memref<4x256x128xbf16, #tpu.memory_space<vmem>>, vector<1x256x128xbf16>
    %30 = vector.shape_cast %29 : vector<1x256x128xbf16> to vector<256x128xbf16>
    %cst_34 = arith.constant dense<0.000000e+00> : vector<16x128xf32>
    %31 = tpu.matmul %28, %30, %cst_34 {dimension_numbers = #tpu.dot_dimension_numbers<[1], [0], [0], [1], [0, 0, 1, 1], [], []>} : vector<16x256xbf16>, vector<256x128xbf16>, vector<16x128xf32> -> vector<16x128xf32>
    %32 = arith.addf %22, %31 : vector<16x128xf32>
    %c0_35 = arith.constant 0 : index
    %c0_36 = arith.constant 0 : index
    %33 = vector.load %arg5[%c0_35, %c0_36] : memref<1x128xf32, #tpu.memory_space<vmem>>, vector<1x128xf32>
    %34 = vector.broadcast %33 : vector<1x128xf32> to vector<16x128xf32>
    %35 = arith.addf %32, %34 : vector<16x128xf32>
    %cst_37 = arith.constant dense<0.000000e+00> : vector<128xf32>
    %36 = vector.multi_reduction <add>, %35, %cst_37 [0] : vector<16x128xf32> to vector<128xf32>
    %37 = vector.shape_cast %36 : vector<128xf32> to vector<1x128xf32>
    %c0_38 = arith.constant 0 : index
    %c0_39 = arith.constant 0 : index
    %c0_40 = arith.constant 0 : index
    %c0_41 = arith.constant 0 : index
    %38 = vector.load %arg7[%c0_38, %c0_39, %c0_40, %c0_41] : memref<1x1x1x128xf32, #tpu.memory_space<vmem>>, vector<1x1x1x128xf32>
    %39 = vector.shape_cast %38 : vector<1x1x1x128xf32> to vector<1x128xf32>
    %40 = vector.shape_cast %37 : vector<1x128xf32> to vector<1x1x1x128xf32>
    tpu.vector_store %arg7[%c0_38, %c0_39, %c0_40, %c0_41], %40 {strides = array<i32>} : memref<1x1x1x128xf32, #tpu.memory_space<vmem>>, vector<1x1x1x128xf32>,
    %41 = arith.mulf %35, %35 : vector<16x128xf32>
    %cst_42 = arith.constant dense<0.000000e+00> : vector<128xf32>
    %42 = vector.multi_reduction <add>, %41, %cst_42 [0] : vector<16x128xf32> to vector<128xf32>
    %43 = vector.shape_cast %42 : vector<128xf32> to vector<1x128xf32>
    %c0_43 = arith.constant 0 : index
    %c0_44 = arith.constant 0 : index
    %c0_45 = arith.constant 0 : index
    %c0_46 = arith.constant 0 : index
    %44 = vector.load %arg8[%c0_43, %c0_44, %c0_45, %c0_46] : memref<1x1x1x128xf32, #tpu.memory_space<vmem>>, vector<1x1x1x128xf32>
    %45 = vector.shape_cast %44 : vector<1x1x1x128xf32> to vector<1x128xf32>
    %46 = vector.shape_cast %43 : vector<1x128xf32> to vector<1x1x1x128xf32>
    tpu.vector_store %arg8[%c0_43, %c0_44, %c0_45, %c0_46], %46 {strides = array<i32>} : memref<1x1x1x128xf32, #tpu.memory_space<vmem>>, vector<1x1x1x128xf32>,
    %47 = arith.truncf %35 : vector<16x128xf32> to vector<16x128xbf16>
    %c0_47 = arith.constant 0 : index
    %c0_48 = arith.constant 0 : index
    %c0_49 = arith.constant 0 : index
    %48 = vector.load %arg6[%c0_47, %c0_48, %c0_49] : memref<1x16x128xbf16, #tpu.memory_space<vmem>>, vector<1x16x128xbf16>
    %49 = vector.shape_cast %48 : vector<1x16x128xbf16> to vector<16x128xbf16>
    %50 = vector.shape_cast %47 : vector<16x128xbf16> to vector<1x16x128xbf16>
    tpu.vector_store %arg6[%c0_47, %c0_48, %c0_49], %50 {strides = array<i32>} : memref<1x16x128xbf16, #tpu.memory_space<vmem>>, vector<1x16x128xbf16>,
    return
  }
  func.func @transform_0(%arg0: i32, %arg1: i32) -> (i32, i32, i32, i32) {
    %c0_i32 = arith.constant 0 : i32
    %c0_i32_0 = arith.constant 0 : i32
    %c0_i32_1 = arith.constant 0 : i32
    return %arg0, %arg1, %c0_i32, %c0_i32_0 : i32, i32, i32, i32
  }
  func.func @transform_1(%arg0: i32, %arg1: i32) -> (i32, i32, i32, i32) {
    %c1_i32 = arith.constant 1 : i32
    %0 = arith.addi %arg1, %c1_i32 : i32
    %c4_i32 = arith.constant 4 : i32
    %1 = arith.muli %0, %c4_i32 : i32
    %c0_i32 = arith.constant 0 : i32
    %c0_i32_0 = arith.constant 0 : i32
    %c0_i32_1 = arith.constant 0 : i32
    return %arg0, %1, %c0_i32, %c0_i32_0 : i32, i32, i32, i32
  }
  func.func @transform_2(%arg0: i32, %arg1: i32) -> (i32, i32, i32) {
    %c0_i32 = arith.constant 0 : i32
    %c0_i32_0 = arith.constant 0 : i32
    %c0_i32_1 = arith.constant 0 : i32
    %c0_i32_2 = arith.constant 0 : i32
    return %c0_i32, %c0_i32_0, %c0_i32_1 : i32, i32, i32
  }
  func.func @transform_3(%arg0: i32, %arg1: i32) -> (i32, i32) {
    %c0_i32 = arith.constant 0 : i32
    %c0_i32_0 = arith.constant 0 : i32
    %c0_i32_1 = arith.constant 0 : i32
    return %c0_i32, %c0_i32_0 : i32, i32
  }
  func.func @transform_4(%arg0: i32, %arg1: i32) -> (i32, i32, i32) {
    %c0_i32 = arith.constant 0 : i32
    %c0_i32_0 = arith.constant 0 : i32
    return %arg0, %arg1, %c0_i32 : i32, i32, i32
  }
  func.func @transform_5(%arg0: i32, %arg1: i32) -> (i32, i32, i32, i32) {
    %c0_i32 = arith.constant 0 : i32
    %c0_i32_0 = arith.constant 0 : i32
    %c0_i32_1 = arith.constant 0 : i32
    return %arg0, %arg1, %c0_i32, %c0_i32_0 : i32, i32, i32, i32
  }
  func.func @transform_6(%arg0: i32, %arg1: i32) -> (i32, i32, i32, i32) {
    %c0_i32 = arith.constant 0 : i32
    %c0_i32_0 = arith.constant 0 : i32
    %c0_i32_1 = arith.constant 0 : i32
    return %arg0, %arg1, %c0_i32, %c0_i32_0 : i32, i32, i32, i32
  }
}

module attributes {stable_mosaic.version = 11 : i64} {
  func.func @_conv_s2d_kernel(%arg0: i32, %arg1: i32, %arg2: memref<1x2x3x512xbf16, #tpu.memory_space<vmem>>, %arg3: memref<1x1x3x512xbf16, #tpu.memory_space<vmem>>, %arg4: memref<4x512x1xbf16, #tpu.memory_space<vmem>>, %arg5: memref<1x1xf32, #tpu.memory_space<vmem>>, %arg6: memref<1x4x1xf32, #tpu.memory_space<vmem>>) attributes {dimension_semantics = [#tpu.dimension_semantics<parallel>, #tpu.dimension_semantics<parallel>], iteration_bounds = array<i64: 2, 1>, scalar_prefetch = 0 : i64, scratch_operands = 0 : i64, tpu.core_type = #tpu.core_type<tc>, window_params = [{transform_indices = @transform_0, window_bounds = array<i64: 1, 2, 3, 512>}, {transform_indices = @transform_1, window_bounds = array<i64: 1, 1, 3, 512>}, {pipeline_mode = #tpu.pipeline_mode<synchronous>, transform_indices = @transform_2, window_bounds = array<i64: 4, 512, 1>}, {pipeline_mode = #tpu.pipeline_mode<synchronous>, transform_indices = @transform_3, window_bounds = array<i64: 1, 1>}, {transform_indices = @transform_4, window_bounds = array<i64: 1, 4, 1>}]} {
    %c0 = arith.constant 0 : index
    %c0_0 = arith.constant 0 : index
    %c0_1 = arith.constant 0 : index
    %c0_2 = arith.constant 0 : index
    %0 = vector.load %arg2[%c0, %c0_0, %c0_1, %c0_2] : memref<1x2x3x512xbf16, #tpu.memory_space<vmem>>, vector<1x2x2x512xbf16>
    %1 = vector.shape_cast %0 : vector<1x2x2x512xbf16> to vector<2x2x512xbf16>
    %2 = vector.shape_cast %1 : vector<2x2x512xbf16> to vector<4x512xbf16>
    %c0_3 = arith.constant 0 : index
    %c0_4 = arith.constant 0 : index
    %c0_5 = arith.constant 0 : index
    %3 = vector.load %arg4[%c0_3, %c0_4, %c0_5] : memref<4x512x1xbf16, #tpu.memory_space<vmem>>, vector<1x512x1xbf16>
    %4 = vector.shape_cast %3 : vector<1x512x1xbf16> to vector<512x1xbf16>
    %cst = arith.constant dense<0.000000e+00> : vector<4x1xf32>
    %5 = tpu.matmul %2, %4, %cst {dimension_numbers = #tpu.dot_dimension_numbers<[1], [0], [0], [1], [0, 0, 1, 1], [], []>} : vector<4x512xbf16>, vector<512x1xbf16>, vector<4x1xf32> -> vector<4x1xf32>
    %c0_6 = arith.constant 0 : index
    %c0_7 = arith.constant 0 : index
    %c1 = arith.constant 1 : index
    %c0_8 = arith.constant 0 : index
    %6 = vector.load %arg2[%c0_6, %c0_7, %c1, %c0_8] : memref<1x2x3x512xbf16, #tpu.memory_space<vmem>>, vector<1x2x2x512xbf16>
    %7 = vector.shape_cast %6 : vector<1x2x2x512xbf16> to vector<2x2x512xbf16>
    %8 = vector.shape_cast %7 : vector<2x2x512xbf16> to vector<4x512xbf16>
    %c1_9 = arith.constant 1 : index
    %c0_10 = arith.constant 0 : index
    %c0_11 = arith.constant 0 : index
    %9 = vector.load %arg4[%c1_9, %c0_10, %c0_11] : memref<4x512x1xbf16, #tpu.memory_space<vmem>>, vector<1x512x1xbf16>
    %10 = vector.shape_cast %9 : vector<1x512x1xbf16> to vector<512x1xbf16>
    %cst_12 = arith.constant dense<0.000000e+00> : vector<4x1xf32>
    %11 = tpu.matmul %8, %10, %cst_12 {dimension_numbers = #tpu.dot_dimension_numbers<[1], [0], [0], [1], [0, 0, 1, 1], [], []>} : vector<4x512xbf16>, vector<512x1xbf16>, vector<4x1xf32> -> vector<4x1xf32>
    %12 = arith.addf %5, %11 : vector<4x1xf32>
    %c0_13 = arith.constant 0 : index
    %c1_14 = arith.constant 1 : index
    %c0_15 = arith.constant 0 : index
    %c0_16 = arith.constant 0 : index
    %13 = vector.load %arg2[%c0_13, %c1_14, %c0_15, %c0_16] : memref<1x2x3x512xbf16, #tpu.memory_space<vmem>>, vector<1x1x2x512xbf16>
    %14 = vector.shape_cast %13 : vector<1x1x2x512xbf16> to vector<1x2x512xbf16>
    %c0_17 = arith.constant 0 : index
    %c0_18 = arith.constant 0 : index
    %c0_19 = arith.constant 0 : index
    %c0_20 = arith.constant 0 : index
    %15 = vector.load %arg3[%c0_17, %c0_18, %c0_19, %c0_20] : memref<1x1x3x512xbf16, #tpu.memory_space<vmem>>, vector<1x1x2x512xbf16>
    %16 = vector.shape_cast %15 : vector<1x1x2x512xbf16> to vector<1x2x512xbf16>
    %17 = tpu.concatenate %14, %16 in 0 : vector<1x2x512xbf16>, vector<1x2x512xbf16> -> vector<2x2x512xbf16>
    %18 = vector.shape_cast %17 : vector<2x2x512xbf16> to vector<4x512xbf16>
    %c2 = arith.constant 2 : index
    %c0_21 = arith.constant 0 : index
    %c0_22 = arith.constant 0 : index
    %19 = vector.load %arg4[%c2, %c0_21, %c0_22] : memref<4x512x1xbf16, #tpu.memory_space<vmem>>, vector<1x512x1xbf16>
    %20 = vector.shape_cast %19 : vector<1x512x1xbf16> to vector<512x1xbf16>
    %cst_23 = arith.constant dense<0.000000e+00> : vector<4x1xf32>
    %21 = tpu.matmul %18, %20, %cst_23 {dimension_numbers = #tpu.dot_dimension_numbers<[1], [0], [0], [1], [0, 0, 1, 1], [], []>} : vector<4x512xbf16>, vector<512x1xbf16>, vector<4x1xf32> -> vector<4x1xf32>
    %22 = arith.addf %12, %21 : vector<4x1xf32>
    %c0_24 = arith.constant 0 : index
    %c1_25 = arith.constant 1 : index
    %c1_26 = arith.constant 1 : index
    %c0_27 = arith.constant 0 : index
    %23 = vector.load %arg2[%c0_24, %c1_25, %c1_26, %c0_27] : memref<1x2x3x512xbf16, #tpu.memory_space<vmem>>, vector<1x1x2x512xbf16>
    %24 = vector.shape_cast %23 : vector<1x1x2x512xbf16> to vector<1x2x512xbf16>
    %c0_28 = arith.constant 0 : index
    %c0_29 = arith.constant 0 : index
    %c1_30 = arith.constant 1 : index
    %c0_31 = arith.constant 0 : index
    %25 = vector.load %arg3[%c0_28, %c0_29, %c1_30, %c0_31] : memref<1x1x3x512xbf16, #tpu.memory_space<vmem>>, vector<1x1x2x512xbf16>
    %26 = vector.shape_cast %25 : vector<1x1x2x512xbf16> to vector<1x2x512xbf16>
    %27 = tpu.concatenate %24, %26 in 0 : vector<1x2x512xbf16>, vector<1x2x512xbf16> -> vector<2x2x512xbf16>
    %28 = vector.shape_cast %27 : vector<2x2x512xbf16> to vector<4x512xbf16>
    %c3 = arith.constant 3 : index
    %c0_32 = arith.constant 0 : index
    %c0_33 = arith.constant 0 : index
    %29 = vector.load %arg4[%c3, %c0_32, %c0_33] : memref<4x512x1xbf16, #tpu.memory_space<vmem>>, vector<1x512x1xbf16>
    %30 = vector.shape_cast %29 : vector<1x512x1xbf16> to vector<512x1xbf16>
    %cst_34 = arith.constant dense<0.000000e+00> : vector<4x1xf32>
    %31 = tpu.matmul %28, %30, %cst_34 {dimension_numbers = #tpu.dot_dimension_numbers<[1], [0], [0], [1], [0, 0, 1, 1], [], []>} : vector<4x512xbf16>, vector<512x1xbf16>, vector<4x1xf32> -> vector<4x1xf32>
    %32 = arith.addf %22, %31 : vector<4x1xf32>
    %c0_35 = arith.constant 0 : index
    %c0_36 = arith.constant 0 : index
    %33 = vector.load %arg5[%c0_35, %c0_36] : memref<1x1xf32, #tpu.memory_space<vmem>>, vector<1x1xf32>
    %34 = vector.broadcast %33 : vector<1x1xf32> to vector<4x1xf32>
    %35 = arith.addf %32, %34 : vector<4x1xf32>
    %cst_37 = arith.constant 0.000000e+00 : f32
    %36 = vector.broadcast %cst_37 : f32 to vector<4x1xf32>
    %37 = arith.subf %36, %35 : vector<4x1xf32>
    %38 = math.exp %37 : vector<4x1xf32>
    %cst_38 = arith.constant 1.000000e+00 : f32
    %39 = vector.broadcast %cst_38 : f32 to vector<4x1xf32>
    %40 = arith.addf %39, %38 : vector<4x1xf32>
    %41 = tpu.reciprocal %40 {approx = true} : vector<4x1xf32> -> vector<4x1xf32>
    %cst_39 = arith.constant 1.000000e+00 : f32
    %42 = vector.broadcast %cst_39 : f32 to vector<4x1xf32>
    %43 = arith.minimumf %41, %42 : vector<4x1xf32>
    %c0_40 = arith.constant 0 : index
    %c0_41 = arith.constant 0 : index
    %c0_42 = arith.constant 0 : index
    %44 = vector.load %arg6[%c0_40, %c0_41, %c0_42] : memref<1x4x1xf32, #tpu.memory_space<vmem>>, vector<1x4x1xf32>
    %45 = vector.shape_cast %44 : vector<1x4x1xf32> to vector<4x1xf32>
    %46 = vector.shape_cast %43 : vector<4x1xf32> to vector<1x4x1xf32>
    tpu.vector_store %arg6[%c0_40, %c0_41, %c0_42], %46 {strides = array<i32>} : memref<1x4x1xf32, #tpu.memory_space<vmem>>, vector<1x4x1xf32>,
    return
  }
  func.func @transform_0(%arg0: i32, %arg1: i32) -> (i32, i32, i32, i32) {
    %c0_i32 = arith.constant 0 : i32
    %c0_i32_0 = arith.constant 0 : i32
    %c0_i32_1 = arith.constant 0 : i32
    return %arg0, %arg1, %c0_i32, %c0_i32_0 : i32, i32, i32, i32
  }
  func.func @transform_1(%arg0: i32, %arg1: i32) -> (i32, i32, i32, i32) {
    %c1_i32 = arith.constant 1 : i32
    %0 = arith.addi %arg1, %c1_i32 : i32
    %c2_i32 = arith.constant 2 : i32
    %1 = arith.muli %0, %c2_i32 : i32
    %c0_i32 = arith.constant 0 : i32
    %c0_i32_0 = arith.constant 0 : i32
    %c0_i32_1 = arith.constant 0 : i32
    return %arg0, %1, %c0_i32, %c0_i32_0 : i32, i32, i32, i32
  }
  func.func @transform_2(%arg0: i32, %arg1: i32) -> (i32, i32, i32) {
    %c0_i32 = arith.constant 0 : i32
    %c0_i32_0 = arith.constant 0 : i32
    %c0_i32_1 = arith.constant 0 : i32
    %c0_i32_2 = arith.constant 0 : i32
    return %c0_i32, %c0_i32_0, %c0_i32_1 : i32, i32, i32
  }
  func.func @transform_3(%arg0: i32, %arg1: i32) -> (i32, i32) {
    %c0_i32 = arith.constant 0 : i32
    %c0_i32_0 = arith.constant 0 : i32
    %c0_i32_1 = arith.constant 0 : i32
    return %c0_i32, %c0_i32_0 : i32, i32
  }
  func.func @transform_4(%arg0: i32, %arg1: i32) -> (i32, i32, i32) {
    %c0_i32 = arith.constant 0 : i32
    %c0_i32_0 = arith.constant 0 : i32
    return %arg0, %arg1, %c0_i32 : i32, i32, i32
  }
}

</mosaic_0001>

<bundles_post_ra>
// kernel: _forward_impl.4
= control target key start
LH: loop header
LB: loop body
LE: loop exit
PB: predicated region body
PF: predicated region fallthrough
CT: control target
= control target key end

     0   :  { %s3530_s15 = smov 0   ;;  %s3532_s16 = smov 0   ;;  %s4180_s0 = inlined_call_operand.vmem [shape: bf16[2,17,17,12], index: 0, kind: input, shape index: {}, may-alias: {0,1}]   ;;  %s4181_s1 = inlined_call_operand.vmem [shape: bf16[2,17,17,12], index: 1, kind: input, shape index: {}, may-alias: {0,1}]   ;;  %s4182_s2 = inlined_call_operand.vmem [shape: bf16[4,12,32], index: 2, kind: input, shape index: {}]   ;;  %s4183_s3 = inlined_call_operand.vmem [shape: f32[1,32], index: 3, kind: input, shape index: {}]   ;;  %s4184_s4 = inlined_call_operand.vmem [shape: bf16[2,256,32], index: 4, kind: output, shape index: {}]  }
   0x1   :  { %s3534_s17 = smov 0  }
   0x2 LB: > { %s26_s18 = sadd.s32 1, %s3499_s16  ;;  %p2826_p0 = scmp.ge.s32.totalorder %s3503_s17, 1  ;;  %s3503_s17 = sphi %s3534_s17, %s14_s17   ;;  %s3499_s16 = sphi %s3532_s16, %s4188_s16   ;;  %s3495_s15 = sphi %s3530_s15, %s4187_s15  }
   0x3   : > { %p28_p1 = scmp.ge.s32.totalorder %s26_s18, 2  ;;  %p218_p2 = scmp.lt.s32.totalorder %s3503_s17, 3 }
   0x5   : > { %s4190_s18 = smov (%p28_p1, %s26_s18), 0  ;;  %p219_p3 = pnand %p2826_p0, %p218_p2 }
   0x6   : > { %vm856_vm0 = vcmask (!%p219_p3), 1045504   ;;  %p275_p4 = scmp.lt.s32.totalorder (!%p219_p3), %s3495_s15, 1  ;;  %v3445_v0 = vld [vmem:[%s4182_s2 + $0x10] sm:$0x3f] (!%p219_p3)   ;;  %v3448_v1 = vld [vmem:[%s4182_s2 + $0x8] sm:$0x3f] (!%p219_p3)  }
   0x7   : > { %222 = sbr.rel (%p219_p3) target bundleno = 393 (0x189), region = 36  ;;  %3416 = vmatprep.subr.msk.bf16.mxu0 (!%p219_p3), %vm856_vm0, %v3445_v0  ;;  %v1488_v2 = vsel (!%p219_p3), %vm856_vm0, %v3445_v0, 0  ;;  %3414 = vmatprep.subr.msk.bf16.mxu1 (!%p219_p3), %vm856_vm0, %v3448_v1  ;;  %v858_v3 = vsel (!%p219_p3), %vm856_vm0, %v3448_v1, 0  ;;  %vm807_vm1 = vcmask (!%p219_p3), 97280   ;;  %vm364_vm2 = vsmask.f32 (!%p219_p3), 3328 }
   0x8   : > { %3251 = vmatpush3.bf16.msra.mxu0 (!%p219_p3), %v1488_v2  ;;  %3183 = vmatpush3.bf16.msra.mxu1 (!%p219_p3), %v858_v3  ;;  %v3450_v4 = vld [vmem:[%s4182_s2] sm:$0x3f] (!%p219_p3)   ;;  %vm365_vm3 = vsmask.f32 (!%p219_p3), 7440  ;;  %v3452_v5 = vld [vmem:[%s4182_s2 + $0x18] sm:$0x3f] (!%p219_p3)  }
   0x9   : > { %3415 = vmatprep.subr.msk.bf16.mxu1 (!%p219_p3), %vm856_vm0, %v3450_v4  ;;  %3417 = vmatprep.subr.msk.bf16.mxu0 (!%p219_p3), %vm856_vm0, %v3452_v5  ;;  %v2220_v8 = vsel (!%p219_p3), %vm856_vm0, %v3452_v5, 0  ;;  %v3582_v10 = vsel (!%p219_p3), %vm856_vm0, %v3450_v4, 0  ;;  %vm3613_vm4 = vmor (!%p219_p3), %vm364_vm2, %vm365_vm3  ;;  %v4067_v36 = vld [vmem:[%s4183_s3] ss:$0 sm:$0xff] (!%p219_p3)  ;;  %vm2678_vm7 = vcmask (!%p219_p3), 257024  }
   0xe   : > { %s4192_s15 = smov (!%p275_p4, %s3495_s15), 1 }
   0xf   : > { %s3418_s23 = smul.u32 204, %s4192_s15  ;;  %s3081_s11 = sshll.u32 %s4192_s15, 7 }
  0x10   : > { %s4077_s14 = scalar_lea.vmem %s4184_s4, %s3081_s11 }
  0x11   : > { %s3569_s28 = scalar_lea.vmem %s4180_s0, %s3418_s23  ;;  %s3080_s5 = sadd.s32 192, %s3418_s23 }
  0x12   : > { %v3446_v6 = vld [vmem:[%s3569_s28 + $0xc] sm:$0xff]   ;;  %v3447_v7 = vld [vmem:[%s3569_s28 + $0x18] sm:$0xff]   ;;  %v3449_v9 = vld [vmem:[%s3569_s28 + $0x24] sm:$0xff]   ;;  %s3797_s8 = scalar_lea.vmem %s4181_s1, %s3080_s5 }
  0x13   : > { %3252 = vmatprep.mubr.msk.bf16.mxu0 %vm807_vm1, %v3446_v6  ;;  %v3586_v11 = vld [vmem:[%s3569_s28] sm:$0xf]  ;;  %v3589_v12 = vld [vmem:[%s3569_s28 + $0x4] sm:$0xf]  ;;  %v348_v13 = vld [vmem:[%s3569_s28 + $0x8] sm:$0x1] }
  0x14   : > { %3253 = vmatmul.mubr.msk.bf16.vlgmr.msra.gmra.mrb[0].mxu0 %vm807_vm1, %v3447_v7  ;;  %v368_v14 = vshrl.u32 %v3586_v11, 16  ;;  %v371_v15 = vshll.u32 %v3586_v11, 16  ;;  %v377_v16 = vshll.u32 %v3589_v12, 16  ;;  %v381_v17 = vshrl.u32 %v3589_v12, 16  ;;  %v3451_v19 = vld [vmem:[%s3569_s28 + $0x30] sm:$0xff]   ;;  %v3453_v40 = vld [vmem:[%s3569_s28 + $0x3c] sm:$0xff]  }
  0x15   : > { %3256 = vmatprep.mubr.msk.bf16.mxu0 %vm807_vm1, %v3449_v9  ;;  %3285 = vmatpush3.bf16.msra.mxu0 %v2220_v8  ;;  %v387_v18 = vshll.u32 %v348_v13, 16  ;;  %v3599_v20 = vld [vmem:[%s3569_s28 + $0xc] sm:$0xf]  ;;  %v2866_v21 = vcombine.low %v3586_v11, %v3589_v12  ;;  %v3604_v26 = vld [vmem:[%s3569_s28 + $0x10] sm:$0xf]  ;;  %v3455_v4 = vld [vmem:[%s3569_s28 + $0x54] sm:$0xff]  }
  0x16   : > { %v370_v22 = vrot.slane %v368_v14, 4  ;;  %v373_v23 = vrot.slane %v371_v15, 5  ;;  %v379_v24 = vrot.slane %v377_v16, 5  ;;  %v383_v25 = vrot.slane %v381_v17, 4  ;;  %v349_v28 = vld [vmem:[%s3569_s28 + $0x14] sm:$0x1] }
  0x17   : > { %v389_v27 = vrot.slane %v387_v18, 5  ;;  %v392_v29 = vshrl.u32 %v3599_v20, 16  ;;  %v395_v30 = vshll.u32 %v3599_v20, 16  ;;  %v401_v31 = vshll.u32 %v3604_v26, 16  ;;  %v3619_v41 = vld [vmem:[%s3569_s28 + $0x18] sm:$0xf] }
  0x18   : > { %v374_v32 = vor.u32 %v373_v23, %v370_v22  ;;  %v384_v33 = vor.u32 %v383_v25, %v379_v24  ;;  %v405_v34 = vshrl.u32 %v3604_v26, 16  ;;  %v411_v35 = vshll.u32 %v349_v28, 16  ;;  %v3624_v47 = vld [vmem:[%s3569_s28 + $0x1c] sm:$0xf]  ;;  %v350_v49 = vld [vmem:[%s3569_s28 + $0x20] sm:$0x1] }
  0x19   : > { %v394_v37 = vrot.slane %v392_v29, 4  ;;  %v397_v38 = vrot.slane %v395_v30, 5  ;;  %v403_v39 = vrot.slane %v401_v31, 5  ;;  %v2867_v42 = vcombine.low %v3599_v20, %v3604_v26  ;;  %v3454_v61 = vld [vmem:[%s3569_s28 + $0x48] sm:$0xff]   ;;  %v3639_v62 = vld [vmem:[%s3569_s28 + $0x24] sm:$0xf] }
  0x1a   : > { %v375_v43 = vrot.slane %v374_v32, 4  ;;  %v385_v44 = vrot.slane %v384_v33, 4  ;;  %v407_v45 = vrot.slane %v405_v34, 4  ;;  %v413_v46 = vrot.slane %v411_v35, 5  ;;  %v3642_v3 = vld [vmem:[%s3569_s28 + $0x28] sm:$0xf] }
  0x1b   : > { %v398_v48 = vor.u32 %v397_v38, %v394_v37  ;;  %v416_v50 = vshrl.u32 %v3619_v41, 16  ;;  %v419_v51 = vshll.u32 %v3619_v41, 16  ;;  %v425_v52 = vshll.u32 %v3624_v47, 16  ;;  %v351_v7 = vld [vmem:[%s3569_s28 + $0x2c] sm:$0x1] }
  0x1c   : > { %3257 = vmatmul.mubr.msk.bf16.gmra.mrb[4].mxu0 %vm807_vm1, %v3451_v19  ;;  %v380_v53 = vsel %vm3613_vm4, %v375_v43, %v379_v24  ;;  %v390_v54 = vsel %vm3613_vm4, %v385_v44, %v389_v27  ;;  %v408_v55 = vor.u32 %v407_v45, %v403_v39  ;;  %v429_v56 = vshrl.u32 %v3624_v47, 16  ;;  %v3655_v17 = vld [vmem:[%s3569_s28 + $0x30] sm:$0xf]  ;;  %v3658_v24 = vld [vmem:[%s3569_s28 + $0x34] sm:$0xf] }
  0x1d   : > { %3260 = vmatprep.mubr.msk.bf16.mxu0 %vm807_vm1, %v3453_v40  ;;  %v2833_v57 = vcombine.low %v380_v53, %v390_v54  ;;  %v399_v58 = vrot.slane %v398_v48, 4  ;;  %v418_v59 = vrot.slane %v416_v50, 4  ;;  %v421_v60 = vrot.slane %v419_v51, 5  ;;  %v352_v30 = vld [vmem:[%s3569_s28 + $0x38] sm:$0x1] }
  0x1e   : > { %v409_v63 = vrot.slane %v408_v55, 4  ;;  %v427_v0 = vrot.slane %v425_v52, 5  ;;  %v431_v1 = vrot.slane %v429_v56, 4  ;;  %v435_v2 = vshll.u32 %v350_v49, 16  ;;  %v3674_v40 = vld [vmem:[%s3569_s28 + $0x3c] sm:$0xf] }
  0x1f   : > { %3184 = vmatprep.mubr.msk.bf16.mxu1 %vm807_vm1, %v2833_v57  ;;  %v404_v5 = vsel %vm3613_vm4, %v399_v58, %v403_v39  ;;  %v422_v6 = vor.u32 %v421_v60, %v418_v59  ;;  %v440_v8 = vshrl.u32 %v3639_v62, 16  ;;  %v443_v9 = vshll.u32 %v3639_v62, 16  ;;  %v3677_v48 = vld [vmem:[%s3569_s28 + $0x40] sm:$0xf]  ;;  %v353_v53 = vld [vmem:[%s3569_s28 + $0x44] sm:$0x1] }
  0x20   : > { %v414_v13 = vsel %vm3613_vm4, %v409_v63, %v413_v46  ;;  %v432_v14 = vor.u32 %v431_v1, %v427_v0  ;;  %v437_v15 = vrot.slane %v435_v2, 5  ;;  %v449_v16 = vshll.u32 %v3642_v3, 16  ;;  %v3456_v52 = vld [vmem:[%s3569_s28 + $0x60] sm:$0xff]   ;;  %v3457_v63 = vld [vmem:[%s3569_s28 + $0x6c] sm:$0xff]  }
  0x21   : > { %v2834_v18 = vcombine.low %v404_v5, %v414_v13  ;;  %v423_v19 = vrot.slane %v422_v6, 4  ;;  %v442_v22 = vrot.slane %v440_v8, 4  ;;  %v445_v23 = vrot.slane %v443_v9, 5  ;;  %v3691_v5 = vld [vmem:[%s3569_s28 + $0x48] sm:$0xf] }
  0x22   : > { %v433_v25 = vrot.slane %v432_v14, 4  ;;  %v451_v27 = vrot.slane %v449_v16, 5  ;;  %v453_v28 = vshrl.u32 %v3642_v3, 16  ;;  %v459_v29 = vshll.u32 %v351_v7, 16  ;;  %v3696_v13 = vld [vmem:[%s3569_s28 + $0x4c] sm:$0xf] }
  0x23   : > { %3185 = vmatmul.mubr.msk.bf16.vlgmr.msra.gmra.mrb[0].mxu1 %vm807_vm1, %v2834_v18  ;;  %v428_v31 = vsel %vm3613_vm4, %v423_v19, %v427_v0  ;;  %v446_v32 = vor.u32 %v445_v23, %v442_v22  ;;  %v464_v33 = vshrl.u32 %v3655_v17, 16  ;;  %v467_v34 = vshll.u32 %v3655_v17, 16  ;;  %v354_v19 = vld [vmem:[%s3569_s28 + $0x50] sm:$0x1] }
  0x24   : > { %3261 = vmatmul.mubr.msk.bf16.gmra.mrb[8].mxu0 %vm807_vm1, %v3454_v61  ;;  %3217 = vmatpush3.bf16.msra.mxu1 %v3582_v10  ;;  %v438_v35 = vsel %vm3613_vm4, %v433_v25, %v437_v15  ;;  %v455_v37 = vrot.slane %v453_v28, 4  ;;  %v461_v38 = vrot.slane %v459_v29, 5  ;;  %v473_v39 = vshll.u32 %v3658_v24, 16  ;;  %v3706_v28 = vld [vmem:[%s3569_s28 + $0x54] sm:$0xf] }
  0x25   : > { %3264 = vmatprep.mubr.msk.bf16.mxu0 %vm807_vm1, %v3455_v4  ;;  %v2835_v43 = vcombine.low %v428_v31, %v438_v35  ;;  %v447_v44 = vrot.slane %v446_v32, 4  ;;  %v466_v45 = vrot.slane %v464_v33, 4  ;;  %v469_v46 = vrot.slane %v467_v34, 5  ;;  %v3712_v33 = vld [vmem:[%s3569_s28 + $0x58] sm:$0xf] }
  0x26   : > { %v456_v10 = vor.u32 %v455_v37, %v451_v27  ;;  %v475_v49 = vrot.slane %v473_v39, 5  ;;  %v477_v50 = vshrl.u32 %v3658_v24, 16  ;;  %v483_v51 = vshll.u32 %v352_v30, 16  ;;  %v3458_v39 = vld [vmem:[%s3569_s28 + $0x78] sm:$0xff]  }
  0x27   : > { %3188 = vmatprep.mubr.msk.bf16.mxu1 %vm807_vm1, %v2835_v43  ;;  %v452_v54 = vsel %vm3613_vm4, %v447_v44, %v451_v27  ;;  %v470_v55 = vor.u32 %v469_v46, %v466_v45  ;;  %v488_v56 = vshrl.u32 %v3674_v40, 16  ;;  %v491_v57 = vshll.u32 %v3674_v40, 16 }
  0x28   : > { %v457_v58 = vrot.slane %v456_v10, 4  ;;  %v479_v59 = vrot.slane %v477_v50, 4  ;;  %v485_v60 = vrot.slane %v483_v51, 5  ;;  %v497_v61 = vshll.u32 %v3677_v48, 16  ;;  %v355_v10 = vld [vmem:[%s3569_s28 + $0x5c] sm:$0x1] }
  0x29   : > { %v471_v0 = vrot.slane %v470_v55, 4  ;;  %v490_v1 = vrot.slane %v488_v56, 4  ;;  %v493_v2 = vrot.slane %v491_v57, 5  ;;  %v501_v4 = vshrl.u32 %v3677_v48, 16 }
  0x2a   : > { %v462_v6 = vsel %vm3613_vm4, %v457_v58, %v461_v38  ;;  %v480_v7 = vor.u32 %v479_v59, %v475_v49  ;;  %v499_v8 = vrot.slane %v497_v61, 5  ;;  %v507_v9 = vshll.u32 %v353_v53, 16  ;;  %v3459_v53 = vld [vmem:[%s3569_s28 + $0x84] sm:$0xff]  }
  0x2b   : > { %v2836_v14 = vcombine.low %v452_v54, %v462_v6  ;;  %v476_v15 = vsel %vm3613_vm4, %v471_v0, %v475_v49  ;;  %v494_v16 = vor.u32 %v493_v2, %v490_v1  ;;  %v503_v18 = vrot.slane %v501_v4, 4  ;;  %v3723_v54 = vld [vmem:[%s3569_s28 + $0x60] sm:$0xf]  ;;  %v3732_v59 = vld [vmem:[%s3569_s28 + $0x64] sm:$0xf] }
  0x2c   : > { %3265 = vmatmul.mubr.msk.bf16.gmra.mrb[12].mxu0 %vm807_vm1, %v3456_v52  ;;  %v481_v22 = vrot.slane %v480_v7, 4  ;;  %v509_v23 = vrot.slane %v507_v9, 5  ;;  %v512_v25 = vshrl.u32 %v3691_v5, 16  ;;  %v515_v27 = vshll.u32 %v3691_v5, 16  ;;  %v356_v7 = vld [vmem:[%s3569_s28 + $0x68] sm:$0x1] }
  0x2d   : > { %3268 = vmatprep.mubr.msk.bf16.mxu0 %vm807_vm1, %v3457_v63  ;;  %3189 = vmatmul.mubr.msk.bf16.gmra.mrb[4].mxu1 %vm807_vm1, %v2836_v14  ;;  %v495_v29 = vrot.slane %v494_v16, 4  ;;  %v504_v30 = vor.u32 %v503_v18, %v499_v8  ;;  %v521_v31 = vshll.u32 %v3696_v13, 16  ;;  %v525_v32 = vshrl.u32 %v3696_v13, 16  ;;  %v3742_v16 = vld [vmem:[%s3569_s28 + $0x6c] sm:$0xf] }
  0x2e   : > { %v486_v34 = vsel %vm3613_vm4, %v481_v22, %v485_v60  ;;  %v514_v35 = vrot.slane %v512_v25, 4  ;;  %v517_v37 = vrot.slane %v515_v27, 5  ;;  %v531_v38 = vshll.u32 %v354_v19, 16  ;;  %v3747_v25 = vld [vmem:[%s3569_s28 + $0x70] sm:$0xf] }
  0x2f   : > { %v2837_v43 = vcombine.low %v476_v15, %v486_v34  ;;  %v500_v44 = vsel %vm3613_vm4, %v495_v29, %v499_v8  ;;  %v505_v45 = vrot.slane %v504_v30, 4  ;;  %v523_v46 = vrot.slane %v521_v31, 5 }
  0x30   : > { %v518_v49 = vor.u32 %v517_v37, %v514_v35  ;;  %v527_v50 = vrot.slane %v525_v32, 4  ;;  %v533_v51 = vrot.slane %v531_v38, 5  ;;  %v536_v52 = vshrl.u32 %v3706_v28, 16  ;;  %v3460_v38 = vld [vmem:[%s3569_s28 + $0x90] sm:$0xff]  }
  0x31   : > { %3192 = vmatprep.mubr.msk.bf16.mxu1 %vm807_vm1, %v2837_v43  ;;  %v510_v55 = vsel %vm3613_vm4, %v505_v45, %v509_v23  ;;  %v539_v56 = vshll.u32 %v3706_v28, 16  ;;  %v545_v57 = vshll.u32 %v3712_v33, 16  ;;  %v549_v58 = vshrl.u32 %v3712_v33, 16  ;;  %v357_v45 = vld [vmem:[%s3569_s28 + $0x74] sm:$0x1] }
  0x32   : > { %v2838_v60 = vcombine.low %v500_v44, %v510_v55  ;;  %v519_v61 = vrot.slane %v518_v49, 4  ;;  %v528_v63 = vor.u32 %v527_v50, %v523_v46  ;;  %v538_v0 = vrot.slane %v536_v52, 4 }
  0x33   : > { %v541_v1 = vrot.slane %v539_v56, 5  ;;  %v547_v2 = vrot.slane %v545_v57, 5  ;;  %v551_v4 = vrot.slane %v549_v58, 4  ;;  %v555_v6 = vshll.u32 %v355_v10, 16  ;;  %v3461_v10 = vld [vmem:[%s3569_s28 + $0x9c] sm:$0xff]  }
  0x34   : > { %3269 = vmatmul.mubr.msk.bf16.gmra.mrb[16].mxu0 %vm807_vm1, %v3458_v39  ;;  %v524_v8 = vsel %vm3613_vm4, %v519_v61, %v523_v46  ;;  %v529_v9 = vrot.slane %v528_v63, 4  ;;  %v560_v14 = vshrl.u32 %v3723_v54, 16  ;;  %v563_v15 = vshll.u32 %v3723_v54, 16 }
  0x35   : > { %3272 = vmatprep.mubr.msk.bf16.mxu0 %vm807_vm1, %v3459_v53  ;;  %3193 = vmatmul.mubr.msk.bf16.gmra.mrb[8].mxu1 %vm807_vm1, %v2838_v60  ;;  %v542_v18 = vor.u32 %v541_v1, %v538_v0  ;;  %v552_v19 = vor.u32 %v551_v4, %v547_v2  ;;  %v557_v22 = vrot.slane %v555_v6, 5  ;;  %v569_v23 = vshll.u32 %v3732_v59, 16  ;;  %v3764_v53 = vld [vmem:[%s3569_s28 + $0x78] sm:$0xf]  ;;  %v3767_v60 = vld [vmem:[%s3569_s28 + $0x7c] sm:$0xf] }
  0x36   : > { %v534_v27 = vsel %vm3613_vm4, %v529_v9, %v533_v51  ;;  %v562_v29 = vrot.slane %v560_v14, 4  ;;  %v565_v30 = vrot.slane %v563_v15, 5  ;;  %v573_v31 = vshrl.u32 %v3732_v59, 16  ;;  %v3777_v9 = vld [vmem:[%s3569_s28 + $0x84] sm:$0xf] }
  0x37   : > { %v2839_v32 = vcombine.low %v524_v8, %v534_v27  ;;  %v543_v34 = vrot.slane %v542_v18, 4  ;;  %v553_v35 = vrot.slane %v552_v19, 4  ;;  %v571_v37 = vrot.slane %v569_v23, 5 }
  0x38   : > { %v566_v39 = vor.u32 %v565_v30, %v562_v29  ;;  %v575_v43 = vrot.slane %v573_v31, 4  ;;  %v579_v44 = vshll.u32 %v356_v7, 16  ;;  %v584_v46 = vshrl.u32 %v3742_v16, 16 }
  0x39   : > { %3196 = vmatprep.mubr.msk.bf16.mxu1 %vm807_vm1, %v2839_v32  ;;  %v548_v49 = vsel %vm3613_vm4, %v543_v34, %v547_v2  ;;  %v558_v50 = vsel %vm3613_vm4, %v553_v35, %v557_v22  ;;  %v587_v51 = vshll.u32 %v3742_v16, 16  ;;  %v593_v52 = vshll.u32 %v3747_v25, 16  ;;  %v358_v2 = vld [vmem:[%s3569_s28 + $0x80] sm:$0x1]  ;;  %v3462_v35 = vld [vmem:[%s3569_s28 + $0xa8] sm:$0xff]  }
  0x3a   : > { %v2840_v55 = vcombine.low %v548_v49, %v558_v50  ;;  %v567_v56 = vrot.slane %v566_v39, 4  ;;  %v576_v57 = vor.u32 %v575_v43, %v571_v37  ;;  %v581_v58 = vrot.slane %v579_v44, 5 }
  0x3b   : > { %v586_v61 = vrot.slane %v584_v46, 4  ;;  %v589_v63 = vrot.slane %v587_v51, 5  ;;  %v595_v0 = vrot.slane %v593_v52, 5  ;;  %v597_v1 = vshrl.u32 %v3747_v25, 16 }
  0x3c   : > { %3273 = vmatmul.mubr.msk.bf16.gmra.mrb[20].mxu0 %vm807_vm1, %v3460_v38  ;;  %v572_v4 = vsel %vm3613_vm4, %v567_v56, %v571_v37  ;;  %v577_v6 = vrot.slane %v576_v57, 4  ;;  %v603_v7 = vshll.u32 %v357_v45, 16  ;;  %v608_v8 = vshrl.u32 %v3764_v53, 16  ;;  %v3789_v37 = vld [vmem:[%s3569_s28 + $0x88] sm:$0xf]  ;;  %v3463_v38 = vld [vmem:[%s3569_s28 + $0xb4] sm:$0xff]  }
  0x3d   : > { %3276 = vmatprep.mubr.msk.bf16.mxu0 %vm807_vm1, %v3461_v10  ;;  %3197 = vmatmul.mubr.msk.bf16.gmra.mrb[12].mxu1 %vm807_vm1, %v2840_v55  ;;  %v590_v14 = vor.u32 %v589_v63, %v586_v61  ;;  %v599_v15 = vrot.slane %v597_v1, 4  ;;  %v611_v18 = vshll.u32 %v3764_v53, 16  ;;  %v617_v19 = vshll.u32 %v3767_v60, 16  ;;  %v359_v45 = vld [vmem:[%s3569_s28 + $0x8c] sm:$0x1] }
  0x3e   : > { %v582_v22 = vsel %vm3613_vm4, %v577_v6, %v581_v58  ;;  %v605_v23 = vrot.slane %v603_v7, 5  ;;  %v610_v27 = vrot.slane %v608_v8, 4  ;;  %v621_v29 = vshrl.u32 %v3767_v60, 16  ;;  %v3805_v58 = vld [vmem:[%s3569_s28 + $0x90] sm:$0xf] }
  0x3f   : > { %v2841_v30 = vcombine.low %v572_v4, %v582_v22  ;;  %v591_v31 = vrot.slane %v590_v14, 4  ;;  %v600_v32 = vor.u32 %v599_v15, %v595_v0  ;;  %v613_v34 = vrot.slane %v611_v18, 5 }
  0x40   : > { %v619_v39 = vrot.slane %v617_v19, 5  ;;  %v623_v43 = vrot.slane %v621_v29, 4  ;;  %v627_v44 = vshll.u32 %v358_v2, 16  ;;  %v632_v46 = vshrl.u32 %v3777_v9, 16  ;;  %v3812_v2 = vld [vmem:[%s3569_s28 + $0x94] sm:$0xf] }
  0x41   : > { %3200 = vmatprep.mubr.msk.bf16.mxu1 %vm807_vm1, %v2841_v30  ;;  %v596_v10 = vsel %vm3613_vm4, %v591_v31, %v595_v0  ;;  %v601_v49 = vrot.slane %v600_v32, 4  ;;  %v614_v50 = vor.u32 %v613_v34, %v610_v27  ;;  %v635_v51 = vshll.u32 %v3777_v9, 16  ;;  %v360_v19 = vld [vmem:[%s3569_s28 + $0x98] sm:$0x1]  ;;  %v3825_v31 = vld [vmem:[%s3569_s28 + $0x9c] sm:$0xf] }
  0x42   : > { %v624_v52 = vor.u32 %v623_v43, %v619_v39  ;;  %v629_v55 = vrot.slane %v627_v44, 5  ;;  %v634_v56 = vrot.slane %v632_v46, 4  ;;  %v641_v57 = vshll.u32 %v3789_v37, 16  ;;  %v3829_v43 = vld [vmem:[%s3569_s28 + $0xa0] sm:$0xf] }
  0x43   : > { %v606_v61 = vsel %vm3613_vm4, %v601_v49, %v605_v23  ;;  %v615_v63 = vrot.slane %v614_v50, 4  ;;  %v637_v1 = vrot.slane %v635_v51, 5  ;;  %v645_v0 = vshrl.u32 %v3789_v37, 16  ;;  %v361_v51 = vld [vmem:[%s3569_s28 + $0xa4] sm:$0x1] }
  0x44   : > { %3277 = vmatmul.mubr.msk.bf16.gmra.mrb[24].mxu0 %vm807_vm1, %v3462_v35  ;;  %v2842_v4 = vcombine.low %v596_v10, %v606_v61  ;;  %v625_v6 = vrot.slane %v624_v52, 4  ;;  %v643_v7 = vrot.slane %v641_v57, 5  ;;  %v651_v8 = vshll.u32 %v359_v45, 16 }
  0x45   : > { %3280 = vmatprep.mubr.msk.bf16.mxu0 %vm807_vm1, %v3463_v38  ;;  %v620_v14 = vsel %vm3613_vm4, %v615_v63, %v619_v39  ;;  %v638_v15 = vor.u32 %v637_v1, %v634_v56  ;;  %v647_v18 = vrot.slane %v645_v0, 4  ;;  %v656_v22 = vshrl.u32 %v3805_v58, 16  ;;  %v3464_v39 = vld [vmem:[%s3797_s8] sm:$0xff]   ;;  %v2964_v1 = vld [vmem:[%s3569_s28 + $0xc] sm:$0xf] }
  0x46   : > { %3201 = vmatmul.mubr.msk.bf16.gmra.mrb[16].mxu1 %vm807_vm1, %v2842_v4  ;;  %v630_v23 = vsel %vm3613_vm4, %v625_v6, %v629_v55  ;;  %v653_v27 = vrot.slane %v651_v8, 5  ;;  %v659_v29 = vshll.u32 %v3805_v58, 16  ;;  %v665_v30 = vshll.u32 %v3812_v2, 16  ;;  %v2965_v8 = vld [vmem:[%s3569_s28 + $0x10] sm:$0xf] }
  0x47   : > { %v2843_v32 = vcombine.low %v620_v14, %v630_v23  ;;  %v639_v34 = vrot.slane %v638_v15, 4  ;;  %v648_v35 = vor.u32 %v647_v18, %v643_v7  ;;  %v658_v38 = vrot.slane %v656_v22, 4 }
  0x48   : > { %v661_v44 = vrot.slane %v659_v29, 5  ;;  %v667_v45 = vrot.slane %v665_v30, 5  ;;  %v669_v46 = vshrl.u32 %v3812_v2, 16  ;;  %v675_v10 = vshll.u32 %v360_v19, 16 }
  0x49   : > { %3204 = vmatprep.mubr.msk.bf16.mxu1 %vm807_vm1, %v2843_v32  ;;  %v644_v49 = vsel %vm3613_vm4, %v639_v34, %v643_v7  ;;  %v649_v50 = vrot.slane %v648_v35, 4  ;;  %v680_v52 = vshrl.u32 %v3825_v31, 16  ;;  %v683_v55 = vshll.u32 %v3825_v31, 16  ;;  %v2966_v34 = vld [vmem:[%s3569_s28 + $0x14] sm:$0x1] }
  0x4a   : > { %v662_v56 = vor.u32 %v661_v44, %v658_v38  ;;  %v671_v57 = vrot.slane %v669_v46, 4  ;;  %v677_v61 = vrot.slane %v675_v10, 5  ;;  %v689_v63 = vshll.u32 %v3829_v43, 16 }
  0x4b   : > { %v654_v0 = vsel %vm3613_vm4, %v649_v50, %v653_v27  ;;  %v682_v4 = vrot.slane %v680_v52, 4  ;;  %v685_v6 = vrot.slane %v683_v55, 5  ;;  %v693_v7 = vshrl.u32 %v3829_v43, 16 }
  0x4c   : > { %3281 = vmatmul.mubr.msk.bf16.gmra.mrb[28].mxu0 %vm807_vm1, %v3464_v39  ;;  %v2844_v14 = vcombine.low %v644_v49, %v654_v0  ;;  %v663_v15 = vrot.slane %v662_v56, 4  ;;  %v672_v18 = vor.u32 %v671_v57, %v667_v45  ;;  %v691_v19 = vrot.slane %v689_v63, 5  ;;  %v3850_v49 = vld [vmem:[%s3569_s28 + $0xa8] sm:$0xf]  ;;  %v3855_v56 = vld [vmem:[%s3569_s28 + $0xac] sm:$0xf] }
  0x4d   : > { %v686_v22 = vor.u32 %v685_v6, %v682_v4  ;;  %v695_v23 = vrot.slane %v693_v7, 4  ;;  %v699_v29 = vshll.u32 %v361_v51, 16  ;;  %v1732_v30 = vshrl.u32 %v2964_v1, 16  ;;  %v362_v6 = vld [vmem:[%s3569_s28 + $0xb0] sm:$0x1] }
  0x4e   : > { %3205 = vmatmul.mubr.msk.bf16.gmra.mrb[20].mxu1 %vm807_vm1, %v2844_v14  ;;  %v668_v27 = vsel %vm3613_vm4, %v663_v15, %v667_v45  ;;  %v673_v32 = vrot.slane %v672_v18, 4  ;;  %v1735_v35 = vshll.u32 %v2964_v1, 16  ;;  %v1741_v38 = vshll.u32 %v2965_v8, 16 }
  0x4f   : > { %v687_v39 = vrot.slane %v686_v22, 4  ;;  %v696_v44 = vor.u32 %v695_v23, %v691_v19  ;;  %v701_v46 = vrot.slane %v699_v29, 5  ;;  %v1734_v10 = vrot.slane %v1732_v30, 4 }
  0x50   : > { %v678_v50 = vsel %vm3613_vm4, %v673_v32, %v677_v61  ;;  %v1737_v51 = vrot.slane %v1735_v35, 5  ;;  %v1743_v52 = vrot.slane %v1741_v38, 5  ;;  %v1745_v55 = vshrl.u32 %v2965_v8, 16 }
  0x51   : > { %v2845_v45 = vcombine.low %v668_v27, %v678_v50  ;;  %v692_v57 = vsel %vm3613_vm4, %v687_v39, %v691_v19  ;;  %v697_v63 = vrot.slane %v696_v44, 4  ;;  %v1751_v1 = vshll.u32 %v2966_v34, 16  ;;  %v2967_v19 = vld [vmem:[%s3569_s28 + $0x18] sm:$0xf]  ;;  %v2968_v27 = vld [vmem:[%s3569_s28 + $0x1c] sm:$0xf] }
  0x52   : > { %v1738_v0 = vor.u32 %v1737_v51, %v1734_v10  ;;  %v1747_v4 = vrot.slane %v1745_v55, 4  ;;  %v704_v7 = vshrl.u32 %v3850_v49, 16  ;;  %v707_v61 = vshll.u32 %v3850_v49, 16 }
  0x53   : > { %3208 = vmatprep.mubr.msk.bf16.mxu1 %vm807_vm1, %v2845_v45  ;;  %v702_v8 = vsel %vm3613_vm4, %v697_v63, %v701_v46  ;;  %v1753_v14 = vrot.slane %v1751_v1, 5  ;;  %v713_v15 = vshll.u32 %v3855_v56, 16  ;;  %v717_v18 = vshrl.u32 %v3855_v56, 16  ;;  %v2969_v45 = vld [vmem:[%s3569_s28 + $0x20] sm:$0x1] }
  0x54   : > { %v2846_v22 = vcombine.low %v692_v57, %v702_v8  ;;  %v1739_v23 = vrot.slane %v1738_v0, 4  ;;  %v1748_v29 = vor.u32 %v1747_v4, %v1743_v52  ;;  %v706_v30 = vrot.slane %v704_v7, 4  ;;  %v3874_v63 = vld [vmem:[%s3569_s28 + $0xb4] sm:$0xf]  ;;  %v3879_v7 = vld [vmem:[%s3569_s28 + $0xb8] sm:$0xf] }
  0x55   : > { %v709_v32 = vrot.slane %v707_v61, 5  ;;  %v715_v34 = vrot.slane %v713_v15, 5  ;;  %v719_v35 = vrot.slane %v717_v18, 4  ;;  %v723_v38 = vshll.u32 %v362_v6, 16 }
  0x56   : > { %3209 = vmatmul.mubr.msk.bf16.gmra.mrb[24].mxu1 %vm807_vm1, %v2846_v22  ;;  %v1744_v39 = vsel %vm3613_vm4, %v1739_v23, %v1743_v52  ;;  %v1749_v44 = vrot.slane %v1748_v29, 4  ;;  %v1756_v46 = vshrl.u32 %v2967_v19, 16  ;;  %v1759_v10 = vshll.u32 %v2967_v19, 16 }
  0x57   : > { %v710_v50 = vor.u32 %v709_v32, %v706_v30  ;;  %v720_v51 = vor.u32 %v719_v35, %v715_v34  ;;  %v725_v55 = vrot.slane %v723_v38, 5  ;;  %v1765_v57 = vshll.u32 %v2968_v27, 16  ;;  %v363_v30 = vld [vmem:[%s3569_s28 + $0xbc] sm:$0x1]  ;;  %v2970_v35 = vld [vmem:[%s3569_s28 + $0x24] sm:$0xf] }
  0x58   : > { %v1754_v1 = vsel %vm3613_vm4, %v1749_v44, %v1753_v14  ;;  %v1758_v0 = vrot.slane %v1756_v46, 4  ;;  %v1761_v4 = vrot.slane %v1759_v10, 5  ;;  %v1769_v6 = vshrl.u32 %v2968_v27, 16  ;;  %v2971_v10 = vld [vmem:[%s3569_s28 + $0x28] sm:$0xf] }
  0x59   : > { %v3011_v52 = vcombine.low %v1744_v39, %v1754_v1  ;;  %v711_v61 = vrot.slane %v710_v50, 4  ;;  %v721_v8 = vrot.slane %v720_v51, 4  ;;  %v1767_v15 = vrot.slane %v1765_v57, 5 }
  0x5a   : > { %v1762_v18 = vor.u32 %v1761_v4, %v1758_v0  ;;  %v1771_v19 = vrot.slane %v1769_v6, 4  ;;  %v1775_v22 = vshll.u32 %v2969_v45, 16  ;;  %v728_v23 = vshrl.u32 %v3874_v63, 16  ;;  %v2972_v0 = vld [vmem:[%s3569_s28 + $0x2c] sm:$0x1] }
  0x5b   : > { %3286 = vmatprep.mubr.msk.bf16.mxu0 %vm807_vm1, %v3011_v52  ;;  %v716_v14 = vsel %vm3613_vm4, %v711_v61, %v715_v34  ;;  %v726_v29 = vsel %vm3613_vm4, %v721_v8, %v725_v55  ;;  %v731_v27 = vshll.u32 %v3874_v63, 16  ;;  %v737_v32 = vshll.u32 %v3879_v7, 16 }
  0x5c   : > { %v2847_v38 = vcombine.low %v716_v14, %v726_v29  ;;  %v1763_v39 = vrot.slane %v1762_v18, 4  ;;  %v1772_v44 = vor.u32 %v1771_v19, %v1767_v15  ;;  %v1777_v46 = vrot.slane %v1775_v22, 5  ;;  %v2973_v18 = vld [vmem:[%s3569_s28 + $0x30] sm:$0xf] }
  0x5d   : > { %v730_v50 = vrot.slane %v728_v23, 4  ;;  %v733_v51 = vrot.slane %v731_v27, 5  ;;  %v739_v45 = vrot.slane %v737_v32, 5  ;;  %v741_v34 = vshrl.u32 %v3879_v7, 16 }
  0x5e   : > { %3212 = vmatprep.mubr.msk.bf16.mxu1 %vm807_vm1, %v2847_v38  ;;  %v1768_v55 = vsel %vm3613_vm4, %v1763_v39, %v1767_v15  ;;  %v1773_v57 = vrot.slane %v1772_v44, 4  ;;  %v747_v1 = vshll.u32 %v363_v30, 16  ;;  %v1780_v4 = vshrl.u32 %v2970_v35, 16  ;;  %v2974_v30 = vld [vmem:[%s3569_s28 + $0x34] sm:$0xf] }
  0x5f   : > { %v734_v6 = vor.u32 %v733_v51, %v730_v50  ;;  %v743_v52 = vrot.slane %v741_v34, 4  ;;  %v1783_v61 = vshll.u32 %v2970_v35, 16  ;;  %v1789_v8 = vshll.u32 %v2971_v10, 16  ;;  %v2975_v34 = vld [vmem:[%s3569_s28 + $0x38] sm:$0x1] }
  0x60   : > { %v1778_v19 = vsel %vm3613_vm4, %v1773_v57, %v1777_v46  ;;  %v749_v22 = vrot.slane %v747_v1, 5  ;;  %v1782_v23 = vrot.slane %v1780_v4, 4  ;;  %v1793_v14 = vshrl.u32 %v2971_v10, 16 }
  0x61   : > { %v3012_v29 = vcombine.low %v1768_v55, %v1778_v19  ;;  %v735_v27 = vrot.slane %v734_v6, 4  ;;  %v744_v15 = vor.u32 %v743_v52, %v739_v45  ;;  %v1785_v32 = vrot.slane %v1783_v61, 5  ;;  %v2976_v6 = vld [vmem:[%s3569_s28 + $0x3c] sm:$0xf]  ;;  %v2977_v19 = vld [vmem:[%s3569_s28 + $0x40] sm:$0xf] }
  0x62   : > { %v1791_v38 = vrot.slane %v1789_v8, 5  ;;  %v1795_v39 = vrot.slane %v1793_v14, 4  ;;  %v1799_v44 = vshll.u32 %v2972_v0, 16  ;;  %v1804_v50 = vshrl.u32 %v2973_v18, 16 }
  0x63   : > { %3287 = vmatmul.mubr.msk.bf16.vlgmr.msra.gmra.mrb[0].mxu0 %vm807_vm1, %v3012_v29  ;;  %v740_v35 = vsel %vm3613_vm4, %v735_v27, %v739_v45  ;;  %v745_v46 = vrot.slane %v744_v15, 4  ;;  %v1786_v51 = vor.u32 %v1785_v32, %v1782_v23  ;;  %v1807_v10 = vshll.u32 %v2973_v18, 16  ;;  %v2978_v32 = vld [vmem:[%s3569_s28 + $0x44] sm:$0x1] }
  0x64   : > { %v1796_v55 = vor.u32 %v1795_v39, %v1791_v38  ;;  %v1801_v57 = vrot.slane %v1799_v44, 5  ;;  %v1806_v1 = vrot.slane %v1804_v50, 4  ;;  %v1813_v4 = vshll.u32 %v2974_v30, 16 }
  0x65   : > { %v750_v0 = vsel %vm3613_vm4, %v745_v46, %v749_v22  ;;  %v1787_v52 = vrot.slane %v1786_v51, 4  ;;  %v1809_v61 = vrot.slane %v1807_v10, 5  ;;  %v1817_v8 = vshrl.u32 %v2974_v30, 16 }
  0x66   : > { %v2848_v14 = vcombine.low %v740_v35, %v750_v0  ;;  %v1797_v45 = vrot.slane %v1796_v55, 4  ;;  %v1815_v29 = vrot.slane %v1813_v4, 5  ;;  %v1823_v23 = vshll.u32 %v2975_v34, 16  ;;  %v2979_v35 = vld [vmem:[%s3569_s28 + $0x48] sm:$0xf] }
  0x67   : > { %v1792_v18 = vsel %vm3613_vm4, %v1787_v52, %v1791_v38  ;;  %v1810_v27 = vor.u32 %v1809_v61, %v1806_v1  ;;  %v1819_v15 = vrot.slane %v1817_v8, 4  ;;  %v1828_v39 = vshrl.u32 %v2976_v6, 16  ;;  %v2981_v8 = vld [vmem:[%s3569_s28 + $0x50] sm:$0x1] }
  0x68   : > { %3213 = vmatmul.mubr.msk.bf16.gmra.mrb[28].mxu1 %vm807_vm1, %v2848_v14  ;;  %v1802_v22 = vsel %vm3613_vm4, %v1797_v45, %v1801_v57  ;;  %v1825_v30 = vrot.slane %v1823_v23, 5  ;;  %v1831_v44 = vshll.u32 %v2976_v6, 16  ;;  %v1837_v50 = vshll.u32 %v2977_v19, 16  ;;  %v2980_v57 = vld [vmem:[%s3569_s28 + $0x4c] sm:$0xf] }
  0x69   : > { %v3013_v46 = vcombine.low %v1792_v18, %v1802_v22  ;;  %3218 = vmatprep.mubr.msk.bf16.mxu1 %vm807_vm1, %v2866_v21  ;;  %v1811_v38 = vrot.slane %v1810_v27, 4  ;;  %v1820_v51 = vor.u32 %v1819_v15, %v1815_v29  ;;  %v1830_v34 = vrot.slane %v1828_v39, 4  ;;  %v2982_v27 = vld [vmem:[%s3569_s28 + $0x54] sm:$0xf] }
  0x6a   : > { %v1833_v10 = vrot.slane %v1831_v44, 5  ;;  %v1839_v55 = vrot.slane %v1837_v50, 5  ;;  %v1841_v1 = vshrl.u32 %v2977_v19, 16  ;;  %v1847_v4 = vshll.u32 %v2978_v32, 16 }
  0x6b   : > { %3290 = vmatprep.mubr.msk.bf16.mxu0 %vm807_vm1, %v3013_v46  ;;  %v1816_v6 = vsel %vm3613_vm4, %v1811_v38, %v1815_v29  ;;  %v1821_v0 = vrot.slane %v1820_v51, 4  ;;  %v2868_v11 = vcombine.low %v3619_v41, %v3624_v47  ;;  %v1852_v12 = vshrl.u32 %v2979_v35, 16  ;;  %v2983_v41 = vld [vmem:[%s3569_s28 + $0x58] sm:$0xf] }
  0x6c   : > { %v1834_v21 = vor.u32 %v1833_v10, %v1830_v34  ;;  %v1843_v52 = vrot.slane %v1841_v1, 4  ;;  %v1849_v61 = vrot.slane %v1847_v4, 5  ;;  %v1855_v14 = vshll.u32 %v2979_v35, 16  ;;  %v2985_v4 = vld [vmem:[%s3569_s28 + $0x60] sm:$0xf] }
  0x6d   : > { %v1826_v19 = vsel %vm3613_vm4, %v1821_v0, %v1825_v30  ;;  %v1854_v45 = vrot.slane %v1852_v12, 4  ;;  %v1861_v23 = vshll.u32 %v2980_v57, 16  ;;  %v1865_v18 = vshrl.u32 %v2980_v57, 16  ;;  %v2986_v12 = vld [vmem:[%s3569_s28 + $0x64] sm:$0xf] }
  0x6e   : > { %v3014_v15 = vcombine.low %v1816_v6, %v1826_v19  ;;  %v1835_v29 = vrot.slane %v1834_v21, 4  ;;  %v1844_v32 = vor.u32 %v1843_v52, %v1839_v55  ;;  %v1857_v39 = vrot.slane %v1855_v14, 5  ;;  %v2987_v19 = vld [vmem:[%s3569_s28 + $0x68] sm:$0x1] }
  0x6f   : > { %v1863_v47 = vrot.slane %v1861_v23, 5  ;;  %v1867_v22 = vrot.slane %v1865_v18, 4  ;;  %v1871_v44 = vshll.u32 %v2981_v8, 16  ;;  %v2869_v50 = vcombine.low %v3639_v62, %v3642_v3  ;;  %v2984_v62 = vld [vmem:[%s3569_s28 + $0x5c] sm:$0x1] }
  0x70   : > { %3291 = vmatmul.mubr.msk.bf16.gmra.mrb[4].mxu0 %vm807_vm1, %v3014_v15  ;;  %3219 = vmatmul.mubr.msk.bf16.vlgmr.msra.gmra.mrb[0].mxu1 %vm807_vm1, %v2867_v42  ;;  %v1840_v30 = vsel %vm3613_vm4, %v1835_v29, %v1839_v55  ;;  %v1845_v35 = vrot.slane %v1844_v32, 4  ;;  %v1858_v46 = vor.u32 %v1857_v39, %v1854_v45  ;;  %v1876_v38 = vshrl.u32 %v2982_v27, 16  ;;  %v2988_v32 = vld [vmem:[%s3569_s28 + $0x6c] sm:$0xf] }
  0x71   : > { %3222 = vmatprep.mubr.msk.bf16.mxu1 %vm807_vm1, %v2868_v11  ;;  %v1868_v51 = vor.u32 %v1867_v22, %v1863_v47  ;;  %v1873_v34 = vrot.slane %v1871_v44, 5  ;;  %v1879_v3 = vshll.u32 %v2982_v27, 16  ;;  %v1885_v10 = vshll.u32 %v2983_v41, 16 }
  0x72   : > { %v1850_v20 = vsel %vm3613_vm4, %v1845_v35, %v1849_v61  ;;  %v1859_v26 = vrot.slane %v1858_v46, 4  ;;  %v1878_v42 = vrot.slane %v1876_v38, 4  ;;  %v1889_v1 = vshrl.u32 %v2983_v41, 16 }
  0x73   : > { %v3015_v55 = vcombine.low %v1840_v30, %v1850_v20  ;;  %v1869_v57 = vrot.slane %v1868_v51, 4  ;;  %v1881_v6 = vrot.slane %v1879_v3, 5  ;;  %v1887_v0 = vrot.slane %v1885_v10, 5 }
  0x74   : > { %v1864_v11 = vsel %vm3613_vm4, %v1859_v26, %v1863_v47  ;;  %v1891_v21 = vrot.slane %v1889_v1, 4  ;;  %v1895_v52 = vshll.u32 %v2984_v62, 16  ;;  %v2870_v8 = vcombine.low %v3655_v17, %v3658_v24  ;;  %v2989_v24 = vld [vmem:[%s3569_s28 + $0x70] sm:$0xf]  ;;  %v2991_v26 = vld [vmem:[%s3569_s28 + $0x78] sm:$0xf] }
  0x75   : > { %3294 = vmatprep.mubr.msk.bf16.mxu0 %vm807_vm1, %v3015_v55  ;;  %v1874_v61 = vsel %vm3613_vm4, %v1869_v57, %v1873_v34  ;;  %v1882_v14 = vor.u32 %v1881_v6, %v1878_v42  ;;  %v1900_v45 = vshrl.u32 %v2985_v4, 16  ;;  %v1903_v23 = vshll.u32 %v2985_v4, 16  ;;  %v2990_v34 = vld [vmem:[%s3569_s28 + $0x74] sm:$0x1] }
  0x76   : > { %v3016_v18 = vcombine.low %v1864_v11, %v1874_v61  ;;  %v1892_v27 = vor.u32 %v1891_v21, %v1887_v0  ;;  %v1897_v15 = vrot.slane %v1895_v52, 5  ;;  %v1909_v29 = vshll.u32 %v2986_v12, 16 }
  0x77   : > { %v1883_v39 = vrot.slane %v1882_v14, 4  ;;  %v1902_v41 = vrot.slane %v1900_v45, 4  ;;  %v1905_v47 = vrot.slane %v1903_v23, 5  ;;  %v1913_v17 = vshrl.u32 %v2986_v12, 16 }
  0x78   : > { %3295 = vmatmul.mubr.msk.bf16.gmra.mrb[8].mxu0 %vm807_vm1, %v3016_v18  ;;  %3223 = vmatmul.mubr.msk.bf16.gmra.mrb[4].mxu1 %vm807_vm1, %v2869_v50  ;;  %v1893_v22 = vrot.slane %v1892_v27, 4  ;;  %v1911_v44 = vrot.slane %v1909_v29, 5  ;;  %v1919_v30 = vshll.u32 %v2987_v19, 16  ;;  %v2871_v35 = vcombine.low %v3674_v40, %v3677_v48  ;;  %v2993_v19 = vld [vmem:[%s3569_s28 + $0x80] sm:$0x1] }
  0x79   : > { %v1888_v46 = vsel %vm3613_vm4, %v1883_v39, %v1887_v0  ;;  %3226 = vmatprep.mubr.msk.bf16.mxu1 %vm807_vm1, %v2870_v8  ;;  %v1906_v38 = vor.u32 %v1905_v47, %v1902_v41  ;;  %v1915_v51 = vrot.slane %v1913_v17, 4  ;;  %v1924_v62 = vshrl.u32 %v2988_v32, 16  ;;  %v2992_v0 = vld [vmem:[%s3569_s28 + $0x7c] sm:$0xf]  ;;  %v2994_v29 = vld [vmem:[%s3569_s28 + $0x84] sm:$0xf] }
  0x7a   : > { %v1898_v3 = vsel %vm3613_vm4, %v1893_v22, %v1897_v15  ;;  %v1921_v50 = vrot.slane %v1919_v30, 5  ;;  %v1927_v10 = vshll.u32 %v2988_v32, 16  ;;  %v1933_v20 = vshll.u32 %v2989_v24, 16  ;;  %v2995_v41 = vld [vmem:[%s3569_s28 + $0x88] sm:$0xf] }
  0x7b   : > { %v3017_v42 = vcombine.low %v1888_v46, %v1898_v3  ;;  %v1907_v1 = vrot.slane %v1906_v38, 4  ;;  %v1916_v40 = vor.u32 %v1915_v51, %v1911_v44  ;;  %v1926_v48 = vrot.slane %v1924_v62, 4 }
  0x7c   : > { %v1929_v4 = vrot.slane %v1927_v10, 5  ;;  %v1935_v55 = vrot.slane %v1933_v20, 5  ;;  %v1937_v57 = vshrl.u32 %v2989_v24, 16  ;;  %v1943_v6 = vshll.u32 %v2990_v34, 16  ;;  %v2996_v34 = vld [vmem:[%s3569_s28 + $0x8c] sm:$0x1] }
  0x7d   : > { %3298 = vmatprep.mubr.msk.bf16.mxu0 %vm807_vm1, %v3017_v42  ;;  %v1912_v12 = vsel %vm3613_vm4, %v1907_v1, %v1911_v44  ;;  %v1917_v11 = vrot.slane %v1916_v40, 4  ;;  %v2872_v21 = vcombine.low %v3691_v5, %v3696_v13  ;;  %v1948_v52 = vshrl.u32 %v2991_v26, 16  ;;  %v2997_v20 = vld [vmem:[%s3569_s28 + $0x90] sm:$0xf] }
  0x7e   : > { %v1930_v8 = vor.u32 %v1929_v4, %v1926_v48  ;;  %v1939_v61 = vrot.slane %v1937_v57, 4  ;;  %v1945_v14 = vrot.slane %v1943_v6, 5  ;;  %v1951_v45 = vshll.u32 %v2991_v26, 16  ;;  %v2998_v48 = vld [vmem:[%s3569_s28 + $0x94] sm:$0xf] }
  0x7f   : > { %v1922_v23 = vsel %vm3613_vm4, %v1917_v11, %v1921_v50  ;;  %v1950_v18 = vrot.slane %v1948_v52, 4  ;;  %v1957_v27 = vshll.u32 %v2992_v0, 16  ;;  %v1961_v15 = vshrl.u32 %v2992_v0, 16  ;;  %v2999_v11 = vld [vmem:[%s3569_s28 + $0x98] sm:$0x1] }
  0x80   : > { %v3018_v32 = vcombine.low %v1912_v12, %v1922_v23  ;;  %3227 = vmatmul.mubr.msk.bf16.gmra.mrb[8].mxu1 %vm807_vm1, %v2871_v35  ;;  %v1931_v39 = vrot.slane %v1930_v8, 4  ;;  %v1940_v5 = vor.u32 %v1939_v61, %v1935_v55  ;;  %v1953_v13 = vrot.slane %v1951_v45, 5  ;;  %v3000_v45 = vld [vmem:[%s3569_s28 + $0x9c] sm:$0xf] }
  0x81   : > { %3230 = vmatprep.mubr.msk.bf16.mxu1 %vm807_vm1, %v2872_v21  ;;  %v1959_v47 = vrot.slane %v1957_v27, 5  ;;  %v1963_v17 = vrot.slane %v1961_v15, 4  ;;  %v1967_v24 = vshll.u32 %v2993_v19, 16  ;;  %v2873_v22 = vcombine.low %v3706_v28, %v3712_v33  ;;  %v3001_v27 = vld [vmem:[%s3569_s28 + $0xa0] sm:$0xf] }
  0x82   : > { %3299 = vmatmul.mubr.msk.bf16.gmra.mrb[12].mxu0 %vm807_vm1, %v3018_v32  ;;  %v1936_v44 = vsel %vm3613_vm4, %v1931_v39, %v1935_v55  ;;  %v1941_v30 = vrot.slane %v1940_v5, 4  ;;  %v1954_v35 = vor.u32 %v1953_v13, %v1950_v18  ;;  %v1972_v46 = vshrl.u32 %v2994_v29, 16 }
  0x83   : > { %v1964_v38 = vor.u32 %v1963_v17, %v1959_v47  ;;  %v1969_v51 = vrot.slane %v1967_v24, 5  ;;  %v1975_v62 = vshll.u32 %v2994_v29, 16  ;;  %v1981_v3 = vshll.u32 %v2995_v41, 16 }
  0x84   : > { %v1946_v50 = vsel %vm3613_vm4, %v1941_v30, %v1945_v14  ;;  %v1955_v10 = vrot.slane %v1954_v35, 4  ;;  %v1974_v28 = vrot.slane %v1972_v46, 4  ;;  %v1985_v33 = vshrl.u32 %v2995_v41, 16  ;;  %v3003_v35 = vld [vmem:[%s3569_s28 + $0xa8] sm:$0xf] }
  0x85   : > { %v3019_v26 = vcombine.low %v1936_v44, %v1946_v50  ;;  %v1965_v42 = vrot.slane %v1964_v38, 4  ;;  %v1977_v1 = vrot.slane %v1975_v62, 5  ;;  %v1983_v40 = vrot.slane %v1981_v3, 5  ;;  %v3004_v50 = vld [vmem:[%s3569_s28 + $0xac] sm:$0xf] }
  0x86   : > { %v1960_v4 = vsel %vm3613_vm4, %v1955_v10, %v1959_v47  ;;  %v1987_v55 = vrot.slane %v1985_v33, 4  ;;  %v1991_v57 = vshll.u32 %v2996_v34, 16  ;;  %v2874_v6 = vcombine.low %v3723_v54, %v3732_v59  ;;  %v3002_v47 = vld [vmem:[%s3569_s28 + $0xa4] sm:$0x1] }
  0x87   : > { %3302 = vmatprep.mubr.msk.bf16.mxu0 %vm807_vm1, %v3019_v26  ;;  %v1970_v0 = vsel %vm3613_vm4, %v1965_v42, %v1969_v51  ;;  %v1978_v12 = vor.u32 %v1977_v1, %v1974_v28  ;;  %v1996_v21 = vshrl.u32 %v2997_v20, 16  ;;  %v1999_v52 = vshll.u32 %v2997_v20, 16 }
  0x88   : > { %v3020_v8 = vcombine.low %v1960_v4, %v1970_v0  ;;  %3231 = vmatmul.mubr.msk.bf16.gmra.mrb[12].mxu1 %vm807_vm1, %v2873_v22  ;;  %v1988_v61 = vor.u32 %v1987_v55, %v1983_v40  ;;  %v1993_v14 = vrot.slane %v1991_v57, 5  ;;  %v2005_v19 = vshll.u32 %v2998_v48, 16  ;;  %v3006_v0 = vld [vmem:[%s3569_s28 + $0xb4] sm:$0xf] }
  0x89   : > { %v1979_v23 = vrot.slane %v1978_v12, 4  ;;  %3234 = vmatprep.mubr.msk.bf16.mxu1 %vm807_vm1, %v2874_v6  ;;  %v1998_v54 = vrot.slane %v1996_v21, 4  ;;  %v2001_v59 = vrot.slane %v1999_v52, 5  ;;  %v2009_v18 = vshrl.u32 %v2998_v48, 16  ;;  %v3007_v21 = vld [vmem:[%s3569_s28 + $0xb8] sm:$0xf] }
  0x8a   : > { %3303 = vmatmul.mubr.msk.bf16.gmra.mrb[16].mxu0 %vm807_vm1, %v3020_v8  ;;  %v1989_v15 = vrot.slane %v1988_v61, 4  ;;  %v2007_v29 = vrot.slane %v2005_v19, 5  ;;  %v2015_v32 = vshll.u32 %v2999_v11, 16  ;;  %v2875_v39 = vcombine.low %v3742_v16, %v3747_v25 }
  0x8b   : > { %v1984_v5 = vsel %vm3613_vm4, %v1979_v23, %v1983_v40  ;;  %v2002_v13 = vor.u32 %v2001_v59, %v1998_v54  ;;  %v2011_v41 = vrot.slane %v2009_v18, 4  ;;  %v2020_v17 = vshrl.u32 %v3000_v45, 16  ;;  %v3005_v40 = vld [vmem:[%s3569_s28 + $0xb0] sm:$0x1] }
  0x8c   : > { %v1994_v24 = vsel %vm3613_vm4, %v1989_v15, %v1993_v14  ;;  %v2017_v22 = vrot.slane %v2015_v32, 5  ;;  %v2023_v44 = vshll.u32 %v3000_v45, 16  ;;  %v2029_v30 = vshll.u32 %v3001_v27, 16 }
  0x8d   : > { %v3021_v46 = vcombine.low %v1984_v5, %v1994_v24  ;;  %v2003_v38 = vrot.slane %v2002_v13, 4  ;;  %v2012_v51 = vor.u32 %v2011_v41, %v2007_v29  ;;  %v2022_v16 = vrot.slane %v2020_v17, 4  ;;  %v1729_v24 = vld [vmem:[%s3797_s8 + $0x4] sm:$0xf] }
  0x8e   : > { %v2025_v25 = vrot.slane %v2023_v44, 5  ;;  %v2031_v34 = vrot.slane %v2029_v30, 5  ;;  %v2033_v62 = vshrl.u32 %v3001_v27, 16  ;;  %v2039_v3 = vshll.u32 %v3002_v47, 16  ;;  %v3008_v27 = vld [vmem:[%s3569_s28 + $0xbc] sm:$0x1] }
  0x8f   : > { %3306 = vmatprep.mubr.msk.bf16.mxu0 %vm807_vm1, %v3021_v46  ;;  %v2008_v10 = vsel %vm3613_vm4, %v2003_v38, %v2007_v29  ;;  %v2013_v28 = vrot.slane %v2012_v51, 4  ;;  %v2876_v33 = vcombine.low %v3764_v53, %v3767_v60  ;;  %v2044_v20 = vshrl.u32 %v3003_v35, 16  ;;  %v1730_v51 = vld [vmem:[%s3797_s8 + $0x8] sm:$0x1] }
  0x90   : > { %3235 = vmatmul.mubr.msk.bf16.gmra.mrb[16].mxu1 %vm807_vm1, %v2875_v39  ;;  %v2026_v26 = vor.u32 %v2025_v25, %v2022_v16  ;;  %v2035_v42 = vrot.slane %v2033_v62, 4  ;;  %v2041_v1 = vrot.slane %v2039_v3, 5  ;;  %v2047_v48 = vshll.u32 %v3003_v35, 16 }
  0x91   : > { %v2018_v4 = vsel %vm3613_vm4, %v2013_v28, %v2017_v22  ;;  %3238 = vmatprep.mubr.msk.bf16.mxu1 %vm807_vm1, %v2876_v33  ;;  %v2046_v55 = vrot.slane %v2044_v20, 4  ;;  %v2053_v57 = vshll.u32 %v3004_v50, 16  ;;  %v2057_v6 = vshrl.u32 %v3004_v50, 16 }
  0x92   : > { %v3022_v12 = vcombine.low %v2008_v10, %v2018_v4  ;;  %v2027_v53 = vrot.slane %v2026_v26, 4  ;;  %v2036_v60 = vor.u32 %v2035_v42, %v2031_v34  ;;  %v2049_v11 = vrot.slane %v2047_v48, 5 }
  0x93   : > { %v2055_v52 = vrot.slane %v2053_v57, 5  ;;  %v2059_v8 = vrot.slane %v2057_v6, 4  ;;  %v2063_v61 = vshll.u32 %v3005_v40, 16  ;;  %v2877_v14 = vcombine.low %v3777_v9, %v3789_v37  ;;  %v1728_v37 = vld [vmem:[%s3797_s8] sm:$0xf] }
  0x94   : > { %3307 = vmatmul.mubr.msk.bf16.gmra.mrb[20].mxu0 %vm807_vm1, %v3022_v12  ;;  %v2032_v19 = vsel %vm3613_vm4, %v2027_v53, %v2031_v34  ;;  %v2037_v45 = vrot.slane %v2036_v60, 4  ;;  %v2050_v23 = vor.u32 %v2049_v11, %v2046_v55  ;;  %v2068_v54 = vshrl.u32 %v3006_v0, 16 }
  0x95   : > { %v2060_v59 = vor.u32 %v2059_v8, %v2055_v52  ;;  %v2065_v18 = vrot.slane %v2063_v61, 5  ;;  %v2071_v15 = vshll.u32 %v3006_v0, 16  ;;  %v2077_v29 = vshll.u32 %v3007_v21, 16 }
  0x96   : > { %v2042_v32 = vsel %vm3613_vm4, %v2037_v45, %v2041_v1  ;;  %v2051_v39 = vrot.slane %v2050_v23, 4  ;;  %v2070_v5 = vrot.slane %v2068_v54, 4  ;;  %v2081_v9 = vshrl.u32 %v3007_v21, 16 }
  0x97   : > { %v3023_v13 = vcombine.low %v2032_v19, %v2042_v32  ;;  %v2061_v41 = vrot.slane %v2060_v59, 4  ;;  %v2073_v47 = vrot.slane %v2071_v15, 5  ;;  %v2079_v17 = vrot.slane %v2077_v29, 5 }
  0x98   : > { %v2056_v22 = vsel %vm3613_vm4, %v2051_v39, %v2055_v52  ;;  %3239 = vmatmul.mubr.msk.bf16.gmra.mrb[20].mxu1 %vm807_vm1, %v2877_v14  ;;  %v2083_v44 = vrot.slane %v2081_v9, 4  ;;  %v2087_v30 = vshll.u32 %v3008_v27, 16  ;;  %v2878_v35 = vcombine.low %v3805_v58, %v3812_v2 }
  0x99   : > { %3310 = vmatprep.mubr.msk.bf16.mxu0 %vm807_vm1, %v3023_v13  ;;  %v2066_v46 = vsel %vm3613_vm4, %v2061_v41, %v2065_v18  ;;  %v2074_v38 = vor.u32 %v2073_v47, %v2070_v5  ;;  %v2092_v16 = vshrl.u32 %v1728_v37, 16  ;;  %v2095_v25 = vshll.u32 %v1728_v37, 16 }
  0x9a   : > { %v3024_v34 = vcombine.low %v2056_v22, %v2066_v46  ;;  %v2084_v62 = vor.u32 %v2083_v44, %v2079_v17  ;;  %v2089_v3 = vrot.slane %v2087_v30, 5  ;;  %3242 = vmatprep.mubr.msk.bf16.mxu1 %vm807_vm1, %v2878_v35  ;;  %v2101_v50 = vshll.u32 %v1729_v24, 16 }
  0x9b   : > { %v2075_v10 = vrot.slane %v2074_v38, 4  ;;  %v2094_v28 = vrot.slane %v2092_v16, 4  ;;  %v2097_v33 = vrot.slane %v2095_v25, 5  ;;  %v2105_v20 = vshrl.u32 %v1729_v24, 16 }
  0x9c   : > { %3311 = vmatmul.mubr.msk.bf16.gmra.mrb[24].mxu0 %vm807_vm1, %v3024_v34  ;;  %v2085_v58 = vrot.slane %v2084_v62, 4  ;;  %v2103_v2 = vrot.slane %v2101_v50, 5  ;;  %v2111_v26 = vshll.u32 %v1730_v51, 16  ;;  %v2879_v42 = vcombine.low %v3825_v31, %v3829_v43 }
  0x9d   : > { %v2080_v1 = vsel %vm3613_vm4, %v2075_v10, %v2079_v17  ;;  %v2098_v40 = vor.u32 %v2097_v33, %v2094_v28  ;;  %v2107_v48 = vrot.slane %v2105_v20, 4  ;;  %v2880_v4 = vcombine.low %v3850_v49, %v3855_v56 }
  0x9e   : > { %v2090_v55 = vsel %vm3613_vm4, %v2085_v58, %v2089_v3  ;;  %v2113_v12 = vrot.slane %v2111_v26, 5  ;;  %v2881_v53 = vcombine.low %v3874_v63, %v3879_v7 }
  0x9f   : > { %v3025_v57 = vcombine.low %v2080_v1, %v2090_v55  ;;  %v2099_v6 = vrot.slane %v2098_v40, 4  ;;  %v2108_v0 = vor.u32 %v2107_v48, %v2103_v2 }
  0xa0   : > { %3243 = vmatmul.mubr.msk.bf16.gmra.mrb[24].mxu1 %vm807_vm1, %v2879_v42 }
  0xa1   : > { %3314 = vmatprep.mubr.msk.bf16.mxu0 %vm807_vm1, %v3025_v57  ;;  %v2104_v31 = vsel %vm3613_vm4, %v2099_v6, %v2103_v2  ;;  %v2109_v43 = vrot.slane %v2108_v0, 4  ;;  %3246 = vmatprep.mubr.msk.bf16.mxu1 %vm807_vm1, %v2880_v4 }
  0xa3   : > { %v2114_v49 = vsel %vm3613_vm4, %v2109_v43, %v2113_v12 }
  0xa4   : > { %v3026_v56 = vcombine.low %v2104_v31, %v2114_v49 }
  0xa6   : > { %3315 = vmatmul.mubr.msk.bf16.gmra.mrb[28].mxu0 %vm807_vm1, %v3026_v56 }
  0xa8   : > { %3247 = vmatmul.mubr.msk.bf16.gmra.mrb[28].mxu1 %vm807_vm1, %v2881_v53 }
 0x136   : > { %v3288_v60 = vpop.f32.mrb[0].mxu0 }
 0x137   : > { %v2256_v11 = vpop.f32.mrb[1].mxu0 }
 0x138   : > { %v3289_v21 = vpop.f32.mrb[2].mxu0 }
 0x139   : > { %v2259_v52 = vpop.f32.mrb[3].mxu0 }
 0x143   : > { %v3292_v8 = vpop.f32.mrb[4].mxu0  ;;  %v3220_v61 = vpop.f32.mrb[0].mxu1 }
 0x144   : > { %v3318_v14 = vadd.f32 %v3288_v60, %v3220_v61  ;;  %v2272_v19 = vpop.f32.mrb[5].mxu0  ;;  %v1191_v45 = vpop.f32.mrb[1].mxu1 }
 0x145   : > { %v3319_v63 = vadd.f32 %v2256_v11, %v1191_v45  ;;  %v3293_v7 = vpop.f32.mrb[6].mxu0  ;;  %v3221_v23 = vpop.f32.mrb[2].mxu1 }
 0x146   : > { %v2424_v54 = vadd.f32 %v3318_v14, %v4067_v36  ;;  %v3320_v59 = vadd.f32 %v3289_v21, %v3221_v23  ;;  %v2275_v18 = vpop.f32.mrb[7].mxu0  ;;  %v1194_v27 = vpop.f32.mrb[3].mxu1 }
 0x147   : > { %v2422_v15 = vadd.f32 %v3319_v63, %v4067_v36  ;;  %v3321_v29 = vadd.f32 %v2259_v52, %v1194_v27 }
 0x148   : > { %vm2456_vm5 = vcmp.ge.f32.partialorder %v2424_v54, 0.0  ;;  %v2488_v32 = vmul.f32 0.2, %v2424_v54  ;;  %v2425_v39 = vadd.f32 %v3320_v59, %v4067_v36 }
 0x149   : > { %vm2454_vm6 = vcmp.ge.f32.partialorder %v2422_v15, 0.0  ;;  %v2486_v5 = vmul.f32 0.2, %v2422_v15  ;;  %v2423_v9 = vadd.f32 %v3321_v29, %v4067_v36 }
 0x14a   : > { %v2520_v37 = vsel %vm2456_vm5, %v2424_v54, %v2488_v32  ;;  %vm2457_vm8 = vcmp.ge.f32.partialorder %v2425_v39, 0.0  ;;  %v2489_v13 = vmul.f32 0.2, %v2425_v39 }
 0x14b   : > { %v3084_v41 = vpack.c.bf16 %v2520_v37, %v2520_v37  ;;  %v2518_v47 = vsel %vm2454_vm6, %v2422_v15, %v2486_v5  ;;  %vm2455_vm9 = vcmp.ge.f32.partialorder %v2423_v9, 0.0  ;;  %v2487_v17 = vmul.f32 0.2, %v2423_v9  ;;  %v3296_v24 = vpop.f32.mrb[8].mxu0  ;;  %v3224_v22 = vpop.f32.mrb[4].mxu1 }
 0x14c   : > { %v3082_v44 = vpack.c.bf16 %v2518_v47, %v2518_v47  ;;  %v2521_v30 = vsel %vm2457_vm8, %v2425_v39, %v2489_v13  ;;  %v3322_v35 = vadd.f32 %v3292_v8, %v3224_v22  ;;  %v2288_v46 = vpop.f32.mrb[9].mxu0  ;;  %v1207_v38 = vpop.f32.mrb[5].mxu1 }
 0x14d   : > { %2681 = vst.msk [vmem:[%s4077_s14 + $0x8] sm:$0xf] %vm2678_vm7, %v3084_v41  ;;  %v3085_v51 = vpack.c.bf16 %v2521_v30, %v2521_v30  ;;  %v2519_v16 = vsel %vm2455_vm9, %v2423_v9, %v2487_v17  ;;  %v3323_v25 = vadd.f32 %v2272_v19, %v1207_v38  ;;  %v3297_v34 = vpop.f32.mrb[10].mxu0  ;;  %v3225_v62 = vpop.f32.mrb[6].mxu1 }
 0x14e   : > { %2679 = vst.msk [vmem:[%s4077_s14] sm:$0xf] %vm2678_vm7, %v3082_v44  ;;  %v3083_v3 = vpack.c.bf16 %v2519_v16, %v2519_v16  ;;  %v2428_v50 = vadd.f32 %v3322_v35, %v4067_v36  ;;  %v3324_v10 = vadd.f32 %v3293_v7, %v3225_v62  ;;  %v2291_v28 = vpop.f32.mrb[11].mxu0  ;;  %v1210_v33 = vpop.f32.mrb[7].mxu1 }
 0x14f   : > { %2682 = vst.msk [vmem:[%s4077_s14 + $0xc] sm:$0xf] %vm2678_vm7, %v3085_v51  ;;  %v2426_v20 = vadd.f32 %v3323_v25, %v4067_v36  ;;  %v3325_v58 = vadd.f32 %v2275_v18, %v1210_v33 }
 0x150   : > { %2680 = vst.msk [vmem:[%s4077_s14 + $0x4] sm:$0xf] %vm2678_vm7, %v3083_v3  ;;  %vm2460_vm10 = vcmp.ge.f32.partialorder %v2428_v50, 0.0  ;;  %v2492_v2 = vmul.f32 0.2, %v2428_v50  ;;  %v2429_v26 = vadd.f32 %v3324_v10, %v4067_v36 }
 0x151   : > { %vm2458_vm11 = vcmp.ge.f32.partialorder %v2426_v20, 0.0  ;;  %v2490_v42 = vmul.f32 0.2, %v2426_v20  ;;  %v2427_v1 = vadd.f32 %v3325_v58, %v4067_v36 }
 0x152   : > { %v2524_v40 = vsel %vm2460_vm10, %v2428_v50, %v2492_v2  ;;  %vm2461_vm12 = vcmp.ge.f32.partialorder %v2429_v26, 0.0  ;;  %v2493_v48 = vmul.f32 0.2, %v2429_v26 }
 0x153   : > { %v3088_v4 = vpack.c.bf16 %v2524_v40, %v2524_v40  ;;  %v2522_v55 = vsel %vm2458_vm11, %v2426_v20, %v2490_v42  ;;  %vm2459_vm13 = vcmp.ge.f32.partialorder %v2427_v1, 0.0  ;;  %v2491_v57 = vmul.f32 0.2, %v2427_v1  ;;  %v3228_v6 = vpop.f32.mrb[8].mxu1 }
 0x154   : > { %v3086_v0 = vpack.c.bf16 %v2522_v55, %v2522_v55  ;;  %v2525_v12 = vsel %vm2461_vm12, %v2429_v26, %v2493_v48  ;;  %v3326_v31 = vadd.f32 %v3296_v24, %v3228_v6  ;;  %v1223_v43 = vpop.f32.mrb[9].mxu1 }
 0x155   : > { %2685 = vst.msk [vmem:[%s4077_s14 + $0x18] sm:$0xf] %vm2678_vm7, %v3088_v4  ;;  %v3089_v49 = vpack.c.bf16 %v2525_v12, %v2525_v12  ;;  %v2523_v56 = vsel %vm2459_vm13, %v2427_v1, %v2491_v57  ;;  %v3300_v53 = vpop.f32.mrb[12].mxu0  ;;  %v3327_v60 = vadd.f32 %v2288_v46, %v1223_v43  ;;  %v3229_v11 = vpop.f32.mrb[10].mxu1 }
 0x156   : > { %2683 = vst.msk [vmem:[%s4077_s14 + $0x10] sm:$0xf] %vm2678_vm7, %v3086_v0  ;;  %v3087_v21 = vpack.c.bf16 %v2523_v56, %v2523_v56  ;;  %v2432_v52 = vadd.f32 %v3326_v31, %v4067_v36  ;;  %v2304_v8 = vpop.f32.mrb[13].mxu0  ;;  %v3328_v61 = vadd.f32 %v3297_v34, %v3229_v11  ;;  %v1226_v14 = vpop.f32.mrb[11].mxu1 }
 0x157   : > { %2686 = vst.msk [vmem:[%s4077_s14 + $0x1c] sm:$0xf] %vm2678_vm7, %v3089_v49  ;;  %v2430_v19 = vadd.f32 %v3327_v60, %v4067_v36  ;;  %v3301_v45 = vpop.f32.mrb[14].mxu0  ;;  %v3329_v63 = vadd.f32 %v2291_v28, %v1226_v14 }
 0x158   : > { %2684 = vst.msk [vmem:[%s4077_s14 + $0x14] sm:$0xf] %vm2678_vm7, %v3087_v21  ;;  %vm2464_vm14 = vcmp.ge.f32.partialorder %v2432_v52, 0.0  ;;  %v2496_v7 = vmul.f32 0.2, %v2432_v52  ;;  %v2433_v23 = vadd.f32 %v3328_v61, %v4067_v36  ;;  %v2307_v54 = vpop.f32.mrb[15].mxu0 }
 0x159   : > { %vm2462_vm15 = vcmp.ge.f32.partialorder %v2430_v19, 0.0  ;;  %v2494_v59 = vmul.f32 0.2, %v2430_v19  ;;  %v2431_v18 = vadd.f32 %v3329_v63, %v4067_v36 }
 0x15a   : > { %v2528_v27 = vsel %vm2464_vm14, %v2432_v52, %v2496_v7  ;;  %vm2465_vm0 = vcmp.ge.f32.partialorder %v2433_v23, 0.0  ;;  %v2497_v15 = vmul.f32 0.2, %v2433_v23 }
 0x15b   : > { %v3092_v29 = vpack.c.bf16 %v2528_v27, %v2528_v27  ;;  %v2526_v32 = vsel %vm2462_vm15, %v2430_v19, %v2494_v59  ;;  %vm2463_vm1 = vcmp.ge.f32.partialorder %v2431_v18, 0.0  ;;  %v2495_v39 = vmul.f32 0.2, %v2431_v18  ;;  %v3232_v5 = vpop.f32.mrb[12].mxu1 }
 0x15c   : > { %v3090_v9 = vpack.c.bf16 %v2526_v32, %v2526_v32  ;;  %v2529_v37 = vsel %vm2465_vm0, %v2433_v23, %v2497_v15  ;;  %v3330_v13 = vadd.f32 %v3300_v53, %v3232_v5  ;;  %v1239_v41 = vpop.f32.mrb[13].mxu1 }
 0x15d   : > { %2689 = vst.msk [vmem:[%s4077_s14 + $0x28] sm:$0xf] %vm2678_vm7, %v3092_v29  ;;  %v3093_v47 = vpack.c.bf16 %v2529_v37, %v2529_v37  ;;  %v2527_v17 = vsel %vm2463_vm1, %v2431_v18, %v2495_v39  ;;  %v3304_v24 = vpop.f32.mrb[16].mxu0  ;;  %v3331_v22 = vadd.f32 %v2304_v8, %v1239_v41  ;;  %v3233_v44 = vpop.f32.mrb[14].mxu1 }
 0x15e   : > { %2687 = vst.msk [vmem:[%s4077_s14 + $0x20] sm:$0xf] %vm2678_vm7, %v3090_v9  ;;  %v3091_v30 = vpack.c.bf16 %v2527_v17, %v2527_v17  ;;  %v2436_v35 = vadd.f32 %v3330_v13, %v4067_v36  ;;  %v2320_v46 = vpop.f32.mrb[17].mxu0  ;;  %v3332_v38 = vadd.f32 %v3301_v45, %v3233_v44  ;;  %v1242_v51 = vpop.f32.mrb[15].mxu1 }
 0x15f   : > { %2690 = vst.msk [vmem:[%s4077_s14 + $0x2c] sm:$0xf] %vm2678_vm7, %v3093_v47  ;;  %v2434_v16 = vadd.f32 %v3331_v22, %v4067_v36  ;;  %v3305_v25 = vpop.f32.mrb[18].mxu0  ;;  %v3333_v34 = vadd.f32 %v2307_v54, %v1242_v51 }
 0x160   : > { %2688 = vst.msk [vmem:[%s4077_s14 + $0x24] sm:$0xf] %vm2678_vm7, %v3091_v30  ;;  %vm2468_vm2 = vcmp.ge.f32.partialorder %v2436_v35, 0.0  ;;  %v2500_v62 = vmul.f32 0.2, %v2436_v35  ;;  %v2437_v3 = vadd.f32 %v3332_v38, %v4067_v36  ;;  %v2323_v50 = vpop.f32.mrb[19].mxu0 }
 0x161   : > { %vm2466_vm3 = vcmp.ge.f32.partialorder %v2434_v16, 0.0  ;;  %v2498_v10 = vmul.f32 0.2, %v2434_v16  ;;  %v2435_v28 = vadd.f32 %v3333_v34, %v4067_v36 }
 0x162   : > { %v2532_v33 = vsel %vm2468_vm2, %v2436_v35, %v2500_v62  ;;  %vm2469_vm4 = vcmp.ge.f32.partialorder %v2437_v3, 0.0  ;;  %v2501_v20 = vmul.f32 0.2, %v2437_v3 }
 0x163   : > { %v3096_v58 = vpack.c.bf16 %v2532_v33, %v2532_v33  ;;  %v2530_v2 = vsel %vm2466_vm3, %v2434_v16, %v2498_v10  ;;  %vm2467_vm5 = vcmp.ge.f32.partialorder %v2435_v28, 0.0  ;;  %v2499_v26 = vmul.f32 0.2, %v2435_v28  ;;  %v3236_v42 = vpop.f32.mrb[16].mxu1 }
 0x164   : > { %v3094_v1 = vpack.c.bf16 %v2530_v2, %v2530_v2  ;;  %v2533_v40 = vsel %vm2469_vm4, %v2437_v3, %v2501_v20  ;;  %v3334_v48 = vadd.f32 %v3304_v24, %v3236_v42  ;;  %v1255_v4 = vpop.f32.mrb[17].mxu1 }
 0x165   : > { %2693 = vst.msk [vmem:[%s4077_s14 + $0x38] sm:$0xf] %vm2678_vm7, %v3096_v58  ;;  %v3097_v55 = vpack.c.bf16 %v2533_v40, %v2533_v40  ;;  %v2531_v57 = vsel %vm2467_vm5, %v2435_v28, %v2499_v26  ;;  %v3335_v6 = vadd.f32 %v2320_v46, %v1255_v4  ;;  %v3237_v0 = vpop.f32.mrb[18].mxu1 }
 0x166   : > { %2691 = vst.msk [vmem:[%s4077_s14 + $0x30] sm:$0xf] %vm2678_vm7, %v3094_v1  ;;  %v3095_v12 = vpack.c.bf16 %v2531_v57, %v2531_v57  ;;  %v2440_v31 = vadd.f32 %v3334_v48, %v4067_v36  ;;  %v3336_v43 = vadd.f32 %v3305_v25, %v3237_v0  ;;  %v1258_v49 = vpop.f32.mrb[19].mxu1 }
 0x167   : > { %2694 = vst.msk [vmem:[%s4077_s14 + $0x3c] sm:$0xf] %vm2678_vm7, %v3097_v55  ;;  %v3308_v56 = vpop.f32.mrb[20].mxu0  ;;  %v2438_v53 = vadd.f32 %v3335_v6, %v4067_v36  ;;  %v3337_v60 = vadd.f32 %v2323_v50, %v1258_v49 }
 0x168   : > { %2692 = vst.msk [vmem:[%s4077_s14 + $0x34] sm:$0xf] %vm2678_vm7, %v3095_v12  ;;  %vm2472_vm6 = vcmp.ge.f32.partialorder %v2440_v31, 0.0  ;;  %v2504_v11 = vmul.f32 0.2, %v2440_v31  ;;  %v2336_v21 = vpop.f32.mrb[21].mxu0  ;;  %v2441_v52 = vadd.f32 %v3336_v43, %v4067_v36 }
 0x169   : > { %vm2470_vm8 = vcmp.ge.f32.partialorder %v2438_v53, 0.0  ;;  %v2502_v8 = vmul.f32 0.2, %v2438_v53  ;;  %v3309_v61 = vpop.f32.mrb[22].mxu0  ;;  %v2439_v14 = vadd.f32 %v3337_v60, %v4067_v36 }
 0x16a   : > { %v2536_v19 = vsel %vm2472_vm6, %v2440_v31, %v2504_v11  ;;  %vm2473_vm9 = vcmp.ge.f32.partialorder %v2441_v52, 0.0  ;;  %v2505_v45 = vmul.f32 0.2, %v2441_v52  ;;  %v2339_v63 = vpop.f32.mrb[23].mxu0 }
 0x16b   : > { %v3100_v7 = vpack.c.bf16 %v2536_v19, %v2536_v19  ;;  %v2534_v23 = vsel %vm2470_vm8, %v2438_v53, %v2502_v8  ;;  %vm2471_vm10 = vcmp.ge.f32.partialorder %v2439_v14, 0.0  ;;  %v2503_v54 = vmul.f32 0.2, %v2439_v14  ;;  %v3240_v59 = vpop.f32.mrb[20].mxu1 }
 0x16c   : > { %v3098_v18 = vpack.c.bf16 %v2534_v23, %v2534_v23  ;;  %v2537_v27 = vsel %vm2473_vm9, %v2441_v52, %v2505_v45  ;;  %v3338_v15 = vadd.f32 %v3308_v56, %v3240_v59  ;;  %v1271_v29 = vpop.f32.mrb[21].mxu1 }
 0x16d   : > { %2697 = vst.msk [vmem:[%s4077_s14 + $0x48] sm:$0xf] %vm2678_vm7, %v3100_v7  ;;  %v3101_v32 = vpack.c.bf16 %v2537_v27, %v2537_v27  ;;  %v2535_v39 = vsel %vm2471_vm10, %v2439_v14, %v2503_v54  ;;  %v3339_v5 = vadd.f32 %v2336_v21, %v1271_v29  ;;  %v3241_v9 = vpop.f32.mrb[22].mxu1 }
 0x16e   : > { %2695 = vst.msk [vmem:[%s4077_s14 + $0x40] sm:$0xf] %vm2678_vm7, %v3098_v18  ;;  %v3099_v37 = vpack.c.bf16 %v2535_v39, %v2535_v39  ;;  %v2444_v13 = vadd.f32 %v3338_v15, %v4067_v36  ;;  %v3340_v41 = vadd.f32 %v3309_v61, %v3241_v9  ;;  %v1274_v47 = vpop.f32.mrb[23].mxu1 }
 0x16f   : > { %2698 = vst.msk [vmem:[%s4077_s14 + $0x4c] sm:$0xf] %vm2678_vm7, %v3101_v32  ;;  %v3312_v17 = vpop.f32.mrb[24].mxu0  ;;  %v2442_v24 = vadd.f32 %v3339_v5, %v4067_v36  ;;  %v3341_v22 = vadd.f32 %v2339_v63, %v1274_v47 }
 0x170   : > { %2696 = vst.msk [vmem:[%s4077_s14 + $0x44] sm:$0xf] %vm2678_vm7, %v3099_v37  ;;  %vm2476_vm11 = vcmp.ge.f32.partialorder %v2444_v13, 0.0  ;;  %v2508_v44 = vmul.f32 0.2, %v2444_v13  ;;  %v2352_v30 = vpop.f32.mrb[25].mxu0  ;;  %v2445_v35 = vadd.f32 %v3340_v41, %v4067_v36 }
 0x171   : > { %vm2474_vm12 = vcmp.ge.f32.partialorder %v2442_v24, 0.0  ;;  %v2506_v46 = vmul.f32 0.2, %v2442_v24  ;;  %v3313_v38 = vpop.f32.mrb[26].mxu0  ;;  %v2443_v51 = vadd.f32 %v3341_v22, %v4067_v36 }
 0x172   : > { %v2540_v16 = vsel %vm2476_vm11, %v2444_v13, %v2508_v44  ;;  %vm2477_vm13 = vcmp.ge.f32.partialorder %v2445_v35, 0.0  ;;  %v2509_v25 = vmul.f32 0.2, %v2445_v35  ;;  %v2355_v34 = vpop.f32.mrb[27].mxu0 }
 0x173   : > { %v3104_v62 = vpack.c.bf16 %v2540_v16, %v2540_v16  ;;  %v2538_v3 = vsel %vm2474_vm12, %v2442_v24, %v2506_v46  ;;  %vm2475_vm14 = vcmp.ge.f32.partialorder %v2443_v51, 0.0  ;;  %v2507_v50 = vmul.f32 0.2, %v2443_v51  ;;  %v3244_v10 = vpop.f32.mrb[24].mxu1 }
 0x174   : > { %v3102_v28 = vpack.c.bf16 %v2538_v3, %v2538_v3  ;;  %v2541_v33 = vsel %vm2477_vm13, %v2445_v35, %v2509_v25  ;;  %v3342_v20 = vadd.f32 %v3312_v17, %v3244_v10  ;;  %v1287_v58 = vpop.f32.mrb[25].mxu1 }
 0x175   : > { %2701 = vst.msk [vmem:[%s4077_s14 + $0x58] sm:$0xf] %vm2678_vm7, %v3104_v62  ;;  %v3105_v2 = vpack.c.bf16 %v2541_v33, %v2541_v33  ;;  %v2539_v26 = vsel %vm2475_vm14, %v2443_v51, %v2507_v50  ;;  %v3343_v42 = vadd.f32 %v2352_v30, %v1287_v58  ;;  %v3245_v1 = vpop.f32.mrb[26].mxu1 }
 0x176   : > { %2699 = vst.msk [vmem:[%s4077_s14 + $0x50] sm:$0xf] %vm2678_vm7, %v3102_v28  ;;  %v3103_v40 = vpack.c.bf16 %v2539_v26, %v2539_v26  ;;  %v2448_v48 = vadd.f32 %v3342_v20, %v4067_v36  ;;  %v3344_v4 = vadd.f32 %v3313_v38, %v3245_v1  ;;  %v1290_v55 = vpop.f32.mrb[27].mxu1 }
 0x177   : > { %2702 = vst.msk [vmem:[%s4077_s14 + $0x5c] sm:$0xf] %vm2678_vm7, %v3105_v2  ;;  %v2446_v57 = vadd.f32 %v3343_v42, %v4067_v36  ;;  %v3345_v6 = vadd.f32 %v2355_v34, %v1290_v55 }
 0x178   : > { %2700 = vst.msk [vmem:[%s4077_s14 + $0x54] sm:$0xf] %vm2678_vm7, %v3103_v40  ;;  %vm2480_vm15 = vcmp.ge.f32.partialorder %v2448_v48, 0.0  ;;  %v2512_v0 = vmul.f32 0.2, %v2448_v48  ;;  %v2449_v12 = vadd.f32 %v3344_v4, %v4067_v36 }
 0x179   : > { %v3316_v31 = vpop.f32.mrb[28].mxu0  ;;  %vm2478_vm0 = vcmp.ge.f32.partialorder %v2446_v57, 0.0  ;;  %v2510_v43 = vmul.f32 0.2, %v2446_v57  ;;  %v2447_v49 = vadd.f32 %v3345_v6, %v4067_v36 }
 0x17a   : > { %v2544_v56 = vsel %vm2480_vm15, %v2448_v48, %v2512_v0  ;;  %v2368_v53 = vpop.f32.mrb[29].mxu0  ;;  %vm2481_vm1 = vcmp.ge.f32.partialorder %v2449_v12, 0.0  ;;  %v2513_v60 = vmul.f32 0.2, %v2449_v12 }
 0x17b   : > { %v3108_v11 = vpack.c.bf16 %v2544_v56, %v2544_v56  ;;  %v2542_v21 = vsel %vm2478_vm0, %v2446_v57, %v2510_v43  ;;  %v3317_v52 = vpop.f32.mrb[30].mxu0  ;;  %vm2479_vm2 = vcmp.ge.f32.partialorder %v2447_v49, 0.0  ;;  %v2511_v8 = vmul.f32 0.2, %v2447_v49  ;;  %v3248_v61 = vpop.f32.mrb[28].mxu1 }
 0x17c   : > { %v3106_v14 = vpack.c.bf16 %v2542_v21, %v2542_v21  ;;  %v2545_v19 = vsel %vm2481_vm1, %v2449_v12, %v2513_v60  ;;  %v2371_v45 = vpop.f32.mrb[31].mxu0  ;;  %v3346_v63 = vadd.f32 %v3316_v31, %v3248_v61  ;;  %v1303_v7 = vpop.f32.mrb[29].mxu1 }
 0x17d   : > { %2705 = vst.msk [vmem:[%s4077_s14 + $0x68] sm:$0xf] %vm2678_vm7, %v3108_v11  ;;  %v3109_v23 = vpack.c.bf16 %v2545_v19, %v2545_v19  ;;  %v2543_v54 = vsel %vm2479_vm2, %v2447_v49, %v2511_v8  ;;  %v3347_v59 = vadd.f32 %v2368_v53, %v1303_v7  ;;  %v3249_v18 = vpop.f32.mrb[30].mxu1 }
 0x17e   : > { %2703 = vst.msk [vmem:[%s4077_s14 + $0x60] sm:$0xf] %vm2678_vm7, %v3106_v14  ;;  %v3107_v27 = vpack.c.bf16 %v2543_v54, %v2543_v54  ;;  %v2452_v15 = vadd.f32 %v3346_v63, %v4067_v36  ;;  %v3348_v29 = vadd.f32 %v3317_v52, %v3249_v18  ;;  %v1306_v32 = vpop.f32.mrb[31].mxu1 }
 0x17f   : > { %2706 = vst.msk [vmem:[%s4077_s14 + $0x6c] sm:$0xf] %vm2678_vm7, %v3109_v23  ;;  %v2450_v39 = vadd.f32 %v3347_v59, %v4067_v36  ;;  %v3349_v5 = vadd.f32 %v2371_v45, %v1306_v32 }
 0x180   : > { %2704 = vst.msk [vmem:[%s4077_s14 + $0x64] sm:$0xf] %vm2678_vm7, %v3107_v27  ;;  %vm2484_vm3 = vcmp.ge.f32.partialorder %v2452_v15, 0.0  ;;  %v2516_v9 = vmul.f32 0.2, %v2452_v15  ;;  %v2453_v37 = vadd.f32 %v3348_v29, %v4067_v36 }
 0x181   : > { %vm2482_vm4 = vcmp.ge.f32.partialorder %v2450_v39, 0.0  ;;  %v2514_v13 = vmul.f32 0.2, %v2450_v39  ;;  %v2451_v41 = vadd.f32 %v3349_v5, %v4067_v36 }
 0x182   : > { %v2548_v47 = vsel %vm2484_vm3, %v2452_v15, %v2516_v9  ;;  %vm2485_vm5 = vcmp.ge.f32.partialorder %v2453_v37, 0.0  ;;  %v2517_v17 = vmul.f32 0.2, %v2453_v37 }
 0x183   : > { %v3112_v24 = vpack.c.bf16 %v2548_v47, %v2548_v47  ;;  %v2546_v22 = vsel %vm2482_vm4, %v2450_v39, %v2514_v13  ;;  %vm2483_vm6 = vcmp.ge.f32.partialorder %v2451_v41, 0.0  ;;  %v2515_v44 = vmul.f32 0.2, %v2451_v41 }
 0x184   : > { %v3110_v30 = vpack.c.bf16 %v2546_v22, %v2546_v22  ;;  %v2549_v35 = vsel %vm2485_vm5, %v2453_v37, %v2517_v17 }
 0x185   : > { %2709 = vst.msk [vmem:[%s4077_s14 + $0x78] sm:$0xf] %vm2678_vm7, %v3112_v24  ;;  %v3113_v46 = vpack.c.bf16 %v2549_v35, %v2549_v35  ;;  %v2547_v38 = vsel %vm2483_vm6, %v2451_v41, %v2515_v44 }
 0x186   : > { %2707 = vst.msk [vmem:[%s4077_s14 + $0x70] sm:$0xf] %vm2678_vm7, %v3110_v30  ;;  %v3111_v51 = vpack.c.bf16 %v2547_v38, %v2547_v38 }
 0x187   : > { %2710 = vst.msk [vmem:[%s4077_s14 + $0x7c] sm:$0xf] %vm2678_vm7, %v3113_v46 }
 0x188   : > { %2708 = vst.msk [vmem:[%s4077_s14 + $0x74] sm:$0xf] %vm2678_vm7, %v3111_v51 }
 0x189 PF: > { %s14_s17 = sadd.s32 1, %s3503_s17   ;;  %s4187_s15 = smov %s3499_s16 }
 0x18a   : > { %p11_p5 = scmp.ge.s32.totalorder %s14_s17, 4   ;;  %s4188_s16 = smov %s4190_s18 }
 0x18c   :  { %13 = sbr.rel (!%p11_p5) target bundleno = 2 (0x2), region = 73 }

// kernel: _forward_impl.5
= control target key start
LH: loop header
LB: loop body
LE: loop exit
PB: predicated region body
PF: predicated region fallthrough
CT: control target
= control target key end

     0   :  { %s2016_s21 = smov 0   ;;  %s2018_s22 = smov 0   ;;  %s2345_s0 = inlined_call_operand.vmem [shape: bf16[2,9,9,128], index: 0, kind: input, shape index: {}, may-alias: {0,1}]   ;;  %s2346_s1 = inlined_call_operand.vmem [shape: bf16[2,9,9,128], index: 1, kind: input, shape index: {}, may-alias: {0,1}]   ;;  %s2347_s2 = inlined_call_operand.vmem [shape: bf16[4,128,64], index: 2, kind: input, shape index: {}]   ;;  %s2348_s3 = inlined_call_operand.vmem [shape: f32[1,64], index: 3, kind: input, shape index: {}]   ;;  %s2349_s4 = inlined_call_operand.vmem [shape: bf16[2,64,64], index: 4, kind: output, shape index: {0}]   ;;  %s2350_s5 = inlined_call_operand.vmem [shape: f32[2,1,1,64], index: 5, kind: output, shape index: {1}]   ;;  %s2351_s6 = inlined_call_operand.vmem [shape: f32[2,1,1,64], index: 6, kind: output, shape index: {2}]  }
   0x1   :  { %s2020_s23 = smov 0  }
   0x2 LB: > { %s29_s24 = sadd.s32 1, %s1975_s22  ;;  %p1579_p0 = scmp.ge.s32.totalorder %s1979_s23, 1  ;;  %s1979_s23 = sphi %s2020_s23, %s17_s23   ;;  %s1975_s22 = sphi %s2018_s22, %s2355_s22   ;;  %s1971_s21 = sphi %s2016_s21, %s2354_s21  }
   0x3   : > { %p31_p1 = scmp.ge.s32.totalorder %s29_s24, 2  ;;  %p277_p2 = scmp.lt.s32.totalorder %s1979_s23, 3 }
   0x5   : > { %s2357_s24 = smov (%p31_p1, %s29_s24), 0  ;;  %p278_p3 = pnand %p1579_p0, %p277_p2 }
   0x6   : > { %v1918_v0 = vld [vmem:[%s2347_s2 + $0x40] sm:$0xff] (!%p278_p3)   ;;  %p350_p4 = scmp.lt.s32.totalorder (!%p278_p3), %s1971_s21, 1  ;;  %v1920_v2 = vld [vmem:[%s2347_s2 + $0x48] sm:$0xff] (!%p278_p3)   ;;  %v1922_v4 = vld [vmem:[%s2347_s2 + $0x50] sm:$0xff] (!%p278_p3)   ;;  %vm433_vm0 = vsmask.f32 (!%p278_p3), 3328 }
   0x7   : > { %281 = sbr.rel (%p278_p3) target bundleno = 321 (0x141), region = 36  ;;  %v1919_v1 = vld [vmem:[%s2347_s2 + $0x80] sm:$0xff] (!%p278_p3)   ;;  %1771 = vmatprep.subr.bf16.mxu1 (!%p278_p3), %v1918_v0  ;;  %v1921_v3 = vld [vmem:[%s2347_s2 + $0x88] sm:$0xff] (!%p278_p3)   ;;  %v1923_v5 = vld [vmem:[%s2347_s2 + $0x90] sm:$0xff] (!%p278_p3)   ;;  %vm434_vm1 = vsmask.f32 (!%p278_p3), 7440 }
   0x8   : > { %1819 = vmatprep.subr.bf16.mxu0 (!%p278_p3), %v1919_v1  ;;  %1772 = vmatpush3.bf16.msra.mxu1 (!%p278_p3), %v1918_v0  ;;  %v1924_v6 = vld [vmem:[%s2347_s2 + $0x58] sm:$0xff] (!%p278_p3)   ;;  %v1926_v8 = vld [vmem:[%s2347_s2 + $0x60] sm:$0xff] (!%p278_p3)   ;;  %v1928_v10 = vld [vmem:[%s2347_s2 + $0x68] sm:$0xff] (!%p278_p3)   ;;  %vm1385_vm3 = vcmask (!%p278_p3), 519168   ;;  %vm1299_vm4 = vcmask (!%p278_p3), 523264   ;;  %vm1321_vm5 = vcmask (!%p278_p3), 516096  }
   0x9   : > { %1820 = vmatpush3.bf16.msra.mxu0 (!%p278_p3), %v1919_v1  ;;  %1773 = vmatprep.subr.bf16.mxu1 (!%p278_p3), %v1920_v2  ;;  %v1925_v7 = vld [vmem:[%s2347_s2 + $0x98] sm:$0xff] (!%p278_p3)   ;;  %v1927_v9 = vld [vmem:[%s2347_s2 + $0xa0] sm:$0xff] (!%p278_p3)   ;;  %v1929_v11 = vld [vmem:[%s2347_s2 + $0xa8] sm:$0xff] (!%p278_p3)  }
   0xa   : > { %1821 = vmatprep.subr.bf16.mxu0 (!%p278_p3), %v1921_v3  ;;  %v1930_v20 = vld [vmem:[%s2347_s2 + $0x70] sm:$0xff] (!%p278_p3)   ;;  %vm2100_vm2 = vmor (!%p278_p3), %vm433_vm0, %vm434_vm1  ;;  %v1932_v32 = vld [vmem:[%s2347_s2 + $0x78] sm:$0xff] (!%p278_p3)  }
   0xb   : > { %v1931_v21 = vld [vmem:[%s2347_s2 + $0xb0] sm:$0xff] (!%p278_p3)   ;;  %v1933_v35 = vld [vmem:[%s2347_s2 + $0xb8] sm:$0xff] (!%p278_p3)   ;;  %v1934_v52 = vld [vmem:[%s2347_s2] sm:$0xff] (!%p278_p3)  }
   0xc   : > { %1774 = vmatpush3.bf16.msra.mxu1 (!%p278_p3), %v1920_v2  ;;  %v1936_v58 = vld [vmem:[%s2347_s2 + $0xc0] sm:$0xff] (!%p278_p3)   ;;  %v1939_v2 = vld [vmem:[%s2347_s2 + $0xc8] sm:$0xff] (!%p278_p3)  }
   0xd   : > { %1822 = vmatpush3.bf16.msra.mxu0 (!%p278_p3), %v1921_v3  ;;  %1775 = vmatprep.subr.bf16.mxu1 (!%p278_p3), %v1922_v4 }
   0xe   : > { %s2359_s21 = smov (!%p350_p4, %s1971_s21), 1  ;;  %1823 = vmatprep.subr.bf16.mxu0 %v1923_v5 }
   0xf   : > { %s1891_s17 = smul.u32 72, %s2359_s21  ;;  %s1714_s16 = sshll.u32 %s2359_s21, 5 }
  0x10   : > { %1776 = vmatpush3.bf16.msra.mxu1 %v1922_v4  ;;  %v1938_v4 = vld [vmem:[%s2347_s2 + $0x8] sm:$0xff]   ;;  %s2287_s20 = scalar_lea.vmem %s2349_s4, %s1714_s16  ;;  %s393_s27 = scalar_lea.vmem %s2350_s5, %s2359_s21 }
  0x11   : > { %1824 = vmatpush3.bf16.msra.mxu0 %v1923_v5  ;;  %1777 = vmatprep.subr.bf16.mxu1 %v1924_v6  ;;  %s2072_s28 = scalar_lea.vmem %s2345_s0, %s1891_s17  ;;  %v1940_v5 = vld [vmem:[%s2347_s2 + $0x10] sm:$0xff]   ;;  %s2152_s11 = sadd.s32 64, %s1891_s17 }
  0x12   : > { %1825 = vmatprep.subr.bf16.mxu0 %v1925_v7  ;;  %v2081_v12 = vld [vmem:[%s2072_s28] sm:$0xf]  ;;  %v2084_v13 = vld [vmem:[%s2072_s28 + $0x8] sm:$0xf]  ;;  %v425_v14 = vld [vmem:[%s2072_s28 + $0x4] sm:$0x1]  ;;  %s375_s18 = scalar_lea.vmem %s2346_s1, %s2152_s11  ;;  %s399_s7 = scalar_lea.vmem %s2351_s6, %s2359_s21 }
  0x13   : > { %v426_v15 = vld [vmem:[%s2072_s28 + $0xc] sm:$0x1]  ;;  %v437_v16 = vshrl.u32 %v2081_v12, 16  ;;  %v440_v17 = vshll.u32 %v2081_v12, 16  ;;  %v446_v18 = vshll.u32 %v425_v14, 16  ;;  %v451_v19 = vshrl.u32 %v2084_v13, 16 }
  0x14   : > { %1778 = vmatpush3.bf16.msra.mxu1 %v1924_v6  ;;  %v454_v22 = vshll.u32 %v2084_v13, 16  ;;  %v460_v23 = vshll.u32 %v426_v15, 16  ;;  %v1935_v31 = vld [vmem:[%s2072_s28 + $0x8] ss:$8 sps:$4 sm:$0xff]   ;;  %v2115_v37 = vld [vmem:[%s2072_s28 + $0x18] sm:$0xf] }
  0x15   : > { %1826 = vmatpush3.bf16.msra.mxu0 %v1925_v7  ;;  %1779 = vmatprep.subr.bf16.mxu1 %v1926_v8  ;;  %v439_v24 = vrot.slane %v437_v16, 4  ;;  %v442_v25 = vrot.slane %v440_v17, 5  ;;  %v448_v26 = vrot.slane %v446_v18, 5  ;;  %v453_v27 = vrot.slane %v451_v19, 4  ;;  %v2109_v34 = vld [vmem:[%s2072_s28 + $0x10] sm:$0xf] }
  0x16   : > { %1827 = vmatprep.subr.bf16.mxu0 %v1927_v9  ;;  %v456_v29 = vrot.slane %v454_v22, 5  ;;  %v462_v30 = vrot.slane %v460_v23, 5  ;;  %1835 = vmatprep.mubr.bf16.mxu0 %v1935_v31  ;;  %v427_v38 = vld [vmem:[%s2072_s28 + $0x14] sm:$0x1]  ;;  %v428_v39 = vld [vmem:[%s2072_s28 + $0x1c] sm:$0x1] }
  0x17   : > { %v443_v33 = vor.u32 %v442_v25, %v439_v24  ;;  %v465_v41 = vshrl.u32 %v2109_v34, 16  ;;  %v468_v42 = vshll.u32 %v2109_v34, 16  ;;  %v474_v43 = vshll.u32 %v427_v38, 16  ;;  %v1937_v61 = vld [vmem:[%s2072_s28 + $0x18] ss:$8 sps:$4 sm:$0xff]   ;;  %v1941_v6 = vld [vmem:[%s2347_s2 + $0xd0] sm:$0xff]  }
  0x18   : > { %1780 = vmatpush3.bf16.msra.mxu1 %v1926_v8  ;;  %v457_v36 = vor.u32 %v456_v29, %v453_v27  ;;  %v479_v45 = vshrl.u32 %v2115_v37, 16  ;;  %v482_v46 = vshll.u32 %v2115_v37, 16  ;;  %v488_v47 = vshll.u32 %v428_v39, 16  ;;  %v2155_v7 = vld [vmem:[%s2072_s28 + $0x20] sm:$0xf]  ;;  %v1943_v17 = vld [vmem:[%s2347_s2 + $0xd8] sm:$0xff]  }
  0x19   : > { %1828 = vmatpush3.bf16.msra.mxu0 %v1927_v9  ;;  %1781 = vmatprep.subr.bf16.mxu1 %v1928_v10  ;;  %v444_v40 = vrot.slane %v443_v33, 4  ;;  %v467_v49 = vrot.slane %v465_v41, 4  ;;  %v470_v50 = vrot.slane %v468_v42, 5  ;;  %v476_v53 = vrot.slane %v474_v43, 5  ;;  %v2158_v8 = vld [vmem:[%s2072_s28 + $0x28] sm:$0xf] }
  0x1a   : > { %1829 = vmatprep.subr.bf16.mxu0 %v1929_v11  ;;  %v458_v44 = vrot.slane %v457_v36, 4  ;;  %v481_v54 = vrot.slane %v479_v45, 4  ;;  %v484_v55 = vrot.slane %v482_v46, 5  ;;  %v490_v60 = vrot.slane %v488_v47, 5  ;;  %v429_v9 = vld [vmem:[%s2072_s28 + $0x24] sm:$0x1] }
  0x1b   : > { %v449_v48 = vsel %vm2100_vm2, %v444_v40, %v448_v26  ;;  %v471_v57 = vor.u32 %v470_v50, %v467_v49  ;;  %v496_v14 = vshll.u32 %v2155_v7, 16  ;;  %v502_v15 = vshll.u32 %v429_v9, 16  ;;  %v1948_v25 = vld [vmem:[%s2072_s28 + $0x28] ss:$8 sps:$4 sm:$0xff]   ;;  %v432_v33 = vld [vmem:[%s2072_s28 + $0x3c] sm:$0x1] }
  0x1c   : > { %1782 = vmatpush3.bf16.msra.mxu1 %v1928_v10  ;;  %v463_v51 = vsel %vm2100_vm2, %v458_v44, %v462_v30  ;;  %v485_v59 = vor.u32 %v484_v55, %v481_v54  ;;  %v430_v10 = vld [vmem:[%s2072_s28 + $0x2c] sm:$0x1]  ;;  %v507_v16 = vshrl.u32 %v2158_v8, 16  ;;  %v510_v18 = vshll.u32 %v2158_v8, 16  ;;  %v2174_v29 = vld [vmem:[%s2072_s28 + $0x30] sm:$0xf] }
  0x1d   : > { %1830 = vmatpush3.bf16.msra.mxu0 %v1929_v11  ;;  %1783 = vmatprep.subr.bf16.mxu1 %v1930_v20  ;;  %v1600_v56 = vcombine.low %v449_v48, %v463_v51  ;;  %v472_v62 = vrot.slane %v471_v57, 4  ;;  %v493_v11 = vshrl.u32 %v2155_v7, 16  ;;  %v516_v19 = vshll.u32 %v430_v10, 16  ;;  %v2177_v30 = vld [vmem:[%s2072_s28 + $0x38] sm:$0xf]  ;;  %v1944_v42 = vld [vmem:[%s2347_s2 + $0x20] sm:$0xff]  }
  0x1e   : > { %1831 = vmatprep.subr.bf16.mxu0 %v1931_v21  ;;  %v486_v63 = vrot.slane %v485_v59, 4  ;;  %v498_v22 = vrot.slane %v496_v14, 5  ;;  %v504_v23 = vrot.slane %v502_v15, 5  ;;  %v509_v24 = vrot.slane %v507_v16, 4  ;;  %v1945_v47 = vld [vmem:[%s2347_s2 + $0xe0] sm:$0xff]  }
  0x1f   : > { %1787 = vmatprep.mubr.bf16.mxu1 %v1600_v56  ;;  %v477_v0 = vsel %vm2100_vm2, %v472_v62, %v476_v53  ;;  %v512_v26 = vrot.slane %v510_v18, 5  ;;  %v518_v27 = vrot.slane %v516_v19, 5  ;;  %v524_v36 = vshll.u32 %v2174_v29, 16  ;;  %v1630_v51 = vld [vmem:[%s2072_s28 + $0x38] sm:$0xf] }
  0x20   : > { %1784 = vmatpush3.bf16.msra.mxu1 %v1930_v20  ;;  %v491_v1 = vsel %vm2100_vm2, %v486_v63, %v490_v60  ;;  %v1942_v20 = vld [vmem:[%s2347_s2 + $0x18] sm:$0xff]   ;;  %v535_v40 = vshrl.u32 %v2177_v30, 16  ;;  %v538_v41 = vshll.u32 %v2177_v30, 16  ;;  %v544_v46 = vshll.u32 %v432_v33, 16  ;;  %v839_v56 = vld [vmem:[%s375_s18] sm:$0xf] }
  0x21   : > { %1832 = vmatpush3.bf16.msra.mxu0 %v1931_v21  ;;  %1785 = vmatprep.subr.bf16.mxu1 %v1932_v32  ;;  %v1601_v3 = vcombine.low %v477_v0, %v491_v1  ;;  %v495_v21 = vrot.slane %v493_v11, 4  ;;  %v513_v38 = vor.u32 %v512_v26, %v509_v24  ;;  %v526_v45 = vrot.slane %v524_v36, 5  ;;  %v1016_v57 = vld [vmem:[%s375_s18] sm:$0xf]  ;;  %v1946_v63 = vld [vmem:[%s2347_s2 + $0x28] sm:$0xff]  }
  0x22   : > { %1833 = vmatprep.subr.bf16.mxu0 %v1933_v35  ;;  %v537_v49 = vrot.slane %v535_v40, 4  ;;  %v540_v50 = vrot.slane %v538_v41, 5  ;;  %v546_v55 = vrot.slane %v544_v46, 5  ;;  %v1650_v60 = vcombine.low %v1630_v51, %v839_v56  ;;  %v1947_v0 = vld [vmem:[%s2347_s2 + $0xe8] sm:$0xff]   ;;  %v1664_v36 = vld [vmem:[%s2072_s28 + $0x1c] sm:$0x1] }
  0x23   : > { %v499_v31 = vor.u32 %v498_v22, %v495_v21  ;;  %v514_v48 = vrot.slane %v513_v38, 4  ;;  %v1117_v62 = vshrl.u32 %v1016_v57, 16  ;;  %v1612_v14 = vcombine.low %v2081_v12, %v2084_v13  ;;  %v1659_v15 = vld [vmem:[%s2072_s28 + $0x8] sm:$0xf]  ;;  %v1660_v16 = vld [vmem:[%s2072_s28 + $0xc] sm:$0x1] }
  0x24   : > { %1786 = vmatpush3.bf16.msra.mxu1 %v1932_v32  ;;  %v431_v32 = vld [vmem:[%s2072_s28 + $0x34] sm:$0x1]  ;;  %v541_v59 = vor.u32 %v540_v50, %v537_v49  ;;  %v1613_v18 = vcombine.low %v2109_v34, %v2115_v37  ;;  %v1019_v22 = vshrl.u32 %v1659_v15, 16  ;;  %v1028_v24 = vshll.u32 %v1660_v16, 16  ;;  %v1666_v46 = vld [vmem:[%s2072_s28 + $0x24] sm:$0x1] }
  0x25   : > { %1834 = vmatpush3.bf16.msra.mxu0 %v1933_v35  ;;  %1795 = vmatprep.subr.bf16.mxu1 %v1934_v52  ;;  %v521_v35 = vshrl.u32 %v2174_v29, 16  ;;  %v530_v39 = vshll.u32 %v431_v32, 16  ;;  %v500_v43 = vrot.slane %v499_v31, 4  ;;  %v1662_v21 = vld [vmem:[%s2072_s28 + $0x14] sm:$0x1]  ;;  %v1952_v50 = vld [vmem:[%s2347_s2 + $0xf8] sm:$0xff]   ;;  %v1615_v34 = vcombine.low %v2174_v29, %v2177_v30 }
  0x26   : > { %1843 = vmatprep.subr.bf16.mxu0 %v1936_v58  ;;  %v1950_v12 = vld [vmem:[%s2347_s2 + $0xf0] sm:$0xff]   ;;  %v1042_v26 = vshll.u32 %v1662_v21, 16  ;;  %v1021_v32 = vrot.slane %v1019_v22, 4  ;;  %v1671_v21 = vld [vmem:[%s2072_s28 + $0x38] sm:$0xf] }
  0x27   : > { %1788 = vmatmul.mubr.bf16.vlgmr.msra.gmra.mrb[0].mxu1 %v1601_v3  ;;  %v523_v44 = vrot.slane %v521_v35, 4  ;;  %v532_v54 = vrot.slane %v530_v39, 5  ;;  %v1120_v3 = vshll.u32 %v1016_v57, 16  ;;  %v1030_v35 = vrot.slane %v1028_v24, 5 }
  0x28   : > { %1836 = vmatmul.mubr.bf16.vlgmr.msra.gmra.mrb[0].mxu0 %v1937_v61  ;;  %1796 = vmatpush3.bf16.msra.mxu1 %v1934_v52  ;;  %v505_v52 = vsel %vm2100_vm2, %v500_v43, %v504_v23  ;;  %v2200_v61 = vld [vmem:[%s375_s18 + $0x4] sm:$0x1]  ;;  %v1022_v23 = vshll.u32 %v1659_v15, 16  ;;  %v1044_v41 = vrot.slane %v1042_v26, 5 }
  0x29   : > { %1844 = vmatpush3.bf16.msra.mxu0 %v1936_v58  ;;  %1797 = vmatprep.subr.bf16.mxu1 %v1938_v4  ;;  %v527_v53 = vor.u32 %v526_v45, %v523_v44  ;;  %v519_v58 = vsel %vm2100_vm2, %v514_v48, %v518_v27  ;;  %v2212_v9 = vrot.slane %v1120_v3, 5  ;;  %v1126_v10 = vshll.u32 %v2200_v61, 16  ;;  %v1663_v27 = vld [vmem:[%s2072_s28 + $0x18] sm:$0xf] }
  0x2a   : > { %1845 = vmatprep.subr.bf16.mxu0 %v1939_v2  ;;  %1839 = vmatprep.mubr.bf16.mxu0 %v1948_v25  ;;  %v1602_v1 = vcombine.low %v505_v52, %v519_v58  ;;  %v1024_v33 = vrot.slane %v1022_v23, 5  ;;  %v1047_v38 = vshrl.u32 %v1663_v27, 16  ;;  %v1050_v43 = vshll.u32 %v1663_v27, 16  ;;  %v1951_v44 = vld [vmem:[%s2347_s2 + $0x38] sm:$0xff]  }
  0x2b   : > { %v1056_v48 = vshll.u32 %v1664_v36, 16  ;;  %v1106_v36 = vshll.u32 %v1671_v21, 16 }
  0x2c   : > { %1798 = vmatpush3.bf16.msra.mxu1 %v1938_v4  ;;  %v542_v4 = vrot.slane %v541_v59, 4  ;;  %1791 = vmatprep.mubr.bf16.mxu1 %v1602_v1  ;;  %v1025_v45 = vor.u32 %v1024_v33, %v1021_v32  ;;  %v1052_v52 = vrot.slane %v1050_v43, 5  ;;  %v1668_v59 = vld [vmem:[%s2072_s28 + $0x2c] sm:$0x1] }
  0x2d   : > { %1846 = vmatpush3.bf16.msra.mxu0 %v1939_v2  ;;  %1799 = vmatprep.subr.bf16.mxu1 %v1940_v5  ;;  %v528_v2 = vrot.slane %v527_v53, 4  ;;  %v1058_v57 = vrot.slane %v1056_v48, 5 }
  0x2e   : > { %1847 = vmatprep.subr.bf16.mxu0 %v1941_v6  ;;  %v547_v11 = vsel %vm2100_vm2, %v542_v4, %v546_v55  ;;  %v1667_v55 = vld [vmem:[%s2072_s28 + $0x28] sm:$0xf]  ;;  %v1026_v56 = vrot.slane %v1025_v45, 4  ;;  %v1670_v4 = vld [vmem:[%s2072_s28 + $0x34] sm:$0x1] }
  0x30   : > { %1800 = vmatpush3.bf16.msra.mxu1 %v1940_v5  ;;  %v2208_v5 = vrot.slane %v1117_v62, 4  ;;  %1840 = vmatmul.mubr.bf16.gmra.mrb[4].mxu0 %v1650_v60  ;;  %v1075_v60 = vshrl.u32 %v1667_v55, 16  ;;  %v1031_v3 = vsel %vm2100_vm2, %v1026_v56, %v1030_v35  ;;  %v1103_v35 = vshrl.u32 %v1671_v21, 16 }
  0x31   : > { %1848 = vmatpush3.bf16.msra.mxu0 %v1941_v6  ;;  %1801 = vmatprep.subr.bf16.mxu1 %v1942_v20  ;;  %v533_v6 = vsel %vm2100_vm2, %v528_v2, %v532_v54  ;;  %v1070_v54 = vshll.u32 %v1666_v46, 16  ;;  %v1669_v2 = vld [vmem:[%s2072_s28 + $0x30] sm:$0xf] }
  0x32   : > { %1849 = vmatprep.subr.bf16.mxu0 %v1943_v17  ;;  %v1603_v19 = vcombine.low %v533_v6, %v547_v11  ;;  %v1123_v31 = vor.u32 %v2212_v9, %v2208_v5  ;;  %v1077_v6 = vrot.slane %v1075_v60, 4  ;;  %v1078_v11 = vshll.u32 %v1667_v55, 16 }
  0x33   : > { %v1072_v1 = vrot.slane %v1070_v54, 5  ;;  %v1105_v46 = vrot.slane %v1103_v35, 4 }
  0x34   : > { %1802 = vmatpush3.bf16.msra.mxu1 %v1942_v20  ;;  %v1949_v20 = vld [vmem:[%s2347_s2 + $0x30] sm:$0xff]   ;;  %v1080_v23 = vrot.slane %v1078_v11, 5  ;;  %v1124_v48 = vrot.slane %v1123_v31, 4 }
  0x35   : > { %1850 = vmatpush3.bf16.msra.mxu0 %v1943_v17  ;;  %1803 = vmatprep.subr.bf16.mxu1 %v1944_v42  ;;  %v1661_v17 = vld [vmem:[%s2072_s28 + $0x10] sm:$0xf] }
  0x36   : > { %1851 = vmatprep.subr.bf16.mxu0 %v1945_v47  ;;  %v1033_v13 = vshrl.u32 %v1661_v17, 16  ;;  %v1036_v25 = vshll.u32 %v1661_v17, 16  ;;  %1792 = vmatmul.mubr.bf16.gmra.mrb[4].mxu1 %v1603_v19  ;;  %v1089_v19 = vshrl.u32 %v1669_v2, 16  ;;  %v1081_v32 = vor.u32 %v1080_v23, %v1077_v6 }
  0x37   : > { %1811 = vmatprep.mubr.bf16.mxu1 %v1612_v14  ;;  %v1084_v14 = vshll.u32 %v1668_v59, 16 }
  0x38   : > { %1804 = vmatpush3.bf16.msra.mxu1 %v1944_v42  ;;  %v1035_v39 = vrot.slane %v1033_v13, 4  ;;  %v1038_v40 = vrot.slane %v1036_v25, 5  ;;  %v1665_v42 = vld [vmem:[%s2072_s28 + $0x20] sm:$0xf]  ;;  %v1672_v13 = vld [vmem:[%s2072_s28 + $0x3c] sm:$0x1] }
  0x39   : > { %1852 = vmatpush3.bf16.msra.mxu0 %v1945_v47  ;;  %1805 = vmatprep.subr.bf16.mxu1 %v1946_v63  ;;  %v1049_v47 = vrot.slane %v1047_v38, 4  ;;  %v1061_v49 = vshrl.u32 %v1665_v42, 16  ;;  %v1064_v53 = vshll.u32 %v1665_v42, 16  ;;  %v1086_v24 = vrot.slane %v1084_v14, 5 }
  0x3a   : > { %1853 = vmatprep.subr.bf16.mxu0 %v1947_v0  ;;  %v1039_v51 = vor.u32 %v1038_v40, %v1035_v39  ;;  %v1091_v27 = vrot.slane %v1089_v19, 4  ;;  %v1614_v39 = vcombine.low %v2155_v7, %v2158_v8  ;;  %v1082_v43 = vrot.slane %v1081_v32, 4 }
  0x3b   : > { %v1063_v58 = vrot.slane %v1061_v49, 4 }
  0x3c   : > { %1806 = vmatpush3.bf16.msra.mxu1 %v1946_v63  ;;  %v1040_v62 = vrot.slane %v1039_v51, 4  ;;  %v1053_v63 = vor.u32 %v1052_v52, %v1049_v47  ;;  %v1108_v47 = vrot.slane %v1106_v36, 5  ;;  %v1087_v7 = vsel %vm2100_vm2, %v1082_v43, %v1086_v24  ;;  %v2280_v52 = vld [vmem:[%s2348_s3] ss:$0 sm:$0xff] }
  0x3d   : > { %1854 = vmatpush3.bf16.msra.mxu0 %v1947_v0  ;;  %1807 = vmatprep.subr.bf16.mxu1 %v1949_v20  ;;  %v1066_v0 = vrot.slane %v1064_v53, 5 }
  0x3e   : > { %1855 = vmatprep.subr.bf16.mxu0 %v1950_v12  ;;  %v1045_v15 = vsel %vm2100_vm2, %v1040_v62, %v1044_v41  ;;  %v1054_v16 = vrot.slane %v1053_v63, 4  ;;  %v1112_v41 = vshll.u32 %v1672_v13, 16  ;;  %v1109_v49 = vor.u32 %v1108_v47, %v1105_v46 }
  0x3f   : > { %v1067_v17 = vor.u32 %v1066_v0, %v1063_v58  ;;  %v1689_v22 = vcombine.low %v1031_v3, %v1045_v15 }
  0x40   : > { %1808 = vmatpush3.bf16.msra.mxu1 %v1949_v20  ;;  %v1059_v25 = vsel %vm2100_vm2, %v1054_v16, %v1058_v57  ;;  %v1098_v20 = vshll.u32 %v1670_v4, 16  ;;  %v1110_v31 = vrot.slane %v1109_v49, 4 }
  0x41   : > { %1856 = vmatpush3.bf16.msra.mxu0 %v1950_v12  ;;  %1809 = vmatprep.subr.bf16.mxu1 %v1951_v44  ;;  %v1092_v12 = vshll.u32 %v1669_v2, 16  ;;  %v1068_v26 = vrot.slane %v1067_v17, 4 }
  0x42   : > { %1857 = vmatprep.subr.bf16.mxu0 %v1952_v50  ;;  %1859 = vmatprep.mubr.bf16.mxu0 %v1689_v22  ;;  %v1100_v40 = vrot.slane %v1098_v20, 5 }
  0x43   : > { %v1094_v33 = vrot.slane %v1092_v12, 5  ;;  %v1073_v38 = vsel %vm2100_vm2, %v1068_v26, %v1072_v1 }
  0x44   : > { %1810 = vmatpush3.bf16.msra.mxu1 %v1951_v44  ;;  %v1690_v42 = vcombine.low %v1059_v25, %v1073_v38  ;;  %v1128_v44 = vrot.slane %v1126_v10, 5 }
  0x45   : > { %1858 = vmatpush3.bf16.msra.mxu0 %v1952_v50  ;;  %v1095_v45 = vor.u32 %v1094_v33, %v1091_v27  ;;  %v1114_v50 = vrot.slane %v1112_v41, 5 }
  0x46   : > { %v1129_v61 = vsel %vm2100_vm2, %v1124_v48, %v1128_v44 }
  0x47   : > { %1812 = vmatmul.mubr.bf16.vlgmr.msra.gmra.mrb[0].mxu1 %v1613_v18  ;;  %v1096_v8 = vrot.slane %v1095_v45, 4  ;;  %v1115_v37 = vsel %vm2100_vm2, %v1110_v31, %v1114_v50 }
  0x48   : > { %1860 = vmatmul.mubr.bf16.vlgmr.msra.gmra.mrb[0].mxu0 %v1690_v42  ;;  %1815 = vmatprep.mubr.bf16.mxu1 %v1614_v39  ;;  %v1692_v10 = vcombine.low %v1115_v37, %v1129_v61 }
  0x49   : > { %v1101_v5 = vsel %vm2100_vm2, %v1096_v8, %v1100_v40 }
  0x4a   : > { %v1691_v9 = vcombine.low %v1087_v7, %v1101_v5 }
  0x4c   : > { %1863 = vmatprep.mubr.bf16.mxu0 %v1691_v9 }
  0x4f   : > { %1816 = vmatmul.mubr.bf16.gmra.mrb[4].mxu1 %v1615_v34 }
  0x50   : > { %1864 = vmatmul.mubr.bf16.gmra.mrb[4].mxu0 %v1692_v10 }
 0x11a   : > { %v1813_v18 = vpop.f32.mrb[0].mxu1 }
 0x11b   : > { %v1861_v51 = vpop.f32.mrb[0].mxu0  ;;  %v800_v54 = vpop.f32.mrb[1].mxu1 }
 0x11c   : > { %v1867_v53 = vadd.f32 %v1861_v51, %v1813_v18  ;;  %v1245_v55 = vpop.f32.mrb[1].mxu0  ;;  %v1814_v29 = vpop.f32.mrb[2].mxu1 }
 0x11d   : > { %v1868_v56 = vadd.f32 %v1245_v55, %v800_v54  ;;  %v1862_v30 = vpop.f32.mrb[2].mxu0  ;;  %v803_v58 = vpop.f32.mrb[3].mxu1 }
 0x11e   : > { %v1293_v28 = vadd.f32 %v1867_v53, %v2280_v52  ;;  %v1869_v57 = vadd.f32 %v1862_v30, %v1814_v29  ;;  %v1248_v59 = vpop.f32.mrb[3].mxu0 }
 0x11f   : > { %v1291_v60 = vadd.f32 %v1868_v56, %v2280_v52  ;;  %v1870_v62 = vadd.f32 %v1248_v59, %v803_v58 }
 0x120   : > { %v1717_v63 = vpack.c.bf16 %v1293_v28, %v1293_v28  ;;  %v1294_v0 = vadd.f32 %v1869_v57, %v2280_v52  ;;  %v1325_v4 = vmul.f32 %v1293_v28, %v1293_v28  ;;  %v1303_v13 = vsel %vm1299_vm4, %v1293_v28, 0.0 }
 0x121   : > { %v1323_v1 = vmul.f32 %v1291_v60, %v1291_v60  ;;  %v1715_v2 = vpack.c.bf16 %v1291_v60, %v1291_v60  ;;  %v1292_v3 = vadd.f32 %v1870_v62, %v2280_v52  ;;  %v1300_v11 = vsel %vm1299_vm4, %v1291_v60, 0.0 }
 0x122   : > { %1388 = vst.msk [vmem:[%s2287_s20 + $0x8] sm:$0xf] %vm1385_vm3, %v1717_v63  ;;  %v1718_v6 = vpack.c.bf16 %v1294_v0, %v1294_v0  ;;  %v1817_v17 = vpop.f32.mrb[4].mxu1  ;;  %v1326_v21 = vmul.f32 %v1294_v0, %v1294_v0  ;;  %v1334_v41 = vsel %vm1299_vm4, %v1325_v4, 0.0  ;;  %v1305_v45 = vsel %vm1299_vm4, %v1294_v0, 0.0 }
 0x123   : > { %1386 = vst.msk [vmem:[%s2287_s20] sm:$0xf] %vm1385_vm3, %v1715_v2  ;;  %v1301_v14 = vsel %vm1299_vm4, %v1292_v3, 0.0  ;;  %v1324_v15 = vmul.f32 %v1292_v3, %v1292_v3  ;;  %v1716_v16 = vpack.c.bf16 %v1292_v3, %v1292_v3  ;;  %v1865_v19 = vpop.f32.mrb[4].mxu0  ;;  %v816_v24 = vpop.f32.mrb[5].mxu1  ;;  %v1331_v25 = vsel %vm1299_vm4, %v1323_v1, 0.0 }
 0x124   : > { %1389 = vst.msk [vmem:[%s2287_s20 + $0xc] sm:$0xf] %vm1385_vm3, %v1718_v6  ;;  %v1302_v22 = vadd.f32 %v1301_v14, %v1300_v11  ;;  %v1871_v23 = vadd.f32 %v1865_v19, %v1817_v17  ;;  %v1261_v12 = vpop.f32.mrb[5].mxu0  ;;  %v1818_v20 = vpop.f32.mrb[6].mxu1  ;;  %v1336_v46 = vsel %vm1299_vm4, %v1326_v21, 0.0 }
 0x125   : > { %v1332_v26 = vsel %vm1299_vm4, %v1324_v15, 0.0  ;;  %1387 = vst.msk [vmem:[%s2287_s20 + $0x4] sm:$0xf] %vm1385_vm3, %v1716_v16  ;;  %v1872_v27 = vadd.f32 %v1261_v12, %v816_v24  ;;  %v1866_v32 = vpop.f32.mrb[6].mxu0  ;;  %v819_v39 = vpop.f32.mrb[7].mxu1 }
 0x126   : > { %v1304_v33 = vadd.f32 %v1303_v13, %v1302_v22  ;;  %v1333_v35 = vadd.f32 %v1332_v26, %v1331_v25  ;;  %v1297_v36 = vadd.f32 %v1871_v23, %v2280_v52  ;;  %v1873_v38 = vadd.f32 %v1866_v32, %v1818_v20  ;;  %v1264_v40 = vpop.f32.mrb[7].mxu0 }
 0x127   : > { %v1295_v42 = vadd.f32 %v1872_v27, %v2280_v52  ;;  %v1874_v43 = vadd.f32 %v1264_v40, %v819_v39 }
 0x128   : > { %v1335_v47 = vadd.f32 %v1334_v41, %v1333_v35  ;;  %v1721_v48 = vpack.c.bf16 %v1297_v36, %v1297_v36  ;;  %v1306_v44 = vadd.f32 %v1305_v45, %v1304_v33  ;;  %v1298_v5 = vadd.f32 %v1873_v38, %v2280_v52 }
 0x129   : > { %v1307_v7 = vsel %vm1299_vm4, %v1295_v42, 0.0  ;;  %v1327_v8 = vmul.f32 %v1295_v42, %v1295_v42  ;;  %v1719_v49 = vpack.c.bf16 %v1295_v42, %v1295_v42  ;;  %v1296_v9 = vadd.f32 %v1874_v43, %v2280_v52 }
 0x12a   : > { %1392 = vst.msk [vmem:[%s2287_s20 + $0x18] sm:$0xf] %vm1385_vm3, %v1721_v48  ;;  %v1337_v50 = vadd.f32 %v1336_v46, %v1335_v47  ;;  %v1308_v31 = vadd.f32 %v1307_v7, %v1306_v44  ;;  %v1722_v37 = vpack.c.bf16 %v1298_v5, %v1298_v5  ;;  %v1329_v10 = vmul.f32 %v1297_v36, %v1297_v36 }
 0x12b   : > { %v1338_v61 = vsel %vm1299_vm4, %v1327_v8, 0.0  ;;  %1390 = vst.msk [vmem:[%s2287_s20 + $0x10] sm:$0xf] %vm1385_vm3, %v1719_v49  ;;  %v1309_v18 = vsel %vm1299_vm4, %v1296_v9, 0.0  ;;  %v1328_v51 = vmul.f32 %v1296_v9, %v1296_v9  ;;  %v1720_v53 = vpack.c.bf16 %v1296_v9, %v1296_v9 }
 0x12c   : > { %v1339_v34 = vadd.f32 %v1338_v61, %v1337_v50  ;;  %1393 = vst.msk [vmem:[%s2287_s20 + $0x1c] sm:$0xf] %vm1385_vm3, %v1722_v37  ;;  %v1310_v54 = vadd.f32 %v1309_v18, %v1308_v31  ;;  %v1311_v55 = vsel %vm1299_vm4, %v1297_v36, 0.0  ;;  %v1330_v56 = vmul.f32 %v1298_v5, %v1298_v5 }
 0x12d   : > { %v1340_v52 = vsel %vm1299_vm4, %v1328_v51, 0.0  ;;  %1391 = vst.msk [vmem:[%s2287_s20 + $0x14] sm:$0xf] %vm1385_vm3, %v1720_v53  ;;  %v1342_v28 = vsel %vm1299_vm4, %v1329_v10, 0.0  ;;  %v1313_v57 = vsel %vm1299_vm4, %v1298_v5, 0.0 }
 0x12e   : > { %v1312_v29 = vadd.f32 %v1311_v55, %v1310_v54  ;;  %v1341_v30 = vadd.f32 %v1340_v52, %v1339_v34  ;;  %v1344_v60 = vsel %vm1299_vm4, %v1330_v56, 0.0 }
 0x130   : > { %v1314_v58 = vadd.f32 %v1313_v57, %v1312_v29  ;;  %v1343_v59 = vadd.f32 %v1342_v28, %v1341_v30 }
 0x132   : > { %v1315_v62 = vrot.slane %v1314_v58, 4  ;;  %v1345_v63 = vadd.f32 %v1344_v60, %v1343_v59 }
 0x134   : > { %v1316_v0 = vadd.f32 %v1315_v62, %v1314_v58  ;;  %v1346_v1 = vrot.slane %v1345_v63, 4 }
 0x136   : > { %v1317_v2 = vrot.slane %v1316_v0, 2  ;;  %v1347_v3 = vadd.f32 %v1346_v1, %v1345_v63 }
 0x138   : > { %v1318_v4 = vadd.f32 %v1317_v2, %v1316_v0  ;;  %v1348_v6 = vrot.slane %v1347_v3, 2 }
 0x13a   : > { %v1319_v11 = vrot.slane %v1318_v4, 1  ;;  %v1349_v14 = vadd.f32 %v1348_v6, %v1347_v3 }
 0x13c   : > { %v1320_v15 = vadd.f32 %v1319_v11, %v1318_v4  ;;  %v1350_v16 = vrot.slane %v1349_v14, 1 }
 0x13e   : > { %1322 = vst.msk [vmem:[%s393_s27] sm:$0x1] %vm1321_vm5, %v1320_v15  ;;  %v1351_v17 = vadd.f32 %v1350_v16, %v1349_v14 }
 0x140   : > { %1352 = vst.msk [vmem:[%s399_s7] sm:$0x1] %vm1321_vm5, %v1351_v17 }
 0x141 PF: > { %s17_s23 = sadd.s32 1, %s1979_s23   ;;  %s2354_s21 = smov %s1975_s22 }
 0x142   : > { %p14_p5 = scmp.ge.s32.totalorder %s17_s23, 4   ;;  %s2355_s22 = smov %s2357_s24 }
 0x144   :  { %16 = sbr.rel (!%p14_p5) target bundleno = 2 (0x2), region = 97 }

// kernel: _forward_impl.6
= control target key start
LH: loop header
LB: loop body
LE: loop exit
PB: predicated region body
PF: predicated region fallthrough
CT: control target
= control target key end

     0   :  { %s2100_s21 = smov 0   ;;  %s2102_s22 = smov 0   ;;  %s2413_s0 = inlined_call_operand.vmem [shape: bf16[2,5,5,256], index: 0, kind: input, shape index: {}, may-alias: {0,1}]   ;;  %s2414_s1 = inlined_call_operand.vmem [shape: bf16[2,5,5,256], index: 1, kind: input, shape index: {}, may-alias: {0,1}]   ;;  %s2415_s2 = inlined_call_operand.vmem [shape: bf16[4,256,128], index: 2, kind: input, shape index: {}]   ;;  %s2416_s3 = inlined_call_operand.vmem [shape: f32[1,128], index: 3, kind: input, shape index: {}]   ;;  %s2417_s4 = inlined_call_operand.vmem [shape: bf16[2,16,128], index: 4, kind: output, shape index: {0}]   ;;  %s2418_s5 = inlined_call_operand.vmem [shape: f32[2,1,1,128], index: 5, kind: output, shape index: {1}]   ;;  %s2419_s6 = inlined_call_operand.vmem [shape: f32[2,1,1,128], index: 6, kind: output, shape index: {2}]  }
   0x1   :  { %s2104_s23 = smov 0  }
   0x2 LB: > { %s29_s24 = sadd.s32 1, %s2058_s22  ;;  %p1658_p0 = scmp.ge.s32.totalorder %s2062_s23, 1  ;;  %s2062_s23 = sphi %s2104_s23, %s17_s23   ;;  %s2058_s22 = sphi %s2102_s22, %s2425_s22   ;;  %s2054_s21 = sphi %s2100_s21, %s2424_s21  }
   0x3   : > { %p31_p1 = scmp.ge.s32.totalorder %s29_s24, 2  ;;  %p277_p2 = scmp.lt.s32.totalorder %s2062_s23, 3 }
   0x5   : > { %s2427_s24 = smov (%p31_p1, %s29_s24), 0  ;;  %p278_p3 = pnand %p1658_p0, %p277_p2 }
   0x6   : > { %v1976_v0 = vld [vmem:[%s2415_s2 + $0xc0] sm:$0xff] (!%p278_p3)   ;;  %p350_p4 = scmp.lt.s32.totalorder (!%p278_p3), %s2054_s21, 1  ;;  %v1980_v4 = vld [vmem:[%s2415_s2 + $0xc8] sm:$0xff] (!%p278_p3)   ;;  %v1984_v8 = vld [vmem:[%s2415_s2 + $0xd0] sm:$0xff] (!%p278_p3)   ;;  %vm509_vm0 = vsmask.f32 (!%p278_p3), 1280  ;;  %v610_v39 = vlaneseq (!%p278_p3) }
   0x7   : > { %281 = sbr.rel (%p278_p3) target bundleno = 316 (0x13c), region = 36  ;;  %v1977_v1 = vld [vmem:[%s2415_s2 + $0x40] sm:$0xff] (!%p278_p3)   ;;  %1860 = vmatprep.subr.bf16.mxu0 (!%p278_p3), %v1976_v0  ;;  %v1981_v5 = vld [vmem:[%s2415_s2 + $0x48] sm:$0xff] (!%p278_p3)   ;;  %v1985_v9 = vld [vmem:[%s2415_s2 + $0x50] sm:$0xff] (!%p278_p3)   ;;  %vm510_vm1 = vsmask.f32 (!%p278_p3), 3336 }
   0x8   : > { %v1978_v2 = vld [vmem:[%s2415_s2 + $0x80] sm:$0xff] (!%p278_p3)   ;;  %1882 = vmatprep.subr.bf16.mxu1 (!%p278_p3), %v1977_v1  ;;  %v1982_v6 = vld [vmem:[%s2415_s2 + $0x88] sm:$0xff] (!%p278_p3)   ;;  %v1986_v10 = vld [vmem:[%s2415_s2 + $0x90] sm:$0xff] (!%p278_p3)   ;;  %vm512_vm2 = vsmask.f32 (!%p278_p3), 5392 }
   0x9   : > { %v1979_v3 = vld [vmem:[%s2415_s2] sm:$0xff] (!%p278_p3)   ;;  %1861 = vmatpush3.bf16.msra.mxu0 (!%p278_p3), %v1978_v2  ;;  %v1983_v7 = vld [vmem:[%s2415_s2 + $0x8] sm:$0xff] (!%p278_p3)   ;;  %v1987_v11 = vld [vmem:[%s2415_s2 + $0x10] sm:$0xff] (!%p278_p3)   ;;  %vm514_vm4 = vsmask.f32 (!%p278_p3), 7448 }
   0xa   : > { %1883 = vmatpush3.bf16.msra.mxu1 (!%p278_p3), %v1979_v3  ;;  %1862 = vmatprep.subr.bf16.mxu0 (!%p278_p3), %v1980_v4  ;;  %v1988_v12 = vld [vmem:[%s2415_s2 + $0xd8] sm:$0xff] (!%p278_p3)   ;;  %v1992_v16 = vld [vmem:[%s2415_s2 + $0xe0] sm:$0xff] (!%p278_p3)   ;;  %v1996_v20 = vld [vmem:[%s2415_s2 + $0xe8] sm:$0xff] (!%p278_p3)  }
   0xb   : > { %1884 = vmatprep.subr.bf16.mxu1 (!%p278_p3), %v1981_v5  ;;  %v1989_v13 = vld [vmem:[%s2415_s2 + $0x58] sm:$0xff] (!%p278_p3)   ;;  %v1993_v17 = vld [vmem:[%s2415_s2 + $0x60] sm:$0xff] (!%p278_p3)   ;;  %v1997_v21 = vld [vmem:[%s2415_s2 + $0x68] sm:$0xff] (!%p278_p3)  }
   0xc   : > { %v1990_v14 = vld [vmem:[%s2415_s2 + $0x98] sm:$0xff] (!%p278_p3)   ;;  %v1994_v18 = vld [vmem:[%s2415_s2 + $0xa0] sm:$0xff] (!%p278_p3)   ;;  %v1998_v22 = vld [vmem:[%s2415_s2 + $0xa8] sm:$0xff] (!%p278_p3)  }
   0xd   : > { %1863 = vmatpush3.bf16.msra.mxu0 (!%p278_p3), %v1982_v6  ;;  %v1991_v15 = vld [vmem:[%s2415_s2 + $0x18] sm:$0xff] (!%p278_p3)   ;;  %v1995_v19 = vld [vmem:[%s2415_s2 + $0x20] sm:$0xff] (!%p278_p3)   ;;  %v1999_v23 = vld [vmem:[%s2415_s2 + $0x28] sm:$0xff] (!%p278_p3)   ;;  %v611_v6 = vshrl.u32 (!%p278_p3), %v610_v39, 7 }
   0xe   : > { %s2429_s21 = smov (!%p350_p4, %s2054_s21), 1  ;;  %1885 = vmatpush3.bf16.msra.mxu1 %v1983_v7  ;;  %1864 = vmatprep.subr.bf16.mxu0 %v1984_v8  ;;  %v2000_v24 = vld [vmem:[%s2415_s2 + $0xf0] sm:$0xff]   ;;  %v2004_v28 = vld [vmem:[%s2415_s2 + $0xf8] sm:$0xff]   ;;  %vm511_vm3 = vmor %vm509_vm0, %vm510_vm1 }
   0xf   : > { %1886 = vmatprep.subr.bf16.mxu1 %v1985_v9  ;;  %v2001_v25 = vld [vmem:[%s2415_s2 + $0x70] sm:$0xff]   ;;  %s1948_s13 = smul.u32 40, %s2429_s21  ;;  %v2005_v29 = vld [vmem:[%s2415_s2 + $0x78] sm:$0xff]   ;;  %v2008_v44 = vld [vmem:[%s2415_s2 + $0x140] sm:$0xff]   ;;  %s393_s7 = scalar_lea.vmem %s2418_s5, %s2429_s21 }
  0x10   : > { %v2002_v26 = vld [vmem:[%s2415_s2 + $0xb0] sm:$0xff]   ;;  %v2006_v30 = vld [vmem:[%s2415_s2 + $0xb8] sm:$0xff]   ;;  %vm2232_vm5 = vmor %vm511_vm3, %vm512_vm2  ;;  %s399_s10 = scalar_lea.vmem %s2419_s6, %s2429_s21 }
  0x11   : > { %1865 = vmatpush3.bf16.msra.mxu0 %v1986_v10  ;;  %v2003_v27 = vld [vmem:[%s2415_s2 + $0x30] sm:$0xff]   ;;  %s2216_s28 = scalar_lea.vmem %s2413_s0, %s1948_s13  ;;  %v2007_v31 = vld [vmem:[%s2415_s2 + $0x38] sm:$0xff]   ;;  %v2009_v62 = vld [vmem:[%s2415_s2 + $0x1c0] sm:$0xff]   ;;  %v2064_v10 = vmov 1983009808   ;;  %s1851_s14 = sadd.s32 32, %s1948_s13 }
  0x12   : > { %1887 = vmatpush3.bf16.msra.mxu1 %v1987_v11  ;;  %1866 = vmatprep.subr.bf16.mxu0 %v1988_v12  ;;  %v1667_v32 = vld.sshfl [vmem:[%s2216_s28] sm:$0x5f pattern:$0x76325410]  ;;  %vm2242_vm6 = vmor %vm2232_vm5, %vm514_vm4  ;;  %v608_v11 = vunpack.c.l.s4 %v2064_v10  ;;  %v2020_v49 = vld [vmem:[%s2415_s2 + $0x158] sm:$0xff]   ;;  %s375_s26 = scalar_lea.vmem %s2414_s1, %s1851_s14  ;;  %s1852_s13 = sshll.u32 %s2429_s21, 3 }
  0x13   : > { %1888 = vmatprep.subr.bf16.mxu1 %v1989_v13  ;;  %v1668_v33 = vld.sshfl [vmem:[%s2216_s28 + $0x8] sm:$0x5f pattern:$0x76325410]  ;;  %v484_v34 = vcombine.high %v1667_v32, %v1667_v32  ;;  %v517_v41 = vshrl.u32 %v1667_v32, 16  ;;  %v520_v42 = vshll.u32 %v1667_v32, 16 }
  0x14   : > { %v1669_v35 = vld.sshfl [vmem:[%s2216_s28 + $0x10] sm:$0x5f pattern:$0x76325410]  ;;  %v492_v36 = vcombine.high %v1668_v33, %v1668_v33  ;;  %v531_v45 = vshrl.u32 %v1668_v33, 16  ;;  %v534_v46 = vshll.u32 %v1668_v33, 16 }
  0x15   : > { %1867 = vmatpush3.bf16.msra.mxu0 %v1990_v14  ;;  %v1670_v37 = vld.sshfl [vmem:[%s2216_s28 + $0x18] sm:$0x5f pattern:$0x76325410]  ;;  %v500_v38 = vcombine.high %v1669_v35, %v1669_v35  ;;  %v526_v43 = vshll.u32 %v484_v34, 16  ;;  %v545_v48 = vshrl.u32 %v1669_v35, 16 }
  0x16   : > { %1889 = vmatpush3.bf16.msra.mxu1 %v1991_v15  ;;  %1868 = vmatprep.subr.bf16.mxu0 %v1992_v16  ;;  %v508_v40 = vcombine.high %v1670_v37, %v1670_v37  ;;  %v540_v47 = vshll.u32 %v492_v36, 16  ;;  %v519_v50 = vrot.slane %v517_v41, 6  ;;  %v522_v51 = vrot.slane %v520_v42, 7  ;;  %v2011_v36 = vld [vmem:[%s2415_s2 + $0x180] sm:$0xff]   ;;  %v2012_v41 = vld [vmem:[%s2415_s2 + $0x148] sm:$0xff]  }
  0x17   : > { %1890 = vmatprep.subr.bf16.mxu1 %v1993_v17  ;;  %v528_v52 = vrot.slane %v526_v43, 7  ;;  %v548_v53 = vshll.u32 %v1669_v35, 16  ;;  %v533_v54 = vrot.slane %v531_v45, 6  ;;  %v536_v55 = vrot.slane %v534_v46, 7  ;;  %v2015_v42 = vld [vmem:[%s2415_s2 + $0x188] sm:$0xff]   ;;  %v2017_v43 = vld [vmem:[%s2415_s2 + $0x1d0] sm:$0xff]  }
  0x18   : > { %v542_v56 = vrot.slane %v540_v47, 7  ;;  %v547_v57 = vrot.slane %v545_v48, 6  ;;  %v523_v58 = vor.u32 %v522_v51, %v519_v50  ;;  %v554_v60 = vshll.u32 %v500_v38, 16  ;;  %v2016_v45 = vld [vmem:[%s2415_s2 + $0x150] sm:$0xff]   ;;  %v2021_v47 = vld [vmem:[%s2415_s2 + $0x1d8] sm:$0xff]   ;;  %v2025_v51 = vld [vmem:[%s2415_s2 + $0x1e0] sm:$0xff]  }
  0x19   : > { %1869 = vmatpush3.bf16.msra.mxu0 %v1994_v18  ;;  %v550_v59 = vrot.slane %v548_v53, 7  ;;  %v559_v61 = vshrl.u32 %v1670_v37, 16  ;;  %v537_v0 = vor.u32 %v536_v55, %v533_v54  ;;  %v562_v1 = vshll.u32 %v1670_v37, 16  ;;  %v2013_v37 = vld [vmem:[%s2415_s2 + $0x1c8] sm:$0xff]   ;;  %v2019_v46 = vld [vmem:[%s2415_s2 + $0x190] sm:$0xff]   ;;  %v2023_v50 = vld [vmem:[%s2415_s2 + $0x198] sm:$0xff]  }
  0x1a   : > { %1891 = vmatpush3.bf16.msra.mxu1 %v1995_v19  ;;  %1870 = vmatprep.subr.bf16.mxu0 %v1996_v20  ;;  %v568_v2 = vshll.u32 %v508_v40, 16  ;;  %v524_v3 = vrot.slane %v523_v58, 2  ;;  %v556_v8 = vrot.slane %v554_v60, 7  ;;  %v609_v18 = vunpack.c.0.s8 %v608_v11  ;;  %v2010_v40 = vld [vmem:[%s2415_s2 + $0x100] sm:$0xff]   ;;  %v2018_v48 = vld [vmem:[%s2415_s2 + $0x110] sm:$0xff]   ;;  %v2029_v55 = vld [vmem:[%s2415_s2 + $0x1e8] sm:$0xff]  }
  0x1b   : > { %1892 = vmatprep.subr.bf16.mxu1 %v1997_v21  ;;  %v551_v4 = vor.u32 %v550_v59, %v547_v57  ;;  %v561_v5 = vrot.slane %v559_v61, 6  ;;  %v538_v7 = vrot.slane %v537_v0, 2  ;;  %v564_v9 = vrot.slane %v562_v1, 7  ;;  %v2024_v53 = vld [vmem:[%s2415_s2 + $0x160] sm:$0xff]   ;;  %v2028_v57 = vld [vmem:[%s2415_s2 + $0x168] sm:$0xff]   ;;  %v2033_v60 = vld [vmem:[%s2415_s2 + $0x1f0] sm:$0xff]  }
  0x1c   : > { %v529_v12 = vsel %vm2242_vm6, %v524_v3, %v528_v52  ;;  %v570_v14 = vrot.slane %v568_v2, 7  ;;  %v1663_v15 = vld.sshfl [vmem:[%s2216_s28] sm:$0xf pattern:$0x76325410]  ;;  %v2022_v52 = vld [vmem:[%s2415_s2 + $0x118] sm:$0xff]  }
  0x1d   : > { %1871 = vmatpush3.bf16.msra.mxu0 %v1998_v22  ;;  %v552_v13 = vrot.slane %v551_v4, 2  ;;  %v2251_v16 = vsel %vm2242_vm6, %v538_v7, %v542_v56  ;;  %v565_v17 = vor.u32 %v564_v9, %v561_v5  ;;  %v2254_v19 = vld.sshfl [vmem:[%s2216_s28 + $0x8] sm:$0xf pattern:$0x76325410]  ;;  %v2027_v54 = vld [vmem:[%s2415_s2 + $0x1a0] sm:$0xff]  }
  0x1e   : > { %1893 = vmatpush3.bf16.msra.mxu1 %v1999_v23  ;;  %1872 = vmatprep.subr.bf16.mxu0 %v2000_v24  ;;  %v605_v20 = vcombine.low %v529_v12, %v2251_v16  ;;  %v2258_v21 = vld.sshfl [vmem:[%s2216_s28 + $0x10] sm:$0xf pattern:$0x76325410]  ;;  %v762_v22 = vcombine.low %v1663_v15, %v2254_v19  ;;  %v2026_v56 = vld [vmem:[%s2415_s2 + $0x120] sm:$0xff]   ;;  %v2031_v58 = vld [vmem:[%s2415_s2 + $0x1a8] sm:$0xff]  }
  0x1f   : > { %1894 = vmatprep.subr.bf16.mxu1 %v2001_v25  ;;  %v2263_v23 = vsel %vm2242_vm6, %v552_v13, %v556_v8  ;;  %v566_v24 = vrot.slane %v565_v17, 2  ;;  %v2265_v25 = vsub.s32 %v609_v18, %v611_v6  ;;  %v989_v59 = vcombine.low %v2254_v19, %v2258_v21  ;;  %v2030_v61 = vld [vmem:[%s2415_s2 + $0x128] sm:$0xff]   ;;  %v1741_v0 = vld.sshfl [vmem:[%s375_s26] sm:$0xf pattern:$0x76325410] }
  0x20   : > { %v2035_v1 = vld [vmem:[%s2415_s2 + $0x1b0] sm:$0xff]   ;;  %v1796_v4 = vld.sshfl [vmem:[%s375_s26] sm:$0x5f pattern:$0x76325410]  ;;  %v2037_v5 = vld [vmem:[%s2415_s2 + $0x1f8] sm:$0xff]  }
  0x21   : > { %1873 = vmatpush3.bf16.msra.mxu0 %v2002_v26  ;;  %v2268_v26 = vld.sshfl [vmem:[%s2216_s28 + $0x18] sm:$0xf pattern:$0x76325410]  ;;  %v997_v3 = vrot.slane %v989_v59, %v2265_v25  ;;  %v1187_v6 = vcombine.high %v1796_v4, %v1796_v4  ;;  %v1231_v7 = vshrl.u32 %v1796_v4, 16  ;;  %v1234_v8 = vshll.u32 %v1796_v4, 16  ;;  %s386_s28 = scalar_lea.vmem %s2417_s4, %s1852_s13 }
  0x22   : > { %1895 = vmatpush3.bf16.msra.mxu1 %v2003_v27  ;;  %1874 = vmatprep.subr.bf16.mxu0 %v2004_v28  ;;  %v763_v27 = vcombine.low %v2258_v21, %v2268_v26  ;;  %v2274_v28 = vsel %vm2242_vm6, %v566_v24, %v570_v14  ;;  %v990_v2 = vcombine.low %v2268_v26, %v1741_v0  ;;  %v2034_v9 = vld [vmem:[%s2415_s2 + $0x130] sm:$0xff]   ;;  %v2036_v11 = vld [vmem:[%s2415_s2 + $0x178] sm:$0xff]  }
  0x23   : > { %1896 = vmatprep.subr.bf16.mxu1 %v2005_v29  ;;  %v770_v29 = vrot.slane %v762_v22, %v2265_v25  ;;  %v1233_v12 = vrot.slane %v1231_v7, 6  ;;  %v1236_v13 = vrot.slane %v1234_v8, 7  ;;  %v1240_v14 = vshll.u32 %v1187_v6, 16  ;;  %v2039_v15 = vld [vmem:[%s2415_s2 + $0x1b8] sm:$0xff]  }
  0x24   : > { %v777_v32 = vrot.slane %v763_v27, %v2265_v25  ;;  %v1004_v10 = vrot.slane %v990_v2, %v2265_v25  ;;  %v1277_v21 = vcombine.low %v2251_v16, %v2263_v23 }
  0x25   : > { %1875 = vmatpush3.bf16.msra.mxu0 %v2006_v30  ;;  %v606_v30 = vcombine.low %v2263_v23, %v2274_v28  ;;  %v1237_v18 = vor.u32 %v1236_v13, %v1233_v12  ;;  %v1242_v19 = vrot.slane %v1240_v14, 7 }
  0x26   : > { %1897 = vmatpush3.bf16.msra.mxu1 %v2007_v31  ;;  %1904 = vmatprep.subr.bf16.mxu0 %v2008_v44  ;;  %v613_v31 = vrot.slane %v605_v20, %v2265_v25  ;;  %v779_v34 = vcombine.high %v770_v29, %v777_v32  ;;  %v778_v35 = vcombine.low %v770_v29, %v777_v32  ;;  %v2014_v44 = vld [vmem:[%s2415_s2 + $0x108] sm:$0xff]   ;;  %v2038_v20 = vld [vmem:[%s2415_s2 + $0x138] sm:$0xff]  }
  0x27   : > { %1926 = vmatprep.subr.bf16.mxu1 %v2009_v62  ;;  %v620_v33 = vrot.slane %v606_v30, %v2265_v25  ;;  %v2032_v62 = vld [vmem:[%s2415_s2 + $0x170] sm:$0xff]   ;;  %v1006_v17 = vcombine.high %v997_v3, %v1004_v10  ;;  %v1238_v22 = vrot.slane %v1237_v18, 2  ;;  %v1005_v26 = vcombine.low %v997_v3, %v1004_v10 }
  0x28   : > { %910 = vmatprep.mubr.bf16.mxu1 %v779_v34  ;;  %v1285_v29 = vrot.slane %v1277_v21, %v2265_v25 }
  0x29   : > { %v622_v38 = vcombine.high %v613_v31, %v620_v33  ;;  %v621_v39 = vcombine.low %v613_v31, %v620_v33  ;;  %911 = vmatmul.mubr.bf16.vlgmr.msra.gmra.mrb[0].mxu1 %v778_v35  ;;  %v1243_v24 = vsel %vm2242_vm6, %v1238_v22, %v1242_v19 }
  0x2a   : > { %1927 = vmatpush3.bf16.msra.mxu1 %v2011_v36  ;;  %v1278_v27 = vcombine.low %v2274_v28, %v1243_v24 }
  0x2b   : > { %753 = vmatprep.mubr.bf16.mxu0 %v622_v38  ;;  %1928 = vmatprep.subr.bf16.mxu1 %v2013_v37 }
  0x2c   : > { %754 = vmatmul.mubr.bf16.vlgmr.msra.gmra.mrb[0].mxu0 %v621_v39  ;;  %v1292_v30 = vrot.slane %v1278_v27, %v2265_v25 }
  0x2d   : > { %1905 = vmatpush3.bf16.msra.mxu0 %v2010_v40  ;;  %1137 = vmatprep.mubr.bf16.mxu0 %v1006_v17 }
  0x2e   : > { %1906 = vmatprep.subr.bf16.mxu0 %v2012_v41  ;;  %1929 = vmatpush3.bf16.msra.mxu1 %v2015_v42  ;;  %v1294_v31 = vcombine.high %v1285_v29, %v1292_v30  ;;  %v1293_v32 = vcombine.low %v1285_v29, %v1292_v30 }
  0x2f   : > { %1930 = vmatprep.subr.bf16.mxu1 %v2017_v43 }
  0x30   : > { %1425 = vmatprep.mubr.bf16.mxu1 %v1294_v31 }
  0x31   : > { %1907 = vmatpush3.bf16.msra.mxu0 %v2014_v44 }
  0x32   : > { %1908 = vmatprep.subr.bf16.mxu0 %v2016_v45  ;;  %1931 = vmatpush3.bf16.msra.mxu1 %v2019_v46 }
  0x33   : > { %1932 = vmatprep.subr.bf16.mxu1 %v2021_v47 }
  0x35   : > { %1909 = vmatpush3.bf16.msra.mxu0 %v2018_v48 }
  0x36   : > { %1910 = vmatprep.subr.bf16.mxu0 %v2020_v49  ;;  %1933 = vmatpush3.bf16.msra.mxu1 %v2023_v50 }
  0x37   : > { %1934 = vmatprep.subr.bf16.mxu1 %v2025_v51 }
  0x39   : > { %1911 = vmatpush3.bf16.msra.mxu0 %v2022_v52 }
  0x3a   : > { %1912 = vmatprep.subr.bf16.mxu0 %v2024_v53  ;;  %1935 = vmatpush3.bf16.msra.mxu1 %v2027_v54  ;;  %v1845_v54 = vld [vmem:[%s2416_s3] ss:$0 sm:$0xff] }
  0x3b   : > { %1936 = vmatprep.subr.bf16.mxu1 %v2029_v55 }
  0x3d   : > { %1913 = vmatpush3.bf16.msra.mxu0 %v2026_v56 }
  0x3e   : > { %1914 = vmatprep.subr.bf16.mxu0 %v2028_v57  ;;  %1937 = vmatpush3.bf16.msra.mxu1 %v2031_v58 }
  0x3f   : > { %1938 = vmatprep.subr.bf16.mxu1 %v2033_v60 }
  0x41   : > { %1915 = vmatpush3.bf16.msra.mxu0 %v2030_v61 }
  0x42   : > { %1916 = vmatprep.subr.bf16.mxu0 %v2032_v62  ;;  %1939 = vmatpush3.bf16.msra.mxu1 %v2035_v1 }
  0x43   : > { %1940 = vmatprep.subr.bf16.mxu1 %v2037_v5 }
  0x45   : > { %1917 = vmatpush3.bf16.msra.mxu0 %v2034_v9 }
  0x46   : > { %1918 = vmatprep.subr.bf16.mxu0 %v2036_v11  ;;  %1941 = vmatpush3.bf16.msra.mxu1 %v2039_v15 }
  0x49   : > { %1919 = vmatpush3.bf16.msra.mxu0 %v2038_v20  ;;  %1426 = vmatmul.mubr.bf16.vlgmr.msra.gmra.mrb[4].mxu1 %v1293_v32 }
  0x4c   : > { %1138 = vmatmul.mubr.bf16.vlgmr.msra.gmra.mrb[4].mxu0 %v1005_v26 }
  0xfc   : > { %v1898_v16 = vpop.f32.mrb[0].mxu1 }
  0xfd   : > { %v1899_v23 = vpop.f32.mrb[1].mxu1 }
  0xfe   : > { %v1900_v34 = vadd.f32 %v1899_v23, %v1898_v16  ;;  %v1901_v35 = vpop.f32.mrb[2].mxu1 }
  0xff   : > { %v1876_v33 = vpop.f32.mrb[0].mxu0  ;;  %v1902_v36 = vpop.f32.mrb[3].mxu1 }
 0x100   : > { %v1877_v63 = vpop.f32.mrb[1].mxu0  ;;  %v1903_v39 = vadd.f32 %v1902_v36, %v1901_v35 }
 0x101   : > { %v1878_v37 = vadd.f32 %v1877_v63, %v1876_v33  ;;  %v1879_v38 = vpop.f32.mrb[2].mxu0 }
 0x102   : > { %v1880_v28 = vpop.f32.mrb[3].mxu0 }
 0x103   : > { %v913_v40 = vadd.f32 %v1900_v34, %v1878_v37  ;;  %v1881_v41 = vadd.f32 %v1880_v28, %v1879_v38 }
 0x105   : > { %v916_v42 = vadd.f32 %v1903_v39, %v1881_v41 }
 0x11c   : > { %v1942_v47 = vpop.f32.mrb[4].mxu1 }
 0x11d   : > { %v1943_v50 = vpop.f32.mrb[5].mxu1 }
 0x11e   : > { %v1944_v51 = vadd.f32 %v1943_v50, %v1942_v47  ;;  %v1945_v52 = vpop.f32.mrb[6].mxu1 }
 0x11f   : > { %v1920_v25 = vpop.f32.mrb[4].mxu0  ;;  %v1946_v55 = vpop.f32.mrb[7].mxu1 }
 0x120   : > { %v1921_v43 = vpop.f32.mrb[5].mxu0  ;;  %v1947_v57 = vadd.f32 %v1946_v55, %v1945_v52 }
 0x121   : > { %v1922_v44 = vadd.f32 %v1921_v43, %v1920_v25  ;;  %v1923_v45 = vpop.f32.mrb[6].mxu0 }
 0x122   : > { %v1924_v46 = vpop.f32.mrb[7].mxu0 }
 0x123   : > { %v1146_v48 = vadd.f32 %v1922_v44, %v913_v40  ;;  %v1925_v49 = vadd.f32 %v1924_v46, %v1923_v45 }
 0x125   : > { %v1147_v53 = vadd.f32 %v1925_v49, %v916_v42  ;;  %v1434_v56 = vadd.f32 %v1944_v51, %v1146_v48 }
 0x127   : > { %v1443_v58 = vadd.f32 %v1845_v54, %v1434_v56  ;;  %v1435_v59 = vadd.f32 %v1947_v57, %v1147_v53 }
 0x129   : > { %v1444_v60 = vadd.f32 %v1845_v54, %v1435_v59  ;;  %v1453_v61 = vmul.f32 %v1443_v58, %v1443_v58 }
 0x12b   : > { %v1445_v62 = vadd.f32 %v1444_v60, %v1443_v58  ;;  %v1454_v0 = vmul.f32 %v1444_v60, %v1444_v60  ;;  %v1858_v1 = vpack.c.bf16 %v1444_v60, %v1443_v58 }
 0x12d   : > { %v1446_v2 = vrot.slane %v1445_v62, 4  ;;  %v1455_v3 = vadd.f32 %v1454_v0, %v1453_v61  ;;  %1859 = vst [vmem:[%s386_s28] sm:$0xff] %v1858_v1  }
 0x12f   : > { %v1447_v4 = vadd.f32 %v1446_v2, %v1445_v62  ;;  %v1456_v5 = vrot.slane %v1455_v3, 4 }
 0x131   : > { %v1448_v6 = vrot.slane %v1447_v4, 2  ;;  %v1457_v7 = vadd.f32 %v1456_v5, %v1455_v3 }
 0x133   : > { %v1449_v8 = vadd.f32 %v1448_v6, %v1447_v4  ;;  %v1458_v9 = vrot.slane %v1457_v7, 2 }
 0x135   : > { %v1450_v10 = vrot.slane %v1449_v8, 1  ;;  %v1459_v11 = vadd.f32 %v1458_v9, %v1457_v7 }
 0x137   : > { %v1451_v12 = vadd.f32 %v1450_v10, %v1449_v8  ;;  %v1460_v13 = vrot.slane %v1459_v11, 1 }
 0x139   : > { %1452 = vst [vmem:[%s393_s7] sm:$0x1] %v1451_v12  ;;  %v1461_v14 = vadd.f32 %v1460_v13, %v1459_v11 }
 0x13b   : > { %1462 = vst [vmem:[%s399_s10] sm:$0x1] %v1461_v14 }
 0x13c PF: > { %s17_s23 = sadd.s32 1, %s2062_s23   ;;  %s2424_s21 = smov %s2058_s22 }
 0x13d   : > { %p14_p5 = scmp.ge.s32.totalorder %s17_s23, 4   ;;  %s2425_s22 = smov %s2427_s24 }
 0x13f   :  { %16 = sbr.rel (!%p14_p5) target bundleno = 2 (0x2), region = 97 }

// kernel: _forward_impl.7
= control target key start
LH: loop header
LB: loop body
LE: loop exit
PB: predicated region body
PF: predicated region fallthrough
CT: control target
= control target key end

     0   :  { %s2757_s17 = smov 0   ;;  %s2759_s18 = smov 0   ;;  %s3229_s0 = inlined_call_operand.vmem [shape: bf16[2,3,3,512], index: 0, kind: input, shape index: {}, may-alias: {0,1}]   ;;  %s3230_s1 = inlined_call_operand.vmem [shape: bf16[2,3,3,512], index: 1, kind: input, shape index: {}, may-alias: {0,1}]   ;;  %s3231_s2 = inlined_call_operand.vmem [shape: bf16[4,512,1], index: 2, kind: input, shape index: {}]   ;;  %s3232_s3 = inlined_call_operand.<no memory space> [shape: f32[1,1], index: 3, kind: input, shape index: {}]   ;;  %s3233_s4 = inlined_call_operand.vmem [shape: f32[2,4,1], index: 4, kind: output, shape index: {}]  }
   0x1   :  { %v9_v0 = vstv %s3232_s3  ;;  %s2761_s19 = smov 0  }
   0x2   :  { %10 = vst [vmem:[#allocation2] sm:$0x1] %v9_v0 }
   0x3 LB: > { %s28_s3 = sadd.s32 1, %s2722_s18  ;;  %p2025_p0 = scmp.ge.s32.totalorder %s2726_s19, 1  ;;  %s2726_s19 = sphi %s2761_s19, %s16_s19   ;;  %s2722_s18 = sphi %s2759_s18, %s3237_s18   ;;  %s2718_s17 = sphi %s2757_s17, %s3236_s17  }
   0x4   : > { %p30_p1 = scmp.ge.s32.totalorder %s28_s3, 2  ;;  %p220_p2 = scmp.lt.s32.totalorder %s2726_s19, 3 }
   0x6   : > { %s3239_s3 = smov (%p30_p1, %s28_s3), 0  ;;  %p221_p3 = pnand %p2025_p0, %p220_p2 }
   0x7   : > { %v2572_v1 = vld [vmem:[%s3231_s2 + $0x140] sm:$0xff] (!%p221_p3)   ;;  %p275_p4 = scmp.lt.s32.totalorder (!%p221_p3), %s2718_s17, 1  ;;  %v2576_v5 = vld [vmem:[%s3231_s2 + $0x148] sm:$0xff] (!%p221_p3)   ;;  %v2580_v9 = vld [vmem:[%s3231_s2 + $0x150] sm:$0xff] (!%p221_p3)   ;;  %vm413_vm0 = vsmask.f32 (!%p221_p3), 256  ;;  %v515_v37 = vlaneseq (!%p221_p3) }
   0x8   : > { %224 = sbr.rel (%p221_p3) target bundleno = 391 (0x187), region = 36  ;;  %v2573_v2 = vld [vmem:[%s3231_s2 + $0x1c0] sm:$0xff] (!%p221_p3)   ;;  %2368 = vmatprep.subr.bf16.mxu0 (!%p221_p3), %v2572_v1  ;;  %v2577_v6 = vld [vmem:[%s3231_s2 + $0x1c8] sm:$0xff] (!%p221_p3)   ;;  %v2581_v10 = vld [vmem:[%s3231_s2 + $0x1d0] sm:$0xff] (!%p221_p3)   ;;  %vm414_vm1 = vsmask.f32 (!%p221_p3), 1284 }
   0x9   : > { %v2574_v3 = vld [vmem:[%s3231_s2 + $0x100] sm:$0xff] (!%p221_p3)   ;;  %2390 = vmatprep.subr.bf16.mxu1 (!%p221_p3), %v2573_v2  ;;  %v2578_v7 = vld [vmem:[%s3231_s2 + $0x108] sm:$0xff] (!%p221_p3)   ;;  %v2582_v11 = vld [vmem:[%s3231_s2 + $0x110] sm:$0xff] (!%p221_p3)   ;;  %vm416_vm3 = vsmask.f32 (!%p221_p3), 2312  ;;  %v516_v45 = vshrl.u32 (!%p221_p3), %v515_v37, 7 }
   0xa   : > { %v2575_v4 = vld [vmem:[%s3231_s2 + $0x180] sm:$0xff] (!%p221_p3)   ;;  %2369 = vmatpush3.bf16.msra.mxu0 (!%p221_p3), %v2574_v3  ;;  %v2579_v8 = vld [vmem:[%s3231_s2 + $0x188] sm:$0xff] (!%p221_p3)   ;;  %v2583_v12 = vld [vmem:[%s3231_s2 + $0x190] sm:$0xff] (!%p221_p3)   ;;  %vm418_vm4 = vsmask.f32 (!%p221_p3), 3340  ;;  %vm1918_vm15 = vcmask (!%p221_p3), 3072  }
   0xb   : > { %2391 = vmatpush3.bf16.msra.mxu1 (!%p221_p3), %v2575_v4  ;;  %2370 = vmatprep.subr.bf16.mxu0 (!%p221_p3), %v2576_v5  ;;  %v2584_v13 = vld [vmem:[%s3231_s2 + $0x158] sm:$0xff] (!%p221_p3)   ;;  %v2588_v17 = vld [vmem:[%s3231_s2 + $0x160] sm:$0xff] (!%p221_p3)   ;;  %v2592_v21 = vld [vmem:[%s3231_s2 + $0x168] sm:$0xff] (!%p221_p3)   ;;  %vm420_vm5 = vsmask.f32 (!%p221_p3), 4368 }
   0xc   : > { %2392 = vmatprep.subr.bf16.mxu1 (!%p221_p3), %v2577_v6  ;;  %v2585_v14 = vld [vmem:[%s3231_s2 + $0x1d8] sm:$0xff] (!%p221_p3)   ;;  %v2589_v18 = vld [vmem:[%s3231_s2 + $0x1e0] sm:$0xff] (!%p221_p3)   ;;  %v2593_v22 = vld [vmem:[%s3231_s2 + $0x1e8] sm:$0xff] (!%p221_p3)   ;;  %vm422_vm7 = vsmask.f32 (!%p221_p3), 5396 }
   0xd   : > { %v2586_v15 = vld [vmem:[%s3231_s2 + $0x118] sm:$0xff] (!%p221_p3)   ;;  %v2590_v19 = vld [vmem:[%s3231_s2 + $0x120] sm:$0xff] (!%p221_p3)   ;;  %v2594_v23 = vld [vmem:[%s3231_s2 + $0x128] sm:$0xff] (!%p221_p3)   ;;  %vm424_vm8 = vsmask.f32 (!%p221_p3), 6424 }
   0xe   : > { %2371 = vmatpush3.bf16.msra.mxu0 (!%p221_p3), %v2578_v7  ;;  %v2587_v16 = vld [vmem:[%s3231_s2 + $0x198] sm:$0xff] (!%p221_p3)   ;;  %v2591_v20 = vld [vmem:[%s3231_s2 + $0x1a0] sm:$0xff] (!%p221_p3)   ;;  %v2595_v24 = vld [vmem:[%s3231_s2 + $0x1a8] sm:$0xff] (!%p221_p3)   ;;  %vm426_vm9 = vsmask.f32 (!%p221_p3), 7452 }
   0xf   : > { %s3241_s17 = smov (!%p275_p4, %s2718_s17), 1  ;;  %2393 = vmatpush3.bf16.msra.mxu1 %v2579_v8  ;;  %2372 = vmatprep.subr.bf16.mxu0 %v2580_v9  ;;  %v2596_v25 = vld [vmem:[%s3231_s2 + $0x170] sm:$0xff]   ;;  %v2600_v29 = vld [vmem:[%s3231_s2 + $0x178] sm:$0xff]   ;;  %vm415_vm2 = vmor %vm413_vm0, %vm414_vm1  ;;  %v2728_v43 = vmov 1966171168  }
  0x10   : > { %2394 = vmatprep.subr.bf16.mxu1 %v2581_v10  ;;  %v2597_v26 = vld [vmem:[%s3231_s2 + $0x1f0] sm:$0xff]   ;;  %s2544_s26 = smul.u32 24, %s3241_s17  ;;  %v2601_v30 = vld [vmem:[%s3231_s2 + $0x1f8] sm:$0xff]   ;;  %vm417_vm6 = vmor %vm415_vm2, %vm416_vm3  ;;  %v513_v44 = vunpack.c.l.s4 %v2728_v43 }
  0x11   : > { %v2598_v27 = vld [vmem:[%s3231_s2 + $0x130] sm:$0xff]   ;;  %v2602_v31 = vld [vmem:[%s3231_s2 + $0x138] sm:$0xff]   ;;  %vm419_vm10 = vmor %vm417_vm6, %vm418_vm4 }
  0x12   : > { %2373 = vmatpush3.bf16.msra.mxu0 %v2582_v11  ;;  %v2599_v28 = vld [vmem:[%s3231_s2 + $0x1b0] sm:$0xff]   ;;  %s2873_s11 = scalar_lea.vmem %s3229_s0, %s2544_s26  ;;  %v2603_v32 = vld [vmem:[%s3231_s2 + $0x1b8] sm:$0xff]   ;;  %vm421_vm11 = vmor %vm419_vm10, %vm420_vm5  ;;  %v514_v48 = vunpack.c.0.s8 %v513_v44  ;;  %s2367_s14 = sadd.s32 16, %s2544_s26 }
  0x13   : > { %2395 = vmatpush3.bf16.msra.mxu1 %v2583_v12  ;;  %2374 = vmatprep.subr.bf16.mxu0 %v2584_v13  ;;  %v2031_v33 = vld.sshfl [vmem:[%s2873_s11] sm:$0xff pattern:$0x75316420]  ;;  %v2032_v34 = vld.sshfl [vmem:[%s2873_s11 + $0x8] sm:$0xff pattern:$0x75316420]  ;;  %vm423_vm12 = vmor %vm421_vm11, %vm422_vm7  ;;  %s300_s27 = scalar_lea.vmem %s3230_s1, %s2367_s14 }
  0x14   : > { %2396 = vmatprep.subr.bf16.mxu1 %v2585_v14  ;;  %v404_v35 = vcombine.high %v2031_v33, %v2031_v33  ;;  %v412_v36 = vcombine.high %v2032_v34, %v2032_v34  ;;  %v429_v38 = vshrl.u32 %v2031_v33, 16  ;;  %v438_v40 = vshrl.u32 %v2032_v34, 16  ;;  %v2604_v42 = vld [vmem:[%s3231_s2 + $0x40] sm:$0xff]   ;;  %vm425_vm13 = vmor %vm423_vm12, %vm424_vm8  ;;  %v2608_v60 = vld [vmem:[%s3231_s2 + $0x48] sm:$0xff]  }
  0x15   : > { %v2605_v46 = vld [vmem:[%s3231_s2 + $0xc0] sm:$0xff]   ;;  %vm2890_vm14 = vmor %vm425_vm13, %vm426_vm9  ;;  %v2901_v52 = vsub.s32 %v514_v48, %v516_v45  ;;  %v2609_v62 = vld [vmem:[%s3231_s2 + $0xc8] sm:$0xff]  }
  0x16   : > { %2375 = vmatpush3.bf16.msra.mxu0 %v2586_v15  ;;  %v434_v39 = vshll.u32 %v404_v35, 16  ;;  %v443_v41 = vshll.u32 %v412_v36, 16  ;;  %v2606_v56 = vld [vmem:[%s3231_s2] sm:$0xff]   ;;  %v2610_v63 = vld [vmem:[%s3231_s2 + $0x8] sm:$0xff]   ;;  %v2612_v1 = vld [vmem:[%s3231_s2 + $0x50] sm:$0xff]  }
  0x17   : > { %2397 = vmatpush3.bf16.msra.mxu1 %v2587_v16  ;;  %2376 = vmatprep.subr.bf16.mxu0 %v2588_v17  ;;  %v2607_v58 = vld [vmem:[%s3231_s2 + $0x80] sm:$0xff]   ;;  %v2611_v0 = vld [vmem:[%s3231_s2 + $0x88] sm:$0xff]   ;;  %v2613_v2 = vld [vmem:[%s3231_s2 + $0xd0] sm:$0xff]  }
  0x18   : > { %2398 = vmatprep.subr.bf16.mxu1 %v2589_v18  ;;  %v436_v49 = vsel %vm2890_vm14, %v429_v38, %v434_v39  ;;  %v2898_v50 = vsel %vm2890_vm14, %v438_v40, %v443_v41  ;;  %v2614_v3 = vld [vmem:[%s3231_s2 + $0x10] sm:$0xff]   ;;  %v2616_v5 = vld [vmem:[%s3231_s2 + $0x58] sm:$0xff]   ;;  %v2620_v9 = vld [vmem:[%s3231_s2 + $0x60] sm:$0xff]  }
  0x19   : > { %v511_v51 = vcombine.low %v436_v49, %v2898_v50  ;;  %v2615_v4 = vld [vmem:[%s3231_s2 + $0x90] sm:$0xff]   ;;  %v2617_v6 = vld [vmem:[%s3231_s2 + $0xd8] sm:$0xff]   ;;  %v2621_v10 = vld [vmem:[%s3231_s2 + $0xe0] sm:$0xff]  }
  0x1a   : > { %2377 = vmatpush3.bf16.msra.mxu0 %v2590_v19  ;;  %v2618_v7 = vld [vmem:[%s3231_s2 + $0x18] sm:$0xff]   ;;  %v2622_v11 = vld [vmem:[%s3231_s2 + $0x20] sm:$0xff]   ;;  %v2624_v13 = vld [vmem:[%s3231_s2 + $0x68] sm:$0xff]  }
  0x1b   : > { %2399 = vmatpush3.bf16.msra.mxu1 %v2591_v20  ;;  %2378 = vmatprep.subr.bf16.mxu0 %v2592_v21  ;;  %v518_v53 = vrot.slane %v511_v51, %v2901_v52  ;;  %v2619_v8 = vld [vmem:[%s3231_s2 + $0x98] sm:$0xff]   ;;  %v2623_v12 = vld [vmem:[%s3231_s2 + $0xa0] sm:$0xff]   ;;  %v2625_v14 = vld [vmem:[%s3231_s2 + $0xe8] sm:$0xff]  }
  0x1c   : > { %2400 = vmatprep.subr.bf16.mxu1 %v2593_v22  ;;  %v2626_v15 = vld [vmem:[%s3231_s2 + $0x28] sm:$0xff]   ;;  %v2628_v17 = vld [vmem:[%s3231_s2 + $0x70] sm:$0xff]   ;;  %v2029_v18 = vld.sshfl [vmem:[%s2873_s11] sm:$0xf pattern:$0x75316420] }
  0x1d   : > { %v519_v54 = vcombine.high %v518_v53, %v518_v53  ;;  %v526_v55 = vrot.slane %v518_v53, %v2901_v52  ;;  %v2627_v16 = vld [vmem:[%s3231_s2 + $0xa8] sm:$0xff]   ;;  %v2629_v19 = vld [vmem:[%s3231_s2 + $0xf0] sm:$0xff]   ;;  %v2637_v33 = vld [vmem:[%s3231_s2 + $0x2c0] sm:$0xff]  }
  0x1e   : > { %2379 = vmatpush3.bf16.msra.mxu0 %v2594_v23  ;;  %v2630_v20 = vld [vmem:[%s3231_s2 + $0x30] sm:$0xff]   ;;  %v2983_v21 = vld.sshfl [vmem:[%s2873_s11 + $0x8] sm:$0xf pattern:$0x75316420]  ;;  %v2638_v34 = vld [vmem:[%s3231_s2 + $0x200] sm:$0xff]  }
  0x1f   : > { %2401 = vmatpush3.bf16.msra.mxu1 %v2595_v24  ;;  %2380 = vmatprep.subr.bf16.mxu0 %v2596_v25  ;;  %v533_v57 = vrot.slane %v519_v54, %v2901_v52  ;;  %v534_v59 = vcombine.high %v526_v55, %v526_v55  ;;  %v2631_v22 = vld [vmem:[%s3231_s2 + $0xb0] sm:$0xff]   ;;  %v812_v23 = vcombine.low %v2029_v18, %v2983_v21  ;;  %v2632_v24 = vld [vmem:[%s3231_s2 + $0x78] sm:$0xff]   ;;  %v2639_v36 = vld [vmem:[%s3231_s2 + $0x280] sm:$0xff]   ;;  %s2028_s11 = sshll.u32 %s3241_s17, 2 }
  0x20   : > { %2402 = vmatprep.subr.bf16.mxu1 %v2597_v26  ;;  %v2633_v25 = vld [vmem:[%s3231_s2 + $0xf8] sm:$0xff]   ;;  %v2640_v38 = vld [vmem:[%s3231_s2 + $0x248] sm:$0xff]   ;;  %v2645_v43 = vld [vmem:[%s3231_s2 + $0x2d0] sm:$0xff]   ;;  %s309_s15 = scalar_lea.vmem %s3233_s4, %s2028_s11 }
  0x21   : > { %764 = vmatprep.mubr.bf16.mxu0 %v533_v57  ;;  %v535_v61 = vcombine.high %v533_v57, %v533_v57  ;;  %v819_v26 = vrot.slane %v812_v23, %v2901_v52  ;;  %v2641_v39 = vld [vmem:[%s3231_s2 + $0x2c8] sm:$0xff]   ;;  %v2646_v44 = vld [vmem:[%s3231_s2 + $0x210] sm:$0xff]   ;;  %v2649_v48 = vld [vmem:[%s3231_s2 + $0x2d8] sm:$0xff]  }
  0x22   : > { %2381 = vmatpush3.bf16.msra.mxu0 %v2598_v27  ;;  %v2634_v27 = vld [vmem:[%s3231_s2 + $0x38] sm:$0xff]   ;;  %v2642_v40 = vld [vmem:[%s3231_s2 + $0x208] sm:$0xff]   ;;  %v2647_v45 = vld [vmem:[%s3231_s2 + $0x290] sm:$0xff]  }
  0x23   : > { %2403 = vmatpush3.bf16.msra.mxu1 %v2599_v28  ;;  %2382 = vmatprep.subr.bf16.mxu0 %v2600_v29  ;;  %v2635_v28 = vld [vmem:[%s3231_s2 + $0xb8] sm:$0xff]   ;;  %v820_v29 = vcombine.high %v819_v26, %v819_v26  ;;  %v2643_v41 = vld [vmem:[%s3231_s2 + $0x288] sm:$0xff]   ;;  %v2652_v53 = vld [vmem:[%s3231_s2 + $0x260] sm:$0xff]  }
  0x24   : > { %2404 = vmatprep.subr.bf16.mxu1 %v2601_v30  ;;  %804 = vmatprep.mubr.bf16.mxu1 %v535_v61  ;;  %v827_v30 = vrot.slane %v819_v26, %v2901_v52  ;;  %v2650_v49 = vld [vmem:[%s3231_s2 + $0x218] sm:$0xff]   ;;  %v2653_v54 = vld [vmem:[%s3231_s2 + $0x2e0] sm:$0xff]   ;;  %v2656_v57 = vld [vmem:[%s3231_s2 + $0x268] sm:$0xff]  }
  0x25   : > { %v2651_v51 = vld [vmem:[%s3231_s2 + $0x298] sm:$0xff]   ;;  %v2660_v61 = vld [vmem:[%s3231_s2 + $0x270] sm:$0xff]   ;;  %v2671_v23 = vld [vmem:[%s3231_s2 + $0x380] sm:$0xff]  }
  0x26   : > { %2383 = vmatpush3.bf16.msra.mxu0 %v2602_v31  ;;  %v2636_v31 = vld [vmem:[%s3231_s2 + $0x240] sm:$0xff]   ;;  %v835_v37 = vcombine.high %v827_v30, %v827_v30  ;;  %v2667_v47 = vld [vmem:[%s3231_s2 + $0x2b8] sm:$0xff]   ;;  %v2674_v26 = vld [vmem:[%s3231_s2 + $0x308] sm:$0xff]  }
  0x27   : > { %2405 = vmatpush3.bf16.msra.mxu1 %v2603_v32  ;;  %2412 = vmatprep.subr.bf16.mxu0 %v2604_v42  ;;  %v834_v32 = vrot.slane %v820_v29, %v2901_v52  ;;  %v2644_v42 = vld [vmem:[%s3231_s2 + $0x250] sm:$0xff]   ;;  %v2675_v29 = vld [vmem:[%s3231_s2 + $0x388] sm:$0xff]  }
  0x28   : > { %2434 = vmatprep.subr.bf16.mxu1 %v2605_v46  ;;  %v2648_v46 = vld [vmem:[%s3231_s2 + $0x258] sm:$0xff]  }
  0x29   : > { %765 = vmatmul.mubr.bf16.vlgmr.msra.gmra.mrb[0].mxu0 %v526_v55  ;;  %v836_v35 = vcombine.high %v834_v32, %v834_v32  ;;  %v2654_v55 = vld [vmem:[%s3231_s2 + $0x220] sm:$0xff]  }
  0x2a   : > { %2413 = vmatpush3.bf16.msra.mxu0 %v2606_v56  ;;  %805 = vmatmul.mubr.bf16.vlgmr.msra.gmra.mrb[0].mxu1 %v534_v59  ;;  %v2655_v56 = vld [vmem:[%s3231_s2 + $0x2a0] sm:$0xff]   ;;  %v2658_v59 = vld [vmem:[%s3231_s2 + $0x228] sm:$0xff]  }
  0x2b   : > { %2414 = vmatprep.subr.bf16.mxu0 %v2608_v60  ;;  %2435 = vmatpush3.bf16.msra.mxu1 %v2607_v58  ;;  %v2657_v58 = vld [vmem:[%s3231_s2 + $0x2e8] sm:$0xff]  }
  0x2c   : > { %2436 = vmatprep.subr.bf16.mxu1 %v2609_v62  ;;  %1065 = vmatprep.mubr.bf16.mxu0 %v834_v32  ;;  %v2659_v60 = vld [vmem:[%s3231_s2 + $0x2a8] sm:$0xff]   ;;  %v2661_v62 = vld [vmem:[%s3231_s2 + $0x2f0] sm:$0xff]   ;;  %v2680_v32 = vld [vmem:[%s3231_s2 + $0x358] sm:$0xff]  }
  0x2d   : > { %1105 = vmatprep.mubr.bf16.mxu1 %v836_v35  ;;  %v2682_v35 = vld [vmem:[%s3231_s2 + $0x318] sm:$0xff]  }
  0x2e   : > { %2415 = vmatpush3.bf16.msra.mxu0 %v2610_v63  ;;  %v2264_v63 = vld.sshfl [vmem:[%s300_s27] sm:$0xff pattern:$0x75316420] }
  0x2f   : > { %2416 = vmatprep.subr.bf16.mxu0 %v2612_v1  ;;  %2437 = vmatpush3.bf16.msra.mxu1 %v2611_v0  ;;  %v2662_v0 = vld [vmem:[%s3231_s2 + $0x230] sm:$0xff]   ;;  %v2165_v1 = vld.sshfl [vmem:[%s300_s27] sm:$0xf pattern:$0x75316420] }
  0x30   : > { %2438 = vmatprep.subr.bf16.mxu1 %v2613_v2  ;;  %v1518_v2 = vcombine.high %v2264_v63, %v2264_v63 }
  0x32   : > { %2417 = vmatpush3.bf16.msra.mxu0 %v2614_v3  ;;  %v1529_v3 = vshrl.u32 %v2264_v63, 16 }
  0x33   : > { %2418 = vmatprep.subr.bf16.mxu0 %v2616_v5  ;;  %2439 = vmatpush3.bf16.msra.mxu1 %v2615_v4  ;;  %v1197_v4 = vcombine.low %v2983_v21, %v2165_v1  ;;  %v2664_v5 = vld [vmem:[%s3231_s2 + $0x278] sm:$0xff]  }
  0x34   : > { %2440 = vmatprep.subr.bf16.mxu1 %v2617_v6  ;;  %v1534_v6 = vshll.u32 %v1518_v2, 16 }
  0x36   : > { %2419 = vmatpush3.bf16.msra.mxu0 %v2618_v7  ;;  %v2663_v7 = vld [vmem:[%s3231_s2 + $0x2b0] sm:$0xff]  }
  0x37   : > { %2420 = vmatprep.subr.bf16.mxu0 %v2620_v9  ;;  %2441 = vmatpush3.bf16.msra.mxu1 %v2619_v8  ;;  %v1204_v8 = vrot.slane %v1197_v4, %v2901_v52  ;;  %v2665_v9 = vld [vmem:[%s3231_s2 + $0x2f8] sm:$0xff]  }
  0x38   : > { %2442 = vmatprep.subr.bf16.mxu1 %v2621_v10  ;;  %v1536_v10 = vsel %vm2890_vm14, %v1529_v3, %v1534_v6 }
  0x3a   : > { %2421 = vmatpush3.bf16.msra.mxu0 %v2622_v11  ;;  %v2666_v11 = vld [vmem:[%s3231_s2 + $0x238] sm:$0xff]  }
  0x3b   : > { %2422 = vmatprep.subr.bf16.mxu0 %v2624_v13  ;;  %2443 = vmatpush3.bf16.msra.mxu1 %v2623_v12  ;;  %v1205_v12 = vcombine.high %v1204_v8, %v1204_v8  ;;  %v1602_v13 = vcombine.low %v2898_v50, %v1536_v10  ;;  %v2669_v50 = vld [vmem:[%s3231_s2 + $0x3c0] sm:$0xff]  }
  0x3c   : > { %2444 = vmatprep.subr.bf16.mxu1 %v2625_v14  ;;  %v1212_v14 = vrot.slane %v1204_v8, %v2901_v52 }
  0x3e   : > { %2423 = vmatpush3.bf16.msra.mxu0 %v2626_v15  ;;  %v2668_v15 = vld [vmem:[%s3231_s2 + $0x340] sm:$0xff]   ;;  %v1220_v21 = vcombine.high %v1212_v14, %v1212_v14 }
  0x3f   : > { %2424 = vmatprep.subr.bf16.mxu0 %v2628_v17  ;;  %2445 = vmatpush3.bf16.msra.mxu1 %v2627_v16  ;;  %v1219_v16 = vrot.slane %v1205_v12, %v2901_v52  ;;  %v3116_v17 = vrot.slane %v1602_v13, %v2901_v52 }
  0x40   : > { %2446 = vmatprep.subr.bf16.mxu1 %v2629_v19  ;;  %v2670_v19 = vld [vmem:[%s3231_s2 + $0x300] sm:$0xff]  }
  0x41   : > { %v1221_v18 = vcombine.high %v1219_v16, %v1219_v16 }
  0x42   : > { %2425 = vmatpush3.bf16.msra.mxu0 %v2630_v20  ;;  %v1610_v20 = vcombine.high %v3116_v17, %v3116_v17 }
  0x43   : > { %2426 = vmatprep.subr.bf16.mxu0 %v2632_v24  ;;  %2447 = vmatpush3.bf16.msra.mxu1 %v2631_v22  ;;  %v2672_v22 = vld [vmem:[%s3231_s2 + $0x348] sm:$0xff]  }
  0x44   : > { %2448 = vmatprep.subr.bf16.mxu1 %v2633_v25  ;;  %v1624_v24 = vrot.slane %v1610_v20, %v2901_v52  ;;  %v2673_v25 = vld [vmem:[%s3231_s2 + $0x3c8] sm:$0xff]  }
  0x46   : > { %2427 = vmatpush3.bf16.msra.mxu0 %v2634_v27  ;;  %v1626_v27 = vcombine.high %v1624_v24, %v1624_v24 }
  0x47   : > { %2456 = vmatprep.subr.bf16.mxu0 %v2636_v31  ;;  %2449 = vmatpush3.bf16.msra.mxu1 %v2635_v28  ;;  %v2676_v28 = vld [vmem:[%s3231_s2 + $0x350] sm:$0xff]  }
  0x48   : > { %2478 = vmatprep.subr.bf16.mxu1 %v2637_v33  ;;  %v2678_v31 = vld [vmem:[%s3231_s2 + $0x310] sm:$0xff]  }
  0x49   : > { %1066 = vmatmul.mubr.bf16.vlgmr.msra.gmra.mrb[4].mxu0 %v827_v30  ;;  %v2677_v30 = vld [vmem:[%s3231_s2 + $0x3d0] sm:$0xff]  }
  0x4a   : > { %2457 = vmatpush3.bf16.msra.mxu0 %v2638_v34  ;;  %1106 = vmatmul.mubr.bf16.vlgmr.msra.gmra.mrb[4].mxu1 %v835_v37  ;;  %v2679_v33 = vld [vmem:[%s3231_s2 + $0x390] sm:$0xff]   ;;  %v2681_v34 = vld [vmem:[%s3231_s2 + $0x3d8] sm:$0xff]  }
  0x4b   : > { %2458 = vmatprep.subr.bf16.mxu0 %v2640_v38  ;;  %2479 = vmatpush3.bf16.msra.mxu1 %v2639_v36  ;;  %v2684_v36 = vld [vmem:[%s3231_s2 + $0x360] sm:$0xff]   ;;  %v2683_v37 = vld [vmem:[%s3231_s2 + $0x398] sm:$0xff]  }
  0x4c   : > { %2480 = vmatprep.subr.bf16.mxu1 %v2641_v39  ;;  %1450 = vmatprep.mubr.bf16.mxu0 %v1219_v16  ;;  %v2685_v38 = vld [vmem:[%s3231_s2 + $0x3e0] sm:$0xff]  }
  0x4d   : > { %1490 = vmatprep.mubr.bf16.mxu1 %v1221_v18  ;;  %v2686_v39 = vld [vmem:[%s3231_s2 + $0x320] sm:$0xff]  }
  0x4e   : > { %2459 = vmatpush3.bf16.msra.mxu0 %v2642_v40  ;;  %v2688_v40 = vld [vmem:[%s3231_s2 + $0x368] sm:$0xff]  }
  0x4f   : > { %2460 = vmatprep.subr.bf16.mxu0 %v2644_v42  ;;  %2481 = vmatpush3.bf16.msra.mxu1 %v2643_v41  ;;  %v2687_v41 = vld [vmem:[%s3231_s2 + $0x3a0] sm:$0xff]   ;;  %v2689_v42 = vld [vmem:[%s3231_s2 + $0x3e8] sm:$0xff]  }
  0x50   : > { %2482 = vmatprep.subr.bf16.mxu1 %v2645_v43  ;;  %v2690_v43 = vld [vmem:[%s3231_s2 + $0x328] sm:$0xff]  }
  0x52   : > { %2461 = vmatpush3.bf16.msra.mxu0 %v2646_v44  ;;  %v2692_v44 = vld [vmem:[%s3231_s2 + $0x370] sm:$0xff]  }
  0x53   : > { %2462 = vmatprep.subr.bf16.mxu0 %v2648_v46  ;;  %2483 = vmatpush3.bf16.msra.mxu1 %v2647_v45  ;;  %v2691_v45 = vld [vmem:[%s3231_s2 + $0x3a8] sm:$0xff]   ;;  %v2693_v46 = vld [vmem:[%s3231_s2 + $0x3f0] sm:$0xff]  }
  0x54   : > { %2484 = vmatprep.subr.bf16.mxu1 %v2649_v48  ;;  %v2694_v48 = vld [vmem:[%s3231_s2 + $0x330] sm:$0xff]  }
  0x56   : > { %2463 = vmatpush3.bf16.msra.mxu0 %v2650_v49  ;;  %v2696_v49 = vld [vmem:[%s3231_s2 + $0x378] sm:$0xff]  }
  0x57   : > { %2464 = vmatprep.subr.bf16.mxu0 %v2652_v53  ;;  %2485 = vmatpush3.bf16.msra.mxu1 %v2651_v51  ;;  %v2695_v51 = vld [vmem:[%s3231_s2 + $0x3b0] sm:$0xff]   ;;  %v2697_v53 = vld [vmem:[%s3231_s2 + $0x3f8] sm:$0xff]  }
  0x58   : > { %2486 = vmatprep.subr.bf16.mxu1 %v2653_v54  ;;  %v2698_v54 = vld [vmem:[%s3231_s2 + $0x338] sm:$0xff]  }
  0x5a   : > { %2465 = vmatpush3.bf16.msra.mxu0 %v2654_v55  ;;  %v1617_v55 = vrot.slane %v3116_v17, %v2901_v52 }
  0x5b   : > { %2466 = vmatprep.subr.bf16.mxu0 %v2656_v57  ;;  %2487 = vmatpush3.bf16.msra.mxu1 %v2655_v56  ;;  %v2699_v56 = vld [vmem:[%s3231_s2 + $0x3b8] sm:$0xff]  }
  0x5c   : > { %2488 = vmatprep.subr.bf16.mxu1 %v2657_v58  ;;  %v1625_v57 = vcombine.high %v1617_v55, %v1617_v55 }
  0x5e   : > { %2467 = vmatpush3.bf16.msra.mxu0 %v2658_v59 }
  0x5f   : > { %2468 = vmatprep.subr.bf16.mxu0 %v2660_v61  ;;  %2489 = vmatpush3.bf16.msra.mxu1 %v2659_v60 }
  0x60   : > { %2490 = vmatprep.subr.bf16.mxu1 %v2661_v62 }
  0x62   : > { %2469 = vmatpush3.bf16.msra.mxu0 %v2662_v0 }
  0x63   : > { %2470 = vmatprep.subr.bf16.mxu0 %v2664_v5  ;;  %2491 = vmatpush3.bf16.msra.mxu1 %v2663_v7 }
  0x64   : > { %2492 = vmatprep.subr.bf16.mxu1 %v2665_v9 }
  0x66   : > { %2471 = vmatpush3.bf16.msra.mxu0 %v2666_v11 }
  0x67   : > { %2500 = vmatprep.subr.bf16.mxu0 %v2668_v15  ;;  %2493 = vmatpush3.bf16.msra.mxu1 %v2667_v47 }
  0x68   : > { %2522 = vmatprep.subr.bf16.mxu1 %v2669_v50 }
  0x69   : > { %1451 = vmatmul.mubr.bf16.vlgmr.msra.gmra.mrb[8].mxu0 %v1212_v14 }
  0x6a   : > { %2501 = vmatpush3.bf16.msra.mxu0 %v2670_v19  ;;  %1855 = vmatprep.mubr.bf16.mxu0 %v1624_v24 }
  0x6b   : > { %1491 = vmatmul.mubr.bf16.vlgmr.msra.gmra.mrb[8].mxu1 %v1220_v21  ;;  %2502 = vmatprep.subr.bf16.mxu0 %v2672_v22 }
  0x6c   : > { %2523 = vmatpush3.bf16.msra.mxu1 %v2671_v23  ;;  %1895 = vmatprep.mubr.bf16.mxu1 %v1626_v27 }
  0x6d   : > { %2524 = vmatprep.subr.bf16.mxu1 %v2673_v25 }
  0x6e   : > { %2503 = vmatpush3.bf16.msra.mxu0 %v2674_v26 }
  0x6f   : > { %2504 = vmatprep.subr.bf16.mxu0 %v2676_v28 }
  0x70   : > { %2525 = vmatpush3.bf16.msra.mxu1 %v2675_v29 }
  0x71   : > { %2526 = vmatprep.subr.bf16.mxu1 %v2677_v30 }
  0x72   : > { %2505 = vmatpush3.bf16.msra.mxu0 %v2678_v31 }
  0x73   : > { %2506 = vmatprep.subr.bf16.mxu0 %v2680_v32 }
  0x74   : > { %2527 = vmatpush3.bf16.msra.mxu1 %v2679_v33 }
  0x75   : > { %2528 = vmatprep.subr.bf16.mxu1 %v2681_v34 }
  0x76   : > { %2507 = vmatpush3.bf16.msra.mxu0 %v2682_v35 }
  0x77   : > { %2508 = vmatprep.subr.bf16.mxu0 %v2684_v36 }
  0x78   : > { %2529 = vmatpush3.bf16.msra.mxu1 %v2683_v37  ;;  %v2363_v37 = vld [vmem:[#allocation2] ss:$0 sm:$0xff] }
  0x79   : > { %2530 = vmatprep.subr.bf16.mxu1 %v2685_v38 }
  0x7a   : > { %2509 = vmatpush3.bf16.msra.mxu0 %v2686_v39 }
  0x7b   : > { %2510 = vmatprep.subr.bf16.mxu0 %v2688_v40 }
  0x7c   : > { %2531 = vmatpush3.bf16.msra.mxu1 %v2687_v41 }
  0x7d   : > { %2532 = vmatprep.subr.bf16.mxu1 %v2689_v42 }
  0x7e   : > { %2511 = vmatpush3.bf16.msra.mxu0 %v2690_v43 }
  0x7f   : > { %2512 = vmatprep.subr.bf16.mxu0 %v2692_v44 }
  0x80   : > { %2533 = vmatpush3.bf16.msra.mxu1 %v2691_v45 }
  0x81   : > { %2534 = vmatprep.subr.bf16.mxu1 %v2693_v46 }
  0x82   : > { %2513 = vmatpush3.bf16.msra.mxu0 %v2694_v48 }
  0x83   : > { %2514 = vmatprep.subr.bf16.mxu0 %v2696_v49 }
  0x84   : > { %2535 = vmatpush3.bf16.msra.mxu1 %v2695_v51 }
  0x85   : > { %2536 = vmatprep.subr.bf16.mxu1 %v2697_v53 }
  0x86   : > { %2515 = vmatpush3.bf16.msra.mxu0 %v2698_v54 }
  0x88   : > { %2537 = vmatpush3.bf16.msra.mxu1 %v2699_v56 }
  0x89   : > { %1856 = vmatmul.mubr.bf16.vlgmr.msra.gmra.mrb[12].mxu0 %v1617_v55 }
  0x8b   : > { %1896 = vmatmul.mubr.bf16.vlgmr.msra.gmra.mrb[12].mxu1 %v1625_v57 }
  0xfc   : > { %v2384_v58 = vpop.f32.mrb[0].mxu0 }
  0xfd   : > { %v2385_v59 = vpop.f32.mrb[1].mxu0  ;;  %v2406_v60 = vpop.f32.mrb[0].mxu1 }
  0xfe   : > { %v2386_v61 = vadd.f32 %v2385_v59, %v2384_v58  ;;  %v2387_v62 = vpop.f32.mrb[2].mxu0  ;;  %v2407_v63 = vpop.f32.mrb[1].mxu1 }
  0xff   : > { %v2388_v0 = vpop.f32.mrb[3].mxu0  ;;  %v2408_v1 = vadd.f32 %v2407_v63, %v2406_v60  ;;  %v2409_v52 = vpop.f32.mrb[2].mxu1 }
 0x100   : > { %v2410_v2 = vpop.f32.mrb[3].mxu1 }
 0x101   : > { %v807_v3 = vadd.f32 %v2408_v1, %v2386_v61 }
 0x11c   : > { %v2428_v4 = vpop.f32.mrb[4].mxu0 }
 0x11d   : > { %v2429_v5 = vpop.f32.mrb[5].mxu0  ;;  %v2450_v6 = vpop.f32.mrb[4].mxu1 }
 0x11e   : > { %v2430_v7 = vadd.f32 %v2429_v5, %v2428_v4  ;;  %v2431_v8 = vpop.f32.mrb[6].mxu0  ;;  %v2451_v9 = vpop.f32.mrb[5].mxu1 }
 0x11f   : > { %v2432_v10 = vpop.f32.mrb[7].mxu0  ;;  %v2452_v12 = vadd.f32 %v2451_v9, %v2450_v6  ;;  %v2453_v13 = vpop.f32.mrb[6].mxu1 }
 0x120   : > { %v1068_v11 = vadd.f32 %v2430_v7, %v807_v3  ;;  %v2454_v14 = vpop.f32.mrb[7].mxu1 }
 0x122   : > { %v1108_v15 = vadd.f32 %v2452_v12, %v1068_v11 }
 0x13c   : > { %v2472_v47 = vpop.f32.mrb[8].mxu0 }
 0x13d   : > { %v2473_v16 = vpop.f32.mrb[9].mxu0 }
 0x13e   : > { %v2494_v17 = vpop.f32.mrb[8].mxu1  ;;  %v2474_v50 = vadd.f32 %v2473_v16, %v2472_v47  ;;  %v2475_v18 = vpop.f32.mrb[10].mxu0 }
 0x13f   : > { %v2495_v19 = vpop.f32.mrb[9].mxu1  ;;  %v2476_v20 = vpop.f32.mrb[11].mxu0 }
 0x140   : > { %v2496_v21 = vadd.f32 %v2495_v19, %v2494_v17  ;;  %v2497_v22 = vpop.f32.mrb[10].mxu1 }
 0x141   : > { %v2498_v23 = vpop.f32.mrb[11].mxu1 }
 0x142   : > { %v1493_v24 = vadd.f32 %v2496_v21, %v2474_v50 }
 0x144   : > { %v1498_v25 = vadd.f32 %v1493_v24, %v1108_v15 }
 0x15c   : > { %v2516_v26 = vpop.f32.mrb[12].mxu0 }
 0x15d   : > { %v2517_v27 = vpop.f32.mrb[13].mxu0 }
 0x15e   : > { %v2538_v28 = vpop.f32.mrb[12].mxu1  ;;  %v2518_v29 = vadd.f32 %v2517_v27, %v2516_v26  ;;  %v2519_v30 = vpop.f32.mrb[14].mxu0 }
 0x15f   : > { %v2539_v31 = vpop.f32.mrb[13].mxu1  ;;  %v2520_v32 = vpop.f32.mrb[15].mxu0 }
 0x160   : > { %v2540_v33 = vadd.f32 %v2539_v31, %v2538_v28  ;;  %v2541_v34 = vpop.f32.mrb[14].mxu1 }
 0x161   : > { %v2542_v35 = vpop.f32.mrb[15].mxu1 }
 0x162   : > { %v1898_v36 = vadd.f32 %v2540_v33, %v2518_v29 }
 0x164   : > { %v1903_v38 = vadd.f32 %v1898_v36, %v1498_v25 }
 0x166   : > { %v1911_v39 = vadd.f32 %v2363_v37, %v1903_v38 }
 0x168   : > { %v1912_v40 = vsub.f32 0.0, %v1911_v39 }
 0x16a   : > { %v1913_v41 = vmul.f32 1.442695, %v1912_v40 }
 0x16c   : > { %2700 = vpow2.f32 %v1913_v41 }
 0x176   : > { %v2701_v42 = vpop.eup %2700 }
 0x177   : > { %v1915_v43 = vadd.f32 1.0, %v2701_v42 }
 0x179   : > { %2702 = vrcp.f32 %v1915_v43 }
 0x183   : > { %v2703_v44 = vpop.eup %2702 }
 0x184   : > { %v1917_v45 = vmin.f32 %v2703_v44, 1.0 }
 0x186   : > { %1919 = vst.msk [vmem:[%s309_s15] sm:$0xf] %vm1918_vm15, %v1917_v45 }
 0x187 PF: > { %s16_s19 = sadd.s32 1, %s2726_s19   ;;  %s3236_s17 = smov %s2722_s18 }
 0x188   : > { %p13_p5 = scmp.ge.s32.totalorder %s16_s19, 4   ;;  %s3237_s18 = smov %s3239_s3 }
 0x18a   :  { %15 = sbr.rel (!%p13_p5) target bundleno = 3 (0x3), region = 73 }

</bundles_post_ra>
